<compile_context>
chip_gen: v5e
topology: v5e:2x2
jax: 0.10.0
libtpu: 0.0.40
codegen_flags: <defaults>
</compile_context>

<pallas_src>
import functools

import jax
import jax.numpy as jnp
from jax.experimental import pallas as pl
from jax.experimental.pallas import tpu as pltpu


def _round_up(x, m):
    return (x + m - 1) // m * m


def _lstm_chunk_kernel(preact_ref, whh_hbm_ref, out_ref, h_scr, c_scr, w_scr,
                       *, hid_pad, time_chunk):
    """Processes `time_chunk` LSTM steps per grid iteration.

    preact_ref : (time_chunk, TB, 4*hid_pad) f32  (x@W_ih^T + b, gate-padded)
    whh_hbm_ref: (hid_pad, 4*hid_pad) bf16, raw HBM ref (memory_space=pl.ANY)
    out_ref    : (time_chunk, TB, hid_pad) f32
    h_scr,c_scr: (TB, hid_pad) f32 persistent recurrent state
    w_scr      : (hid_pad, 4*hid_pad) bf16 resident recurrent weight
    """
    t_blk = pl.program_id(1)

    @pl.when(t_blk == 0)
    def _():
        # Copy the constant recurrent weight into VMEM once per batch tile
        # (avoids pipeline double-buffering of a constant input) and reset the
        # recurrent state (hidden_state is None -> zero init, PyTorch default).
        pltpu.sync_copy(whh_hbm_ref, w_scr)
        h_scr[...] = jnp.zeros_like(h_scr)
        c_scr[...] = jnp.zeros_like(c_scr)

    H = hid_pad

    def step(s, carry):
        h_prev = h_scr[...]                       # (TB, H) f32
        c_prev = c_scr[...]                       # (TB, H) f32
        # Recurrent projection on the MXU: bf16 x bf16 -> f32 accumulate.
        rec = jnp.dot(h_prev.astype(jnp.bfloat16), w_scr[...],
                      preferred_element_type=jnp.float32)
        gates = preact_ref[s] + rec               # (TB, 4H) f32
        # Lane-aligned gate slices (H is a multiple of 128).
        i_g = jax.nn.sigmoid(gates[:, 0 * H:1 * H])
        f_g = jax.nn.sigmoid(gates[:, 1 * H:2 * H])
        g_g = jnp.tanh(gates[:, 2 * H:3 * H])
        o_g = jax.nn.sigmoid(gates[:, 3 * H:4 * H])
        c_new = f_g * c_prev + i_g * g_g
        h_new = o_g * jnp.tanh(c_new)
        c_scr[...] = c_new
        h_scr[...] = h_new
        out_ref[s] = h_new.astype(out_ref.dtype)  # dense, unmasked lane store
        return carry

    jax.lax.fori_loop(0, time_chunk, step, 0, unroll=True)


def basic_unit_lstm(x, w_ih, w_hh, b_ih, b_hh, *, droprate=0.5, training=False,
                    time_chunk=None, batch_tile=None):
    """
    Pallas implementation of BasicUnit('lstm', input_dim, hid_dim, droprate).forward.

    x     : (seq_len, batch, input_dim)
    w_ih  : (4*hid, input_dim)   (PyTorch weight_ih_l0)
    w_hh  : (4*hid, hid)         (PyTorch weight_hh_l0)
    b_ih  : (4*hid,)
    b_hh  : (4*hid,)
    returns (seq_len, batch, hid_dim) float32
    """
    seq_len, batch, input_dim = x.shape
    hid_dim = w_hh.shape[1]

    # ---- padding: lanes (gates -> multiple of 128), sublanes (batch -> 8),
    # ---- time (-> multiple of time_chunk) ------------------------------
    H_pad = _round_up(hid_dim, 128)
    if batch_tile is None:
        TB = _round_up(batch, 8)
        B_pad = TB
    else:
        TB = _round_up(batch_tile, 8)
        B_pad = _round_up(batch, TB)
    nb = B_pad // TB
    if time_chunk is None:
        time_chunk = min(seq_len, 16)
    nt = -(-seq_len // time_chunk)
    T_pad = nt * time_chunk

    x = jnp.asarray(x, jnp.float32)
    w_ih = jnp.asarray(w_ih, jnp.float32)
    w_hh = jnp.asarray(w_hh, jnp.float32)
    bias = jnp.asarray(b_ih, jnp.float32) + jnp.asarray(b_hh, jnp.float32)

    # ---- hoisted input projection: one big bf16 MXU matmul + bias -------
    preact = jnp.dot(
        x.reshape(seq_len * batch, input_dim).astype(jnp.bfloat16),
        w_ih.T.astype(jnp.bfloat16),
        preferred_element_type=jnp.float32,
    ) + bias[None, :]
    # Gate-wise pad hid_dim -> H_pad so each gate occupies whole 128-lane groups.
    preact = preact.reshape(seq_len, batch, 4, hid_dim)
    preact = jnp.pad(preact, ((0, T_pad - seq_len), (0, B_pad - batch),
                              (0, 0), (0, H_pad - hid_dim)))
    preact = preact.reshape(T_pad, B_pad, 4 * H_pad)

    # ---- recurrent weight: transpose, gate-pad, bf16 --------------------
    # Zero padding keeps padded h/c lanes exactly 0 for the whole recurrence.
    whh_t = w_hh.T.reshape(hid_dim, 4, hid_dim)
    whh_t = jnp.pad(whh_t, ((0, H_pad - hid_dim), (0, 0), (0, H_pad - hid_dim)))
    whh_t = whh_t.reshape(H_pad, 4 * H_pad).astype(jnp.bfloat16)

    kernel = functools.partial(_lstm_chunk_kernel,
                               hid_pad=H_pad, time_chunk=time_chunk)

    out = pl.pallas_call(
        kernel,
        out_shape=jax.ShapeDtypeStruct((T_pad, B_pad, H_pad), jnp.float32),
        grid_spec=pltpu.PrefetchScalarGridSpec(
            num_scalar_prefetch=0,
            grid=(nb, nt),
            in_specs=[
                pl.BlockSpec((time_chunk, TB, 4 * H_pad), lambda b, t: (t, b, 0)),
                pl.BlockSpec(memory_space=pl.ANY),  # W_hh^T: HBM, DMA'd once
            ],
            out_specs=pl.BlockSpec((time_chunk, TB, H_pad), lambda b, t: (t, b, 0)),
            scratch_shapes=[
                pltpu.VMEM((TB, H_pad), jnp.float32),          # h state
                pltpu.VMEM((TB, H_pad), jnp.float32),          # c state
                pltpu.VMEM((H_pad, 4 * H_pad), jnp.bfloat16),  # resident W_hh^T
            ],
        ),
        compiler_params=pltpu.CompilerParams(
            dimension_semantics=("parallel", "arbitrary"),  # batch || , time seq
        ),
    )(preact, whh_t)

    out = out[:seq_len, :batch, :hid_dim]

    # F.dropout with training=False is identity (eval-mode parity).
    if droprate > 0 and training:
        # TODO(synk): training-mode dropout (would use pltpu.prng_random_bits).
        pass
    return out


def _lstm_reference(x, w_ih, w_hh, b_ih, b_hh):
    """Pure-JAX reference (same math as torch.nn.LSTM single layer, zero init)."""
    seq_len, batch, _ = x.shape
    hid = w_hh.shape[1]
    h = jnp.zeros((batch, hid), jnp.float32)
    c = jnp.zeros((batch, hid), jnp.float32)

    def step(carry, x_t):
        h, c = carry
        gates = x_t @ w_ih.T + b_ih + h @ w_hh.T + b_hh
        i, f, g, o = jnp.split(gates, 4, axis=-1)
        i, f, o = jax.nn.sigmoid(i), jax.nn.sigmoid(f), jax.nn.sigmoid(o)
        g = jnp.tanh(g)
        c = f * c + i * g
        h = o * jnp.tanh(c)
        return (h, c), h

    _, outs = jax.lax.scan(step, (h, c), x)
    return outs


if __name__ == "__main__":
    # Small shapes consistent with forward(x): (seq_len, batch, input_dim)
    seq_len, batch, input_dim, hid_dim = 8, 8, 32, 32
    droprate = 0.5

    key = jax.random.PRNGKey(0)
    k_x, k_wi, k_wh, k_bi, k_bh = jax.random.split(key, 5)

    # Deterministic parameter init (uniform(-1/sqrt(H), 1/sqrt(H)) like PyTorch).
    bound = 1.0 / jnp.sqrt(jnp.float32(hid_dim))
    w_ih = jax.random.uniform(k_wi, (4 * hid_dim, input_dim), jnp.float32, -bound, bound)
    w_hh = jax.random.uniform(k_wh, (4 * hid_dim, hid_dim), jnp.float32, -bound, bound)
    b_ih = jax.random.uniform(k_bi, (4 * hid_dim,), jnp.float32, -bound, bound)
    b_hh = jax.random.uniform(k_bh, (4 * hid_dim,), jnp.float32, -bound, bound)

    x = jax.random.normal(k_x, (seq_len, batch, input_dim), jnp.float32)

    out = basic_unit_lstm(x, w_ih, w_hh, b_ih, b_hh, droprate=droprate, training=False)
    out = jax.block_until_ready(out)

    ref = jax.block_until_ready(_lstm_reference(x, w_ih, w_hh, b_ih, b_hh))
    assert out.shape == (seq_len, batch, hid_dim)
    # Tolerance accounts for bf16 MXU operands (f32 accumulate, f32 state).
    assert jnp.allclose(out, ref, atol=2e-2, rtol=2e-2), "mismatch vs reference LSTM"

    print("KERNEL_OK")
</pallas_src>

<mosaic_0001>
module attributes {stable_mosaic.version = 11 : i64} {
  func.func @_lstm_chunk_kernel(%arg0: i32, %arg1: i32, %arg2: memref<8x8x512xf32, #tpu.memory_space<vmem>>, %arg3: memref<128x512xbf16, #tpu.memory_space<any>>, %arg4: memref<8x8x128xf32, #tpu.memory_space<vmem>>, %arg5: memref<8x128xf32, #tpu.memory_space<vmem>>, %arg6: memref<8x128xf32, #tpu.memory_space<vmem>>, %arg7: memref<128x512xbf16, #tpu.memory_space<vmem>>) attributes {dimension_semantics = [#tpu.dimension_semantics<parallel>, #tpu.dimension_semantics<arbitrary>], iteration_bounds = array<i64: 1, 1>, scalar_prefetch = 0 : i64, scratch_operands = 3 : i64, tpu.core_type = #tpu.core_type<tc>, window_params = [{transform_indices = @transform_0, window_bounds = array<i64: 8, 8, 512>}, {}, {transform_indices = @transform_2, window_bounds = array<i64: 8, 8, 128>}]} {
    %c0_i32 = arith.constant 0 : i32
    %0 = arith.cmpi eq, %arg1, %c0_i32 : i32
    %1 = arith.extui %0 : i1 to i32
    %c0_i32_0 = arith.constant 0 : i32
    %2 = arith.cmpi ne, %1, %c0_i32_0 : i32
    scf.if %2 {
      "tpu.region"() ({
        %327 = tpu.sem_alloc : memref<!tpu.dma_semaphore, #tpu.memory_space<semaphore_mem>>
        tpu.enqueue_dma source(%arg3 : memref<128x512xbf16, #tpu.memory_space<any>>) target(%arg7 : memref<128x512xbf16, #tpu.memory_space<vmem>>) target_semaphore(%327 : memref<!tpu.dma_semaphore, #tpu.memory_space<semaphore_mem>>)
        tpu.wait_dma2 semaphore(%327 : memref<!tpu.dma_semaphore, #tpu.memory_space<semaphore_mem>>) src(%arg3 : memref<128x512xbf16, #tpu.memory_space<any>>) dst(%arg7 : memref<128x512xbf16, #tpu.memory_space<vmem>>)
        tpu.yield
      }) : () -> ()
      %cst_144 = arith.constant 0.000000e+00 : f32
      %323 = vector.broadcast %cst_144 : f32 to vector<8x128xf32>
      %c0_145 = arith.constant 0 : index
      %c0_146 = arith.constant 0 : index
      %324 = vector.load %arg5[%c0_145, %c0_146] : memref<8x128xf32, #tpu.memory_space<vmem>>, vector<8x128xf32>
      tpu.vector_store %arg5[%c0_145, %c0_146], %323 {strides = array<i32>} : memref<8x128xf32, #tpu.memory_space<vmem>>, vector<8x128xf32>,
      %cst_147 = arith.constant 0.000000e+00 : f32
      %325 = vector.broadcast %cst_147 : f32 to vector<8x128xf32>
      %c0_148 = arith.constant 0 : index
      %c0_149 = arith.constant 0 : index
      %326 = vector.load %arg6[%c0_148, %c0_149] : memref<8x128xf32, #tpu.memory_space<vmem>>, vector<8x128xf32>
      tpu.vector_store %arg6[%c0_148, %c0_149], %325 {strides = array<i32>} : memref<8x128xf32, #tpu.memory_space<vmem>>, vector<8x128xf32>,
    } else {
    }
    %c0_i32_1 = arith.constant 0 : i32
    %c0 = arith.constant 0 : index
    %c0_2 = arith.constant 0 : index
    %3 = vector.load %arg5[%c0, %c0_2] : memref<8x128xf32, #tpu.memory_space<vmem>>, vector<8x128xf32>
    %c0_3 = arith.constant 0 : index
    %c0_4 = arith.constant 0 : index
    %4 = vector.load %arg6[%c0_3, %c0_4] : memref<8x128xf32, #tpu.memory_space<vmem>>, vector<8x128xf32>
    %5 = arith.truncf %3 : vector<8x128xf32> to vector<8x128xbf16>
    %c0_5 = arith.constant 0 : index
    %c0_6 = arith.constant 0 : index
    %6 = vector.load %arg7[%c0_5, %c0_6] : memref<128x512xbf16, #tpu.memory_space<vmem>>, vector<128x512xbf16>
    %cst = arith.constant dense<0.000000e+00> : vector<8x512xf32>
    %7 = tpu.matmul %5, %6, %cst {dimension_numbers = #tpu.dot_dimension_numbers<[1], [0], [0], [1], [0, 0, 1, 1], [], []>} : vector<8x128xbf16>, vector<128x512xbf16>, vector<8x512xf32> -> vector<8x512xf32>
    %8 = arith.index_cast %c0_i32_1 : i32 to index
    %c0_7 = arith.constant 0 : index
    %c0_8 = arith.constant 0 : index
    %9 = vector.load %arg2[%8, %c0_7, %c0_8] : memref<8x8x512xf32, #tpu.memory_space<vmem>>, vector<1x8x512xf32>
    %10 = vector.shape_cast %9 : vector<1x8x512xf32> to vector<8x512xf32>
    %11 = arith.addf %10, %7 : vector<8x512xf32>
    %12 = vector.extract_strided_slice %11 {offsets = [0, 0], sizes = [8, 128], strides = [1, 1]} : vector<8x512xf32> to vector<8x128xf32>
    %13 = arith.negf %12 : vector<8x128xf32>
    %14 = math.exp %13 : vector<8x128xf32>
    %cst_9 = arith.constant 1.000000e+00 : f32
    %15 = vector.broadcast %cst_9 : f32 to vector<8x128xf32>
    %16 = arith.addf %15, %14 : vector<8x128xf32>
    %17 = arith.divf %15, %16 : vector<8x128xf32>
    %18 = vector.extract_strided_slice %11 {offsets = [0, 128], sizes = [8, 128], strides = [1, 1]} : vector<8x512xf32> to vector<8x128xf32>
    %19 = arith.negf %18 : vector<8x128xf32>
    %20 = math.exp %19 : vector<8x128xf32>
    %cst_10 = arith.constant 1.000000e+00 : f32
    %21 = vector.broadcast %cst_10 : f32 to vector<8x128xf32>
    %22 = arith.addf %21, %20 : vector<8x128xf32>
    %23 = arith.divf %21, %22 : vector<8x128xf32>
    %24 = vector.extract_strided_slice %11 {offsets = [0, 256], sizes = [8, 128], strides = [1, 1]} : vector<8x512xf32> to vector<8x128xf32>
    %25 = math.tanh %24 : vector<8x128xf32>
    %26 = vector.extract_strided_slice %11 {offsets = [0, 384], sizes = [8, 128], strides = [1, 1]} : vector<8x512xf32> to vector<8x128xf32>
    %27 = arith.negf %26 : vector<8x128xf32>
    %28 = math.exp %27 : vector<8x128xf32>
    %cst_11 = arith.constant 1.000000e+00 : f32
    %29 = vector.broadcast %cst_11 : f32 to vector<8x128xf32>
    %30 = arith.addf %29, %28 : vector<8x128xf32>
    %31 = arith.divf %29, %30 : vector<8x128xf32>
    %32 = arith.mulf %23, %4 : vector<8x128xf32>
    %33 = arith.mulf %17, %25 : vector<8x128xf32>
    %34 = arith.addf %32, %33 : vector<8x128xf32>
    %35 = math.tanh %34 : vector<8x128xf32>
    %36 = arith.mulf %31, %35 : vector<8x128xf32>
    %c0_12 = arith.constant 0 : index
    %c0_13 = arith.constant 0 : index
    %37 = vector.load %arg6[%c0_12, %c0_13] : memref<8x128xf32, #tpu.memory_space<vmem>>, vector<8x128xf32>
    tpu.vector_store %arg6[%c0_12, %c0_13], %34 {strides = array<i32>} : memref<8x128xf32, #tpu.memory_space<vmem>>, vector<8x128xf32>,
    %c0_14 = arith.constant 0 : index
    %c0_15 = arith.constant 0 : index
    %38 = vector.load %arg5[%c0_14, %c0_15] : memref<8x128xf32, #tpu.memory_space<vmem>>, vector<8x128xf32>
    tpu.vector_store %arg5[%c0_14, %c0_15], %36 {strides = array<i32>} : memref<8x128xf32, #tpu.memory_space<vmem>>, vector<8x128xf32>,
    %39 = arith.index_cast %c0_i32_1 : i32 to index
    %c0_16 = arith.constant 0 : index
    %c0_17 = arith.constant 0 : index
    %40 = vector.load %arg4[%39, %c0_16, %c0_17] : memref<8x8x128xf32, #tpu.memory_space<vmem>>, vector<1x8x128xf32>
    %41 = vector.shape_cast %40 : vector<1x8x128xf32> to vector<8x128xf32>
    %42 = vector.shape_cast %36 : vector<8x128xf32> to vector<1x8x128xf32>
    tpu.vector_store %arg4[%39, %c0_16, %c0_17], %42 {strides = array<i32>} : memref<8x8x128xf32, #tpu.memory_space<vmem>>, vector<1x8x128xf32>,
    %c1_i32 = arith.constant 1 : i32
    %c0_18 = arith.constant 0 : index
    %c0_19 = arith.constant 0 : index
    %43 = vector.load %arg5[%c0_18, %c0_19] : memref<8x128xf32, #tpu.memory_space<vmem>>, vector<8x128xf32>
    %c0_20 = arith.constant 0 : index
    %c0_21 = arith.constant 0 : index
    %44 = vector.load %arg6[%c0_20, %c0_21] : memref<8x128xf32, #tpu.memory_space<vmem>>, vector<8x128xf32>
    %45 = arith.truncf %43 : vector<8x128xf32> to vector<8x128xbf16>
    %c0_22 = arith.constant 0 : index
    %c0_23 = arith.constant 0 : index
    %46 = vector.load %arg7[%c0_22, %c0_23] : memref<128x512xbf16, #tpu.memory_space<vmem>>, vector<128x512xbf16>
    %cst_24 = arith.constant dense<0.000000e+00> : vector<8x512xf32>
    %47 = tpu.matmul %45, %46, %cst_24 {dimension_numbers = #tpu.dot_dimension_numbers<[1], [0], [0], [1], [0, 0, 1, 1], [], []>} : vector<8x128xbf16>, vector<128x512xbf16>, vector<8x512xf32> -> vector<8x512xf32>
    %48 = arith.index_cast %c1_i32 : i32 to index
    %c0_25 = arith.constant 0 : index
    %c0_26 = arith.constant 0 : index
    %49 = vector.load %arg2[%48, %c0_25, %c0_26] : memref<8x8x512xf32, #tpu.memory_space<vmem>>, vector<1x8x512xf32>
    %50 = vector.shape_cast %49 : vector<1x8x512xf32> to vector<8x512xf32>
    %51 = arith.addf %50, %47 : vector<8x512xf32>
    %52 = vector.extract_strided_slice %51 {offsets = [0, 0], sizes = [8, 128], strides = [1, 1]} : vector<8x512xf32> to vector<8x128xf32>
    %53 = arith.negf %52 : vector<8x128xf32>
    %54 = math.exp %53 : vector<8x128xf32>
    %cst_27 = arith.constant 1.000000e+00 : f32
    %55 = vector.broadcast %cst_27 : f32 to vector<8x128xf32>
    %56 = arith.addf %55, %54 : vector<8x128xf32>
    %57 = arith.divf %55, %56 : vector<8x128xf32>
    %58 = vector.extract_strided_slice %51 {offsets = [0, 128], sizes = [8, 128], strides = [1, 1]} : vector<8x512xf32> to vector<8x128xf32>
    %59 = arith.negf %58 : vector<8x128xf32>
    %60 = math.exp %59 : vector<8x128xf32>
    %cst_28 = arith.constant 1.000000e+00 : f32
    %61 = vector.broadcast %cst_28 : f32 to vector<8x128xf32>
    %62 = arith.addf %61, %60 : vector<8x128xf32>
    %63 = arith.divf %61, %62 : vector<8x128xf32>
    %64 = vector.extract_strided_slice %51 {offsets = [0, 256], sizes = [8, 128], strides = [1, 1]} : vector<8x512xf32> to vector<8x128xf32>
    %65 = math.tanh %64 : vector<8x128xf32>
    %66 = vector.extract_strided_slice %51 {offsets = [0, 384], sizes = [8, 128], strides = [1, 1]} : vector<8x512xf32> to vector<8x128xf32>
    %67 = arith.negf %66 : vector<8x128xf32>
    %68 = math.exp %67 : vector<8x128xf32>
    %cst_29 = arith.constant 1.000000e+00 : f32
    %69 = vector.broadcast %cst_29 : f32 to vector<8x128xf32>
    %70 = arith.addf %69, %68 : vector<8x128xf32>
    %71 = arith.divf %69, %70 : vector<8x128xf32>
    %72 = arith.mulf %63, %44 : vector<8x128xf32>
    %73 = arith.mulf %57, %65 : vector<8x128xf32>
    %74 = arith.addf %72, %73 : vector<8x128xf32>
    %75 = math.tanh %74 : vector<8x128xf32>
    %76 = arith.mulf %71, %75 : vector<8x128xf32>
    %c0_30 = arith.constant 0 : index
    %c0_31 = arith.constant 0 : index
    %77 = vector.load %arg6[%c0_30, %c0_31] : memref<8x128xf32, #tpu.memory_space<vmem>>, vector<8x128xf32>
    tpu.vector_store %arg6[%c0_30, %c0_31], %74 {strides = array<i32>} : memref<8x128xf32, #tpu.memory_space<vmem>>, vector<8x128xf32>,
    %c0_32 = arith.constant 0 : index
    %c0_33 = arith.constant 0 : index
    %78 = vector.load %arg5[%c0_32, %c0_33] : memref<8x128xf32, #tpu.memory_space<vmem>>, vector<8x128xf32>
    tpu.vector_store %arg5[%c0_32, %c0_33], %76 {strides = array<i32>} : memref<8x128xf32, #tpu.memory_space<vmem>>, vector<8x128xf32>,
    %79 = arith.index_cast %c1_i32 : i32 to index
    %c0_34 = arith.constant 0 : index
    %c0_35 = arith.constant 0 : index
    %80 = vector.load %arg4[%79, %c0_34, %c0_35] : memref<8x8x128xf32, #tpu.memory_space<vmem>>, vector<1x8x128xf32>
    %81 = vector.shape_cast %80 : vector<1x8x128xf32> to vector<8x128xf32>
    %82 = vector.shape_cast %76 : vector<8x128xf32> to vector<1x8x128xf32>
    tpu.vector_store %arg4[%79, %c0_34, %c0_35], %82 {strides = array<i32>} : memref<8x8x128xf32, #tpu.memory_space<vmem>>, vector<1x8x128xf32>,
    %c2_i32 = arith.constant 2 : i32
    %c0_36 = arith.constant 0 : index
    %c0_37 = arith.constant 0 : index
    %83 = vector.load %arg5[%c0_36, %c0_37] : memref<8x128xf32, #tpu.memory_space<vmem>>, vector<8x128xf32>
    %c0_38 = arith.constant 0 : index
    %c0_39 = arith.constant 0 : index
    %84 = vector.load %arg6[%c0_38, %c0_39] : memref<8x128xf32, #tpu.memory_space<vmem>>, vector<8x128xf32>
    %85 = arith.truncf %83 : vector<8x128xf32> to vector<8x128xbf16>
    %c0_40 = arith.constant 0 : index
    %c0_41 = arith.constant 0 : index
    %86 = vector.load %arg7[%c0_40, %c0_41] : memref<128x512xbf16, #tpu.memory_space<vmem>>, vector<128x512xbf16>
    %cst_42 = arith.constant dense<0.000000e+00> : vector<8x512xf32>
    %87 = tpu.matmul %85, %86, %cst_42 {dimension_numbers = #tpu.dot_dimension_numbers<[1], [0], [0], [1], [0, 0, 1, 1], [], []>} : vector<8x128xbf16>, vector<128x512xbf16>, vector<8x512xf32> -> vector<8x512xf32>
    %88 = arith.index_cast %c2_i32 : i32 to index
    %c0_43 = arith.constant 0 : index
    %c0_44 = arith.constant 0 : index
    %89 = vector.load %arg2[%88, %c0_43, %c0_44] : memref<8x8x512xf32, #tpu.memory_space<vmem>>, vector<1x8x512xf32>
    %90 = vector.shape_cast %89 : vector<1x8x512xf32> to vector<8x512xf32>
    %91 = arith.addf %90, %87 : vector<8x512xf32>
    %92 = vector.extract_strided_slice %91 {offsets = [0, 0], sizes = [8, 128], strides = [1, 1]} : vector<8x512xf32> to vector<8x128xf32>
    %93 = arith.negf %92 : vector<8x128xf32>
    %94 = math.exp %93 : vector<8x128xf32>
    %cst_45 = arith.constant 1.000000e+00 : f32
    %95 = vector.broadcast %cst_45 : f32 to vector<8x128xf32>
    %96 = arith.addf %95, %94 : vector<8x128xf32>
    %97 = arith.divf %95, %96 : vector<8x128xf32>
    %98 = vector.extract_strided_slice %91 {offsets = [0, 128], sizes = [8, 128], strides = [1, 1]} : vector<8x512xf32> to vector<8x128xf32>
    %99 = arith.negf %98 : vector<8x128xf32>
    %100 = math.exp %99 : vector<8x128xf32>
    %cst_46 = arith.constant 1.000000e+00 : f32
    %101 = vector.broadcast %cst_46 : f32 to vector<8x128xf32>
    %102 = arith.addf %101, %100 : vector<8x128xf32>
    %103 = arith.divf %101, %102 : vector<8x128xf32>
    %104 = vector.extract_strided_slice %91 {offsets = [0, 256], sizes = [8, 128], strides = [1, 1]} : vector<8x512xf32> to vector<8x128xf32>
    %105 = math.tanh %104 : vector<8x128xf32>
    %106 = vector.extract_strided_slice %91 {offsets = [0, 384], sizes = [8, 128], strides = [1, 1]} : vector<8x512xf32> to vector<8x128xf32>
    %107 = arith.negf %106 : vector<8x128xf32>
    %108 = math.exp %107 : vector<8x128xf32>
    %cst_47 = arith.constant 1.000000e+00 : f32
    %109 = vector.broadcast %cst_47 : f32 to vector<8x128xf32>
    %110 = arith.addf %109, %108 : vector<8x128xf32>
    %111 = arith.divf %109, %110 : vector<8x128xf32>
    %112 = arith.mulf %103, %84 : vector<8x128xf32>
    %113 = arith.mulf %97, %105 : vector<8x128xf32>
    %114 = arith.addf %112, %113 : vector<8x128xf32>
    %115 = math.tanh %114 : vector<8x128xf32>
    %116 = arith.mulf %111, %115 : vector<8x128xf32>
    %c0_48 = arith.constant 0 : index
    %c0_49 = arith.constant 0 : index
    %117 = vector.load %arg6[%c0_48, %c0_49] : memref<8x128xf32, #tpu.memory_space<vmem>>, vector<8x128xf32>
    tpu.vector_store %arg6[%c0_48, %c0_49], %114 {strides = array<i32>} : memref<8x128xf32, #tpu.memory_space<vmem>>, vector<8x128xf32>,
    %c0_50 = arith.constant 0 : index
    %c0_51 = arith.constant 0 : index
    %118 = vector.load %arg5[%c0_50, %c0_51] : memref<8x128xf32, #tpu.memory_space<vmem>>, vector<8x128xf32>
    tpu.vector_store %arg5[%c0_50, %c0_51], %116 {strides = array<i32>} : memref<8x128xf32, #tpu.memory_space<vmem>>, vector<8x128xf32>,
    %119 = arith.index_cast %c2_i32 : i32 to index
    %c0_52 = arith.constant 0 : index
    %c0_53 = arith.constant 0 : index
    %120 = vector.load %arg4[%119, %c0_52, %c0_53] : memref<8x8x128xf32, #tpu.memory_space<vmem>>, vector<1x8x128xf32>
    %121 = vector.shape_cast %120 : vector<1x8x128xf32> to vector<8x128xf32>
    %122 = vector.shape_cast %116 : vector<8x128xf32> to vector<1x8x128xf32>
    tpu.vector_store %arg4[%119, %c0_52, %c0_53], %122 {strides = array<i32>} : memref<8x8x128xf32, #tpu.memory_space<vmem>>, vector<1x8x128xf32>,
    %c3_i32 = arith.constant 3 : i32
    %c0_54 = arith.constant 0 : index
    %c0_55 = arith.constant 0 : index
    %123 = vector.load %arg5[%c0_54, %c0_55] : memref<8x128xf32, #tpu.memory_space<vmem>>, vector<8x128xf32>
    %c0_56 = arith.constant 0 : index
    %c0_57 = arith.constant 0 : index
    %124 = vector.load %arg6[%c0_56, %c0_57] : memref<8x128xf32, #tpu.memory_space<vmem>>, vector<8x128xf32>
    %125 = arith.truncf %123 : vector<8x128xf32> to vector<8x128xbf16>
    %c0_58 = arith.constant 0 : index
    %c0_59 = arith.constant 0 : index
    %126 = vector.load %arg7[%c0_58, %c0_59] : memref<128x512xbf16, #tpu.memory_space<vmem>>, vector<128x512xbf16>
    %cst_60 = arith.constant dense<0.000000e+00> : vector<8x512xf32>
    %127 = tpu.matmul %125, %126, %cst_60 {dimension_numbers = #tpu.dot_dimension_numbers<[1], [0], [0], [1], [0, 0, 1, 1], [], []>} : vector<8x128xbf16>, vector<128x512xbf16>, vector<8x512xf32> -> vector<8x512xf32>
    %128 = arith.index_cast %c3_i32 : i32 to index
    %c0_61 = arith.constant 0 : index
    %c0_62 = arith.constant 0 : index
    %129 = vector.load %arg2[%128, %c0_61, %c0_62] : memref<8x8x512xf32, #tpu.memory_space<vmem>>, vector<1x8x512xf32>
    %130 = vector.shape_cast %129 : vector<1x8x512xf32> to vector<8x512xf32>
    %131 = arith.addf %130, %127 : vector<8x512xf32>
    %132 = vector.extract_strided_slice %131 {offsets = [0, 0], sizes = [8, 128], strides = [1, 1]} : vector<8x512xf32> to vector<8x128xf32>
    %133 = arith.negf %132 : vector<8x128xf32>
    %134 = math.exp %133 : vector<8x128xf32>
    %cst_63 = arith.constant 1.000000e+00 : f32
    %135 = vector.broadcast %cst_63 : f32 to vector<8x128xf32>
    %136 = arith.addf %135, %134 : vector<8x128xf32>
    %137 = arith.divf %135, %136 : vector<8x128xf32>
    %138 = vector.extract_strided_slice %131 {offsets = [0, 128], sizes = [8, 128], strides = [1, 1]} : vector<8x512xf32> to vector<8x128xf32>
    %139 = arith.negf %138 : vector<8x128xf32>
    %140 = math.exp %139 : vector<8x128xf32>
    %cst_64 = arith.constant 1.000000e+00 : f32
    %141 = vector.broadcast %cst_64 : f32 to vector<8x128xf32>
    %142 = arith.addf %141, %140 : vector<8x128xf32>
    %143 = arith.divf %141, %142 : vector<8x128xf32>
    %144 = vector.extract_strided_slice %131 {offsets = [0, 256], sizes = [8, 128], strides = [1, 1]} : vector<8x512xf32> to vector<8x128xf32>
    %145 = math.tanh %144 : vector<8x128xf32>
    %146 = vector.extract_strided_slice %131 {offsets = [0, 384], sizes = [8, 128], strides = [1, 1]} : vector<8x512xf32> to vector<8x128xf32>
    %147 = arith.negf %146 : vector<8x128xf32>
    %148 = math.exp %147 : vector<8x128xf32>
    %cst_65 = arith.constant 1.000000e+00 : f32
    %149 = vector.broadcast %cst_65 : f32 to vector<8x128xf32>
    %150 = arith.addf %149, %148 : vector<8x128xf32>
    %151 = arith.divf %149, %150 : vector<8x128xf32>
    %152 = arith.mulf %143, %124 : vector<8x128xf32>
    %153 = arith.mulf %137, %145 : vector<8x128xf32>
    %154 = arith.addf %152, %153 : vector<8x128xf32>
    %155 = math.tanh %154 : vector<8x128xf32>
    %156 = arith.mulf %151, %155 : vector<8x128xf32>
    %c0_66 = arith.constant 0 : index
    %c0_67 = arith.constant 0 : index
    %157 = vector.load %arg6[%c0_66, %c0_67] : memref<8x128xf32, #tpu.memory_space<vmem>>, vector<8x128xf32>
    tpu.vector_store %arg6[%c0_66, %c0_67], %154 {strides = array<i32>} : memref<8x128xf32, #tpu.memory_space<vmem>>, vector<8x128xf32>,
    %c0_68 = arith.constant 0 : index
    %c0_69 = arith.constant 0 : index
    %158 = vector.load %arg5[%c0_68, %c0_69] : memref<8x128xf32, #tpu.memory_space<vmem>>, vector<8x128xf32>
    tpu.vector_store %arg5[%c0_68, %c0_69], %156 {strides = array<i32>} : memref<8x128xf32, #tpu.memory_space<vmem>>, vector<8x128xf32>,
    %159 = arith.index_cast %c3_i32 : i32 to index
    %c0_70 = arith.constant 0 : index
    %c0_71 = arith.constant 0 : index
    %160 = vector.load %arg4[%159, %c0_70, %c0_71] : memref<8x8x128xf32, #tpu.memory_space<vmem>>, vector<1x8x128xf32>
    %161 = vector.shape_cast %160 : vector<1x8x128xf32> to vector<8x128xf32>
    %162 = vector.shape_cast %156 : vector<8x128xf32> to vector<1x8x128xf32>
    tpu.vector_store %arg4[%159, %c0_70, %c0_71], %162 {strides = array<i32>} : memref<8x8x128xf32, #tpu.memory_space<vmem>>, vector<1x8x128xf32>,
    %c4_i32 = arith.constant 4 : i32
    %c0_72 = arith.constant 0 : index
    %c0_73 = arith.constant 0 : index
    %163 = vector.load %arg5[%c0_72, %c0_73] : memref<8x128xf32, #tpu.memory_space<vmem>>, vector<8x128xf32>
    %c0_74 = arith.constant 0 : index
    %c0_75 = arith.constant 0 : index
    %164 = vector.load %arg6[%c0_74, %c0_75] : memref<8x128xf32, #tpu.memory_space<vmem>>, vector<8x128xf32>
    %165 = arith.truncf %163 : vector<8x128xf32> to vector<8x128xbf16>
    %c0_76 = arith.constant 0 : index
    %c0_77 = arith.constant 0 : index
    %166 = vector.load %arg7[%c0_76, %c0_77] : memref<128x512xbf16, #tpu.memory_space<vmem>>, vector<128x512xbf16>
    %cst_78 = arith.constant dense<0.000000e+00> : vector<8x512xf32>
    %167 = tpu.matmul %165, %166, %cst_78 {dimension_numbers = #tpu.dot_dimension_numbers<[1], [0], [0], [1], [0, 0, 1, 1], [], []>} : vector<8x128xbf16>, vector<128x512xbf16>, vector<8x512xf32> -> vector<8x512xf32>
    %168 = arith.index_cast %c4_i32 : i32 to index
    %c0_79 = arith.constant 0 : index
    %c0_80 = arith.constant 0 : index
    %169 = vector.load %arg2[%168, %c0_79, %c0_80] : memref<8x8x512xf32, #tpu.memory_space<vmem>>, vector<1x8x512xf32>
    %170 = vector.shape_cast %169 : vector<1x8x512xf32> to vector<8x512xf32>
    %171 = arith.addf %170, %167 : vector<8x512xf32>
    %172 = vector.extract_strided_slice %171 {offsets = [0, 0], sizes = [8, 128], strides = [1, 1]} : vector<8x512xf32> to vector<8x128xf32>
    %173 = arith.negf %172 : vector<8x128xf32>
    %174 = math.exp %173 : vector<8x128xf32>
    %cst_81 = arith.constant 1.000000e+00 : f32
    %175 = vector.broadcast %cst_81 : f32 to vector<8x128xf32>
    %176 = arith.addf %175, %174 : vector<8x128xf32>
    %177 = arith.divf %175, %176 : vector<8x128xf32>
    %178 = vector.extract_strided_slice %171 {offsets = [0, 128], sizes = [8, 128], strides = [1, 1]} : vector<8x512xf32> to vector<8x128xf32>
    %179 = arith.negf %178 : vector<8x128xf32>
    %180 = math.exp %179 : vector<8x128xf32>
    %cst_82 = arith.constant 1.000000e+00 : f32
    %181 = vector.broadcast %cst_82 : f32 to vector<8x128xf32>
    %182 = arith.addf %181, %180 : vector<8x128xf32>
    %183 = arith.divf %181, %182 : vector<8x128xf32>
    %184 = vector.extract_strided_slice %171 {offsets = [0, 256], sizes = [8, 128], strides = [1, 1]} : vector<8x512xf32> to vector<8x128xf32>
    %185 = math.tanh %184 : vector<8x128xf32>
    %186 = vector.extract_strided_slice %171 {offsets = [0, 384], sizes = [8, 128], strides = [1, 1]} : vector<8x512xf32> to vector<8x128xf32>
    %187 = arith.negf %186 : vector<8x128xf32>
    %188 = math.exp %187 : vector<8x128xf32>
    %cst_83 = arith.constant 1.000000e+00 : f32
    %189 = vector.broadcast %cst_83 : f32 to vector<8x128xf32>
    %190 = arith.addf %189, %188 : vector<8x128xf32>
    %191 = arith.divf %189, %190 : vector<8x128xf32>
    %192 = arith.mulf %183, %164 : vector<8x128xf32>
    %193 = arith.mulf %177, %185 : vector<8x128xf32>
    %194 = arith.addf %192, %193 : vector<8x128xf32>
    %195 = math.tanh %194 : vector<8x128xf32>
    %196 = arith.mulf %191, %195 : vector<8x128xf32>
    %c0_84 = arith.constant 0 : index
    %c0_85 = arith.constant 0 : index
    %197 = vector.load %arg6[%c0_84, %c0_85] : memref<8x128xf32, #tpu.memory_space<vmem>>, vector<8x128xf32>
    tpu.vector_store %arg6[%c0_84, %c0_85], %194 {strides = array<i32>} : memref<8x128xf32, #tpu.memory_space<vmem>>, vector<8x128xf32>,
    %c0_86 = arith.constant 0 : index
    %c0_87 = arith.constant 0 : index
    %198 = vector.load %arg5[%c0_86, %c0_87] : memref<8x128xf32, #tpu.memory_space<vmem>>, vector<8x128xf32>
    tpu.vector_store %arg5[%c0_86, %c0_87], %196 {strides = array<i32>} : memref<8x128xf32, #tpu.memory_space<vmem>>, vector<8x128xf32>,
    %199 = arith.index_cast %c4_i32 : i32 to index
    %c0_88 = arith.constant 0 : index
    %c0_89 = arith.constant 0 : index
    %200 = vector.load %arg4[%199, %c0_88, %c0_89] : memref<8x8x128xf32, #tpu.memory_space<vmem>>, vector<1x8x128xf32>
    %201 = vector.shape_cast %200 : vector<1x8x128xf32> to vector<8x128xf32>
    %202 = vector.shape_cast %196 : vector<8x128xf32> to vector<1x8x128xf32>
    tpu.vector_store %arg4[%199, %c0_88, %c0_89], %202 {strides = array<i32>} : memref<8x8x128xf32, #tpu.memory_space<vmem>>, vector<1x8x128xf32>,
    %c5_i32 = arith.constant 5 : i32
    %c0_90 = arith.constant 0 : index
    %c0_91 = arith.constant 0 : index
    %203 = vector.load %arg5[%c0_90, %c0_91] : memref<8x128xf32, #tpu.memory_space<vmem>>, vector<8x128xf32>
    %c0_92 = arith.constant 0 : index
    %c0_93 = arith.constant 0 : index
    %204 = vector.load %arg6[%c0_92, %c0_93] : memref<8x128xf32, #tpu.memory_space<vmem>>, vector<8x128xf32>
    %205 = arith.truncf %203 : vector<8x128xf32> to vector<8x128xbf16>
    %c0_94 = arith.constant 0 : index
    %c0_95 = arith.constant 0 : index
    %206 = vector.load %arg7[%c0_94, %c0_95] : memref<128x512xbf16, #tpu.memory_space<vmem>>, vector<128x512xbf16>
    %cst_96 = arith.constant dense<0.000000e+00> : vector<8x512xf32>
    %207 = tpu.matmul %205, %206, %cst_96 {dimension_numbers = #tpu.dot_dimension_numbers<[1], [0], [0], [1], [0, 0, 1, 1], [], []>} : vector<8x128xbf16>, vector<128x512xbf16>, vector<8x512xf32> -> vector<8x512xf32>
    %208 = arith.index_cast %c5_i32 : i32 to index
    %c0_97 = arith.constant 0 : index
    %c0_98 = arith.constant 0 : index
    %209 = vector.load %arg2[%208, %c0_97, %c0_98] : memref<8x8x512xf32, #tpu.memory_space<vmem>>, vector<1x8x512xf32>
    %210 = vector.shape_cast %209 : vector<1x8x512xf32> to vector<8x512xf32>
    %211 = arith.addf %210, %207 : vector<8x512xf32>
    %212 = vector.extract_strided_slice %211 {offsets = [0, 0], sizes = [8, 128], strides = [1, 1]} : vector<8x512xf32> to vector<8x128xf32>
    %213 = arith.negf %212 : vector<8x128xf32>
    %214 = math.exp %213 : vector<8x128xf32>
    %cst_99 = arith.constant 1.000000e+00 : f32
    %215 = vector.broadcast %cst_99 : f32 to vector<8x128xf32>
    %216 = arith.addf %215, %214 : vector<8x128xf32>
    %217 = arith.divf %215, %216 : vector<8x128xf32>
    %218 = vector.extract_strided_slice %211 {offsets = [0, 128], sizes = [8, 128], strides = [1, 1]} : vector<8x512xf32> to vector<8x128xf32>
    %219 = arith.negf %218 : vector<8x128xf32>
    %220 = math.exp %219 : vector<8x128xf32>
    %cst_100 = arith.constant 1.000000e+00 : f32
    %221 = vector.broadcast %cst_100 : f32 to vector<8x128xf32>
    %222 = arith.addf %221, %220 : vector<8x128xf32>
    %223 = arith.divf %221, %222 : vector<8x128xf32>
    %224 = vector.extract_strided_slice %211 {offsets = [0, 256], sizes = [8, 128], strides = [1, 1]} : vector<8x512xf32> to vector<8x128xf32>
    %225 = math.tanh %224 : vector<8x128xf32>
    %226 = vector.extract_strided_slice %211 {offsets = [0, 384], sizes = [8, 128], strides = [1, 1]} : vector<8x512xf32> to vector<8x128xf32>
    %227 = arith.negf %226 : vector<8x128xf32>
    %228 = math.exp %227 : vector<8x128xf32>
    %cst_101 = arith.constant 1.000000e+00 : f32
    %229 = vector.broadcast %cst_101 : f32 to vector<8x128xf32>
    %230 = arith.addf %229, %228 : vector<8x128xf32>
    %231 = arith.divf %229, %230 : vector<8x128xf32>
    %232 = arith.mulf %223, %204 : vector<8x128xf32>
    %233 = arith.mulf %217, %225 : vector<8x128xf32>
    %234 = arith.addf %232, %233 : vector<8x128xf32>
    %235 = math.tanh %234 : vector<8x128xf32>
    %236 = arith.mulf %231, %235 : vector<8x128xf32>
    %c0_102 = arith.constant 0 : index
    %c0_103 = arith.constant 0 : index
    %237 = vector.load %arg6[%c0_102, %c0_103] : memref<8x128xf32, #tpu.memory_space<vmem>>, vector<8x128xf32>
    tpu.vector_store %arg6[%c0_102, %c0_103], %234 {strides = array<i32>} : memref<8x128xf32, #tpu.memory_space<vmem>>, vector<8x128xf32>,
    %c0_104 = arith.constant 0 : index
    %c0_105 = arith.constant 0 : index
    %238 = vector.load %arg5[%c0_104, %c0_105] : memref<8x128xf32, #tpu.memory_space<vmem>>, vector<8x128xf32>
    tpu.vector_store %arg5[%c0_104, %c0_105], %236 {strides = array<i32>} : memref<8x128xf32, #tpu.memory_space<vmem>>, vector<8x128xf32>,
    %239 = arith.index_cast %c5_i32 : i32 to index
    %c0_106 = arith.constant 0 : index
    %c0_107 = arith.constant 0 : index
    %240 = vector.load %arg4[%239, %c0_106, %c0_107] : memref<8x8x128xf32, #tpu.memory_space<vmem>>, vector<1x8x128xf32>
    %241 = vector.shape_cast %240 : vector<1x8x128xf32> to vector<8x128xf32>
    %242 = vector.shape_cast %236 : vector<8x128xf32> to vector<1x8x128xf32>
    tpu.vector_store %arg4[%239, %c0_106, %c0_107], %242 {strides = array<i32>} : memref<8x8x128xf32, #tpu.memory_space<vmem>>, vector<1x8x128xf32>,
    %c6_i32 = arith.constant 6 : i32
    %c0_108 = arith.constant 0 : index
    %c0_109 = arith.constant 0 : index
    %243 = vector.load %arg5[%c0_108, %c0_109] : memref<8x128xf32, #tpu.memory_space<vmem>>, vector<8x128xf32>
    %c0_110 = arith.constant 0 : index
    %c0_111 = arith.constant 0 : index
    %244 = vector.load %arg6[%c0_110, %c0_111] : memref<8x128xf32, #tpu.memory_space<vmem>>, vector<8x128xf32>
    %245 = arith.truncf %243 : vector<8x128xf32> to vector<8x128xbf16>
    %c0_112 = arith.constant 0 : index
    %c0_113 = arith.constant 0 : index
    %246 = vector.load %arg7[%c0_112, %c0_113] : memref<128x512xbf16, #tpu.memory_space<vmem>>, vector<128x512xbf16>
    %cst_114 = arith.constant dense<0.000000e+00> : vector<8x512xf32>
    %247 = tpu.matmul %245, %246, %cst_114 {dimension_numbers = #tpu.dot_dimension_numbers<[1], [0], [0], [1], [0, 0, 1, 1], [], []>} : vector<8x128xbf16>, vector<128x512xbf16>, vector<8x512xf32> -> vector<8x512xf32>
    %248 = arith.index_cast %c6_i32 : i32 to index
    %c0_115 = arith.constant 0 : index
    %c0_116 = arith.constant 0 : index
    %249 = vector.load %arg2[%248, %c0_115, %c0_116] : memref<8x8x512xf32, #tpu.memory_space<vmem>>, vector<1x8x512xf32>
    %250 = vector.shape_cast %249 : vector<1x8x512xf32> to vector<8x512xf32>
    %251 = arith.addf %250, %247 : vector<8x512xf32>
    %252 = vector.extract_strided_slice %251 {offsets = [0, 0], sizes = [8, 128], strides = [1, 1]} : vector<8x512xf32> to vector<8x128xf32>
    %253 = arith.negf %252 : vector<8x128xf32>
    %254 = math.exp %253 : vector<8x128xf32>
    %cst_117 = arith.constant 1.000000e+00 : f32
    %255 = vector.broadcast %cst_117 : f32 to vector<8x128xf32>
    %256 = arith.addf %255, %254 : vector<8x128xf32>
    %257 = arith.divf %255, %256 : vector<8x128xf32>
    %258 = vector.extract_strided_slice %251 {offsets = [0, 128], sizes = [8, 128], strides = [1, 1]} : vector<8x512xf32> to vector<8x128xf32>
    %259 = arith.negf %258 : vector<8x128xf32>
    %260 = math.exp %259 : vector<8x128xf32>
    %cst_118 = arith.constant 1.000000e+00 : f32
    %261 = vector.broadcast %cst_118 : f32 to vector<8x128xf32>
    %262 = arith.addf %261, %260 : vector<8x128xf32>
    %263 = arith.divf %261, %262 : vector<8x128xf32>
    %264 = vector.extract_strided_slice %251 {offsets = [0, 256], sizes = [8, 128], strides = [1, 1]} : vector<8x512xf32> to vector<8x128xf32>
    %265 = math.tanh %264 : vector<8x128xf32>
    %266 = vector.extract_strided_slice %251 {offsets = [0, 384], sizes = [8, 128], strides = [1, 1]} : vector<8x512xf32> to vector<8x128xf32>
    %267 = arith.negf %266 : vector<8x128xf32>
    %268 = math.exp %267 : vector<8x128xf32>
    %cst_119 = arith.constant 1.000000e+00 : f32
    %269 = vector.broadcast %cst_119 : f32 to vector<8x128xf32>
    %270 = arith.addf %269, %268 : vector<8x128xf32>
    %271 = arith.divf %269, %270 : vector<8x128xf32>
    %272 = arith.mulf %263, %244 : vector<8x128xf32>
    %273 = arith.mulf %257, %265 : vector<8x128xf32>
    %274 = arith.addf %272, %273 : vector<8x128xf32>
    %275 = math.tanh %274 : vector<8x128xf32>
    %276 = arith.mulf %271, %275 : vector<8x128xf32>
    %c0_120 = arith.constant 0 : index
    %c0_121 = arith.constant 0 : index
    %277 = vector.load %arg6[%c0_120, %c0_121] : memref<8x128xf32, #tpu.memory_space<vmem>>, vector<8x128xf32>
    tpu.vector_store %arg6[%c0_120, %c0_121], %274 {strides = array<i32>} : memref<8x128xf32, #tpu.memory_space<vmem>>, vector<8x128xf32>,
    %c0_122 = arith.constant 0 : index
    %c0_123 = arith.constant 0 : index
    %278 = vector.load %arg5[%c0_122, %c0_123] : memref<8x128xf32, #tpu.memory_space<vmem>>, vector<8x128xf32>
    tpu.vector_store %arg5[%c0_122, %c0_123], %276 {strides = array<i32>} : memref<8x128xf32, #tpu.memory_space<vmem>>, vector<8x128xf32>,
    %279 = arith.index_cast %c6_i32 : i32 to index
    %c0_124 = arith.constant 0 : index
    %c0_125 = arith.constant 0 : index
    %280 = vector.load %arg4[%279, %c0_124, %c0_125] : memref<8x8x128xf32, #tpu.memory_space<vmem>>, vector<1x8x128xf32>
    %281 = vector.shape_cast %280 : vector<1x8x128xf32> to vector<8x128xf32>
    %282 = vector.shape_cast %276 : vector<8x128xf32> to vector<1x8x128xf32>
    tpu.vector_store %arg4[%279, %c0_124, %c0_125], %282 {strides = array<i32>} : memref<8x8x128xf32, #tpu.memory_space<vmem>>, vector<1x8x128xf32>,
    %c7_i32 = arith.constant 7 : i32
    %c0_126 = arith.constant 0 : index
    %c0_127 = arith.constant 0 : index
    %283 = vector.load %arg5[%c0_126, %c0_127] : memref<8x128xf32, #tpu.memory_space<vmem>>, vector<8x128xf32>
    %c0_128 = arith.constant 0 : index
    %c0_129 = arith.constant 0 : index
    %284 = vector.load %arg6[%c0_128, %c0_129] : memref<8x128xf32, #tpu.memory_space<vmem>>, vector<8x128xf32>
    %285 = arith.truncf %283 : vector<8x128xf32> to vector<8x128xbf16>
    %c0_130 = arith.constant 0 : index
    %c0_131 = arith.constant 0 : index
    %286 = vector.load %arg7[%c0_130, %c0_131] : memref<128x512xbf16, #tpu.memory_space<vmem>>, vector<128x512xbf16>
    %cst_132 = arith.constant dense<0.000000e+00> : vector<8x512xf32>
    %287 = tpu.matmul %285, %286, %cst_132 {dimension_numbers = #tpu.dot_dimension_numbers<[1], [0], [0], [1], [0, 0, 1, 1], [], []>} : vector<8x128xbf16>, vector<128x512xbf16>, vector<8x512xf32> -> vector<8x512xf32>
    %288 = arith.index_cast %c7_i32 : i32 to index
    %c0_133 = arith.constant 0 : index
    %c0_134 = arith.constant 0 : index
    %289 = vector.load %arg2[%288, %c0_133, %c0_134] : memref<8x8x512xf32, #tpu.memory_space<vmem>>, vector<1x8x512xf32>
    %290 = vector.shape_cast %289 : vector<1x8x512xf32> to vector<8x512xf32>
    %291 = arith.addf %290, %287 : vector<8x512xf32>
    %292 = vector.extract_strided_slice %291 {offsets = [0, 0], sizes = [8, 128], strides = [1, 1]} : vector<8x512xf32> to vector<8x128xf32>
    %293 = arith.negf %292 : vector<8x128xf32>
    %294 = math.exp %293 : vector<8x128xf32>
    %cst_135 = arith.constant 1.000000e+00 : f32
    %295 = vector.broadcast %cst_135 : f32 to vector<8x128xf32>
    %296 = arith.addf %295, %294 : vector<8x128xf32>
    %297 = arith.divf %295, %296 : vector<8x128xf32>
    %298 = vector.extract_strided_slice %291 {offsets = [0, 128], sizes = [8, 128], strides = [1, 1]} : vector<8x512xf32> to vector<8x128xf32>
    %299 = arith.negf %298 : vector<8x128xf32>
    %300 = math.exp %299 : vector<8x128xf32>
    %cst_136 = arith.constant 1.000000e+00 : f32
    %301 = vector.broadcast %cst_136 : f32 to vector<8x128xf32>
    %302 = arith.addf %301, %300 : vector<8x128xf32>
    %303 = arith.divf %301, %302 : vector<8x128xf32>
    %304 = vector.extract_strided_slice %291 {offsets = [0, 256], sizes = [8, 128], strides = [1, 1]} : vector<8x512xf32> to vector<8x128xf32>
    %305 = math.tanh %304 : vector<8x128xf32>
    %306 = vector.extract_strided_slice %291 {offsets = [0, 384], sizes = [8, 128], strides = [1, 1]} : vector<8x512xf32> to vector<8x128xf32>
    %307 = arith.negf %306 : vector<8x128xf32>
    %308 = math.exp %307 : vector<8x128xf32>
    %cst_137 = arith.constant 1.000000e+00 : f32
    %309 = vector.broadcast %cst_137 : f32 to vector<8x128xf32>
    %310 = arith.addf %309, %308 : vector<8x128xf32>
    %311 = arith.divf %309, %310 : vector<8x128xf32>
    %312 = arith.mulf %303, %284 : vector<8x128xf32>
    %313 = arith.mulf %297, %305 : vector<8x128xf32>
    %314 = arith.addf %312, %313 : vector<8x128xf32>
    %315 = math.tanh %314 : vector<8x128xf32>
    %316 = arith.mulf %311, %315 : vector<8x128xf32>
    %c0_138 = arith.constant 0 : index
    %c0_139 = arith.constant 0 : index
    %317 = vector.load %arg6[%c0_138, %c0_139] : memref<8x128xf32, #tpu.memory_space<vmem>>, vector<8x128xf32>
    tpu.vector_store %arg6[%c0_138, %c0_139], %314 {strides = array<i32>} : memref<8x128xf32, #tpu.memory_space<vmem>>, vector<8x128xf32>,
    %c0_140 = arith.constant 0 : index
    %c0_141 = arith.constant 0 : index
    %318 = vector.load %arg5[%c0_140, %c0_141] : memref<8x128xf32, #tpu.memory_space<vmem>>, vector<8x128xf32>
    tpu.vector_store %arg5[%c0_140, %c0_141], %316 {strides = array<i32>} : memref<8x128xf32, #tpu.memory_space<vmem>>, vector<8x128xf32>,
    %319 = arith.index_cast %c7_i32 : i32 to index
    %c0_142 = arith.constant 0 : index
    %c0_143 = arith.constant 0 : index
    %320 = vector.load %arg4[%319, %c0_142, %c0_143] : memref<8x8x128xf32, #tpu.memory_space<vmem>>, vector<1x8x128xf32>
    %321 = vector.shape_cast %320 : vector<1x8x128xf32> to vector<8x128xf32>
    %322 = vector.shape_cast %316 : vector<8x128xf32> to vector<1x8x128xf32>
    tpu.vector_store %arg4[%319, %c0_142, %c0_143], %322 {strides = array<i32>} : memref<8x8x128xf32, #tpu.memory_space<vmem>>, vector<1x8x128xf32>,
    %c8_i32 = arith.constant 8 : i32
    return
  }
  func.func @transform_0(%arg0: i32, %arg1: i32) -> (i32, i32, i32) {
    %c0_i32 = arith.constant 0 : i32
    %c0_i32_0 = arith.constant 0 : i32
    return %arg1, %arg0, %c0_i32 : i32, i32, i32
  }
  func.func @transform_2(%arg0: i32, %arg1: i32) -> (i32, i32, i32) {
    %c0_i32 = arith.constant 0 : i32
    %c0_i32_0 = arith.constant 0 : i32
    return %arg1, %arg0, %c0_i32 : i32, i32, i32
  }
}

</mosaic_0001>

<bundles_post_ra>
// kernel: tpu_custom_call.1
= control target key start
LH: loop header
LB: loop body
LE: loop exit
PB: predicated region body
PF: predicated region fallthrough
CT: control target
= control target key end

     0   :  { %7 = vsyncpa [#allocation6], 0  ;;  %s4228_s0 = inlined_call_operand.hbm [shape: f32[8,8,512], index: 0, kind: input, shape index: {}]   ;;  %s4229_s1 = inlined_call_operand.hbm [shape: bf16[128,512], index: 1, kind: input, shape index: {}]   ;;  %s4230_s2 = inlined_call_operand.hbm [shape: f32[8,8,128], index: 2, kind: output, shape index: {}]  }
   0x1   :  { %8 = vsyncpa [#allocation7], 0  ;;  %s13_s11 = sshll.u32 %s4228_s0, 4  ;;  %s4168_s12 = smov [#allocation5]   ;;  %s14_s11 = int_to_ptr.hbm [resolvable:$true] %s13_s11 }
   0x2   :  { %s15_s13 = sshll.u32 %s4168_s12, 4  ;;  %s4169_s14 = smov 512   ;;  %s16_s13 = int_to_ptr.vmem [resolvable:$true] %s15_s13 }
   0x3   :  { %s4170_s15 = smov 32  }
   0x4   :  { %21 = dma.hbm_to_vmem [thread:$0]  %s14_s11, 4096, %s16_s13, [#allocation6], %s4169_s14, %s4169_s14, %s4170_s15  }
   0x5   :  { %4162 = dma.done.wait [#allocation6], 4096  }
   0x6   :  { %4163 = vsyncadd [#allocation6], 4294963200 }
   0x7   :  { %s37_s18 = sshll.u32 %s4229_s1, 4  ;;  %s4171_s19 = smov [#allocation4]   ;;  %s38_s18 = int_to_ptr.hbm [resolvable:$true] %s37_s18 }
   0x8   :  { %s39_s20 = sshll.u32 %s4171_s19, 4  ;;  %s40_s20 = int_to_ptr.vmem [resolvable:$true] %s39_s20 }
   0x9   :  { %42 = dma.hbm_to_vmem [thread:$0]  %s38_s18, 4096, %s40_s20, [#allocation9] }
   0xa   :  { %4164 = dma.done.wait [#allocation9], 4096 }
   0xb   :  { %4165 = vsyncadd [#allocation9], 4294963200  ;;  %v2764_v0 = vld [vmem:[#allocation4 + $0xe0] sm:$0xf]  ;;  %v3728_v1 = vld [vmem:[#allocation4 + $0xec] sm:$0xf0] }
   0xc   :  { %v3726_v2 = vld [vmem:[#allocation4 + $0xe4] sm:$0xf]  ;;  %v2765_v3 = vor.u32 %v3728_v1, %v2764_v0  ;;  %v2766_v4 = vld [vmem:[#allocation4 + $0xf0] sm:$0xf0]  ;;  %v3727_v5 = vld [vmem:[#allocation4 + $0xec] sm:$0xf] }
   0xd   :  { %v2774_v6 = vld [vmem:[#allocation4 + $0xf8] sm:$0xf0]  ;;  %v2769_v7 = vor.u32 %v3726_v2, %v2766_v4  ;;  %v2748_v9 = vld [vmem:[#allocation4 + $0xc0] sm:$0xf]  ;;  %v3724_v10 = vld [vmem:[#allocation4 + $0xcc] sm:$0xf0] }
   0xe   :  { %v2777_v8 = vor.u32 %v3727_v5, %v2774_v6  ;;  %v3722_v11 = vld [vmem:[#allocation4 + $0xc4] sm:$0xf]  ;;  %244 = vmatpush.bf16.msra.mxu0 %v2765_v3  ;;  %v2749_v12 = vor.u32 %v3724_v10, %v2748_v9  ;;  %v2750_v13 = vld [vmem:[#allocation4 + $0xd0] sm:$0xf0]  ;;  %v3723_v14 = vld [vmem:[#allocation4 + $0xcc] sm:$0xf] }
   0xf   :  { %v2758_v15 = vld [vmem:[#allocation4 + $0xd8] sm:$0xf0]  ;;  %257 = vmatpush.bf16.msra.mxu1 %v2769_v7  ;;  %v2753_v16 = vor.u32 %v3722_v11, %v2750_v13  ;;  %v2772_v18 = vld [vmem:[#allocation4 + $0xe8] sm:$0xf]  ;;  %v3729_v19 = vld [vmem:[#allocation4 + $0xf4] sm:$0xf0] }
  0x10   :  { %283 = vmatpush.bf16.msra.mxu3 %v2777_v8  ;;  %v2761_v17 = vor.u32 %v3723_v14, %v2758_v15  ;;  %v2732_v20 = vld [vmem:[#allocation4 + $0xa0] sm:$0xf]  ;;  %v2773_v21 = vor.u32 %v3729_v19, %v2772_v18  ;;  %v3720_v22 = vld [vmem:[#allocation4 + $0xac] sm:$0xf0]  ;;  %v3718_v23 = vld [vmem:[#allocation4 + $0xa4] sm:$0xf] }
  0x11   :  { %v2734_v24 = vld [vmem:[#allocation4 + $0xb0] sm:$0xf0]  ;;  %v3719_v25 = vld [vmem:[#allocation4 + $0xac] sm:$0xf]  ;;  %v2742_v26 = vld [vmem:[#allocation4 + $0xb8] sm:$0xf0]  ;;  %v2733_v28 = vor.u32 %v3720_v22, %v2732_v20 }
  0x12   :  { %v2756_v27 = vld [vmem:[#allocation4 + $0xc8] sm:$0xf]  ;;  %245 = vmatpush.bf16.msra.mxu0 %v2749_v12  ;;  %270 = vmatpush.bf16.msra.mxu2 %v2773_v21  ;;  %v3725_v29 = vld [vmem:[#allocation4 + $0xd4] sm:$0xf0]  ;;  %v2716_v30 = vld [vmem:[#allocation4 + $0x80] sm:$0xf]  ;;  %v2737_v32 = vor.u32 %v3718_v23, %v2734_v24  ;;  %v2745_v33 = vor.u32 %v3719_v25, %v2742_v26 }
  0x13   :  { %v3716_v31 = vld [vmem:[#allocation4 + $0x8c] sm:$0xf0]  ;;  %258 = vmatpush.bf16.msra.mxu1 %v2753_v16  ;;  %v2757_v34 = vor.u32 %v3725_v29, %v2756_v27  ;;  %v3714_v35 = vld [vmem:[#allocation4 + $0x84] sm:$0xf]  ;;  %v2718_v36 = vld [vmem:[#allocation4 + $0x90] sm:$0xf0] }
  0x14   :  { %284 = vmatpush.bf16.msra.mxu3 %v2761_v17  ;;  %v3715_v37 = vld [vmem:[#allocation4 + $0x8c] sm:$0xf]  ;;  %v2726_v38 = vld [vmem:[#allocation4 + $0x98] sm:$0xf0]  ;;  %v2740_v39 = vld [vmem:[#allocation4 + $0xa8] sm:$0xf]  ;;  %v2717_v41 = vor.u32 %v3716_v31, %v2716_v30  ;;  %v2721_v45 = vor.u32 %v3714_v35, %v2718_v36 }
  0x15   :  { %v3721_v40 = vld [vmem:[#allocation4 + $0xb4] sm:$0xf0]  ;;  %v2700_v43 = vld [vmem:[#allocation4 + $0x60] sm:$0xf]  ;;  %v3712_v44 = vld [vmem:[#allocation4 + $0x6c] sm:$0xf0]  ;;  %v2729_v46 = vor.u32 %v3715_v37, %v2726_v38 }
  0x16   :  { %246 = vmatpush.bf16.msra.mxu0 %v2733_v28  ;;  %271 = vmatpush.bf16.msra.mxu2 %v2757_v34  ;;  %v2741_v42 = vor.u32 %v3721_v40, %v2740_v39  ;;  %v3710_v47 = vld [vmem:[#allocation4 + $0x64] sm:$0xf]  ;;  %v2724_v48 = vld [vmem:[#allocation4 + $0x88] sm:$0xf]  ;;  %v3717_v49 = vld [vmem:[#allocation4 + $0x94] sm:$0xf0]  ;;  %v2701_v53 = vor.u32 %v3712_v44, %v2700_v43 }
  0x17   :  { %259 = vmatpush.bf16.msra.mxu1 %v2737_v32  ;;  %v2702_v50 = vld [vmem:[#allocation4 + $0x70] sm:$0xf0]  ;;  %v3711_v51 = vld [vmem:[#allocation4 + $0x6c] sm:$0xf]  ;;  %v2710_v52 = vld [vmem:[#allocation4 + $0x78] sm:$0xf0]  ;;  %v2725_v54 = vor.u32 %v3717_v49, %v2724_v48 }
  0x18   :  { %285 = vmatpush.bf16.msra.mxu3 %v2745_v33  ;;  %v2684_v55 = vld [vmem:[#allocation4 + $0x40] sm:$0xf]  ;;  %v3708_v56 = vld [vmem:[#allocation4 + $0x4c] sm:$0xf0]  ;;  %v2705_v57 = vor.u32 %v3710_v47, %v2702_v50  ;;  %v2713_v58 = vor.u32 %v3711_v51, %v2710_v52  ;;  %v3706_v59 = vld [vmem:[#allocation4 + $0x44] sm:$0xf] }
  0x19   :  { %v2708_v60 = vld [vmem:[#allocation4 + $0x68] sm:$0xf]  ;;  %v3713_v61 = vld [vmem:[#allocation4 + $0x74] sm:$0xf0]  ;;  %v2686_v62 = vld [vmem:[#allocation4 + $0x50] sm:$0xf0]  ;;  %v2685_v1 = vor.u32 %v3708_v56, %v2684_v55 }
  0x1a   :  { %247 = vmatpush.bf16.msra.mxu0 %v2717_v41  ;;  %272 = vmatpush.bf16.msra.mxu2 %v2741_v42  ;;  %v3707_v63 = vld [vmem:[#allocation4 + $0x4c] sm:$0xf]  ;;  %v2694_v0 = vld [vmem:[#allocation4 + $0x58] sm:$0xf0]  ;;  %v2709_v2 = vor.u32 %v3713_v61, %v2708_v60  ;;  %v2668_v3 = vld [vmem:[#allocation4 + $0x20] sm:$0xf]  ;;  %v2689_v5 = vor.u32 %v3706_v59, %v2686_v62 }
  0x1b   :  { %260 = vmatpush.bf16.msra.mxu1 %v2721_v45  ;;  %v3704_v4 = vld [vmem:[#allocation4 + $0x2c] sm:$0xf0]  ;;  %v2697_v6 = vor.u32 %v3707_v63, %v2694_v0  ;;  %v3702_v7 = vld [vmem:[#allocation4 + $0x24] sm:$0xf]  ;;  %v2692_v8 = vld [vmem:[#allocation4 + $0x48] sm:$0xf] }
  0x1c   :  { %286 = vmatpush.bf16.msra.mxu3 %v2729_v46  ;;  %v3709_v9 = vld [vmem:[#allocation4 + $0x54] sm:$0xf0]  ;;  %v2670_v10 = vld [vmem:[#allocation4 + $0x30] sm:$0xf0]  ;;  %v3703_v11 = vld [vmem:[#allocation4 + $0x2c] sm:$0xf]  ;;  %v2669_v13 = vor.u32 %v3704_v4, %v2668_v3 }
  0x1d   :  { %v2678_v12 = vld [vmem:[#allocation4 + $0x38] sm:$0xf0]  ;;  %v2693_v14 = vor.u32 %v3709_v9, %v2692_v8  ;;  %v2652_v15 = vld [vmem:[#allocation4] sm:$0xf]  ;;  %v3700_v16 = vld [vmem:[#allocation4 + $0xc] sm:$0xf0]  ;;  %v2673_v17 = vor.u32 %v3702_v7, %v2670_v10 }
  0x1e   :  { %248 = vmatpush.bf16.msra.mxu0 %v2701_v53  ;;  %273 = vmatpush.bf16.msra.mxu2 %v2725_v54  ;;  %v2681_v18 = vor.u32 %v3703_v11, %v2678_v12  ;;  %v3698_v19 = vld [vmem:[#allocation4 + $0x4] sm:$0xf]  ;;  %v2676_v20 = vld [vmem:[#allocation4 + $0x28] sm:$0xf]  ;;  %v3705_v21 = vld [vmem:[#allocation4 + $0x34] sm:$0xf0]  ;;  %v2653_v25 = vor.u32 %v3700_v16, %v2652_v15 }
  0x1f   :  { %261 = vmatpush.bf16.msra.mxu1 %v2705_v57  ;;  %v2654_v22 = vld [vmem:[#allocation4 + $0x10] sm:$0xf0]  ;;  %v3699_v23 = vld [vmem:[#allocation4 + $0xc] sm:$0xf]  ;;  %v2662_v24 = vld [vmem:[#allocation4 + $0x18] sm:$0xf0]  ;;  %v2677_v26 = vor.u32 %v3705_v21, %v2676_v20 }
  0x20   :  { %287 = vmatpush.bf16.msra.mxu3 %v2713_v58  ;;  %v2657_v27 = vor.u32 %v3698_v19, %v2654_v22  ;;  %v2665_v28 = vor.u32 %v3699_v23, %v2662_v24  ;;  %v2660_v29 = vld [vmem:[#allocation4 + $0x8] sm:$0xf]  ;;  %v3701_v30 = vld [vmem:[#allocation4 + $0x14] sm:$0xf0]  ;;  %v4172_v32 = vmov 0.0|0.0   ;;  %v296_v16 = vld [vmem:[#allocation5] sm:$0xff] }
  0x21   :  { %v2661_v31 = vor.u32 %v3701_v30, %v2660_v29  ;;  %v2895_v33 = vld [vmem:[#allocation4 + $0xe0] sm:$0xf]  ;;  %v3760_v34 = vld [vmem:[#allocation4 + $0xec] sm:$0xf0]  ;;  %v3758_v35 = vld [vmem:[#allocation4 + $0xe4] sm:$0xf] }
  0x22   :  { %249 = vmatpush.bf16.msra.mxu0 %v2685_v1  ;;  %274 = vmatpush.bf16.msra.mxu2 %v2709_v2  ;;  %v2896_v36 = vor.u32 %v3760_v34, %v2895_v33  ;;  %v2897_v37 = vld [vmem:[#allocation4 + $0xf0] sm:$0xf0]  ;;  %v2903_v38 = vld [vmem:[#allocation4 + $0xe8] sm:$0xf]  ;;  %v3761_v39 = vld [vmem:[#allocation4 + $0xf4] sm:$0xf0] }
  0x23   :  { %262 = vmatpush.bf16.msra.mxu1 %v2689_v5  ;;  %v2900_v40 = vor.u32 %v3758_v35, %v2897_v37  ;;  %v2904_v41 = vor.u32 %v3761_v39, %v2903_v38  ;;  %v3759_v42 = vld [vmem:[#allocation4 + $0xec] sm:$0xf]  ;;  %v2905_v43 = vld [vmem:[#allocation4 + $0xf8] sm:$0xf0]  ;;  %v2879_v45 = vld [vmem:[#allocation4 + $0xc0] sm:$0xf] }
  0x24   :  { %288 = vmatpush.bf16.msra.mxu3 %v2697_v6  ;;  %v2908_v44 = vor.u32 %v3759_v42, %v2905_v43  ;;  %v3756_v46 = vld [vmem:[#allocation4 + $0xcc] sm:$0xf0]  ;;  %v3754_v47 = vld [vmem:[#allocation4 + $0xc4] sm:$0xf]  ;;  %v2881_v49 = vld [vmem:[#allocation4 + $0xd0] sm:$0xf0] }
  0x25   :  { %v2880_v48 = vor.u32 %v3756_v46, %v2879_v45  ;;  %v2887_v50 = vld [vmem:[#allocation4 + $0xc8] sm:$0xf]  ;;  %v3757_v51 = vld [vmem:[#allocation4 + $0xd4] sm:$0xf0]  ;;  %v2884_v52 = vor.u32 %v3754_v47, %v2881_v49  ;;  %v3755_v54 = vld [vmem:[#allocation4 + $0xcc] sm:$0xf] }
  0x26   :  { %250 = vmatpush.bf16.msra.mxu0 %v2669_v13  ;;  %275 = vmatpush.bf16.msra.mxu2 %v2693_v14  ;;  %v2888_v53 = vor.u32 %v3757_v51, %v2887_v50  ;;  %v2889_v55 = vld [vmem:[#allocation4 + $0xd8] sm:$0xf0]  ;;  %v2863_v57 = vld [vmem:[#allocation4 + $0xa0] sm:$0xf]  ;;  %v3752_v58 = vld [vmem:[#allocation4 + $0xac] sm:$0xf0] }
  0x27   :  { %263 = vmatpush.bf16.msra.mxu1 %v2673_v17  ;;  %v2892_v56 = vor.u32 %v3755_v54, %v2889_v55  ;;  %v3750_v59 = vld [vmem:[#allocation4 + $0xa4] sm:$0xf]  ;;  %v2864_v60 = vor.u32 %v3752_v58, %v2863_v57  ;;  %v2865_v61 = vld [vmem:[#allocation4 + $0xb0] sm:$0xf0]  ;;  %v2871_v62 = vld [vmem:[#allocation4 + $0xa8] sm:$0xf] }
  0x28   :  { %289 = vmatpush.bf16.msra.mxu3 %v2681_v18  ;;  %v2868_v63 = vor.u32 %v3750_v59, %v2865_v61  ;;  %v3753_v0 = vld [vmem:[#allocation4 + $0xb4] sm:$0xf0]  ;;  %v3751_v1 = vld [vmem:[#allocation4 + $0xac] sm:$0xf]  ;;  %v2873_v2 = vld [vmem:[#allocation4 + $0xb8] sm:$0xf0] }
  0x29   :  { %v2872_v3 = vor.u32 %v3753_v0, %v2871_v62  ;;  %v2876_v4 = vor.u32 %v3751_v1, %v2873_v2  ;;  %v2847_v5 = vld [vmem:[#allocation4 + $0x80] sm:$0xf]  ;;  %v3748_v6 = vld [vmem:[#allocation4 + $0x8c] sm:$0xf0]  ;;  %v3746_v7 = vld [vmem:[#allocation4 + $0x84] sm:$0xf] }
  0x2a   :  { %251 = vmatpush.bf16.msra.mxu0 %v2653_v25  ;;  %276 = vmatpush.bf16.msra.mxu2 %v2677_v26  ;;  %v2848_v8 = vor.u32 %v3748_v6, %v2847_v5  ;;  %v2849_v9 = vld [vmem:[#allocation4 + $0x90] sm:$0xf0]  ;;  %v2855_v10 = vld [vmem:[#allocation4 + $0x88] sm:$0xf]  ;;  %v3749_v11 = vld [vmem:[#allocation4 + $0x94] sm:$0xf0] }
  0x2b   :  { %264 = vmatpush.bf16.msra.mxu1 %v2657_v27  ;;  %v2852_v12 = vor.u32 %v3746_v7, %v2849_v9  ;;  %v2856_v13 = vor.u32 %v3749_v11, %v2855_v10  ;;  %v3747_v14 = vld [vmem:[#allocation4 + $0x8c] sm:$0xf]  ;;  %v2857_v15 = vld [vmem:[#allocation4 + $0x98] sm:$0xf0]  ;;  %v2831_v18 = vld [vmem:[#allocation4 + $0x60] sm:$0xf] }
  0x2c   :  { %290 = vmatpush.bf16.msra.mxu3 %v2665_v28  ;;  %v2860_v17 = vor.u32 %v3747_v14, %v2857_v15  ;;  %v3744_v19 = vld [vmem:[#allocation4 + $0x6c] sm:$0xf0]  ;;  %v3742_v20 = vld [vmem:[#allocation4 + $0x64] sm:$0xf]  ;;  %v2833_v22 = vld [vmem:[#allocation4 + $0x70] sm:$0xf0] }
  0x2d   :  { %252 = vmatmul.bf16.vlgmr.msra.gmra.mxu0 %v4172_v32  ;;  %v2832_v21 = vor.u32 %v3744_v19, %v2831_v18  ;;  %v2839_v23 = vld [vmem:[#allocation4 + $0x68] sm:$0xf]  ;;  %v3745_v24 = vld [vmem:[#allocation4 + $0x74] sm:$0xf0]  ;;  %v2836_v26 = vor.u32 %v3742_v20, %v2833_v22  ;;  %v3743_v28 = vld [vmem:[#allocation4 + $0x6c] sm:$0xf] }
  0x2e   :  { %265 = vmatmul.bf16.vlgmr.msra.gmra.mxu1 %v4172_v32  ;;  %277 = vmatpush.bf16.msra.mxu2 %v2661_v31  ;;  %v297_v25 = vld [vmem:[#allocation5 + $0x8] sm:$0xff]  ;;  %v2840_v27 = vor.u32 %v3745_v24, %v2839_v23  ;;  %v2841_v29 = vld [vmem:[#allocation4 + $0x78] sm:$0xf0]  ;;  %v2815_v34 = vld [vmem:[#allocation4 + $0x40] sm:$0xf]  ;;  %s4173_s0 = smov [#allocation8]  }
  0x2f   :  { %291 = vmatmul.bf16.vlgmr.msra.gmra.mxu3 %v4172_v32  ;;  %565 = vmatpush.bf16.msrb.mxu0 %v2896_v36  ;;  %v2844_v31 = vor.u32 %v3743_v28, %v2841_v29  ;;  %v3740_v35 = vld [vmem:[#allocation4 + $0x4c] sm:$0xf0]  ;;  %v3738_v36 = vld [vmem:[#allocation4 + $0x44] sm:$0xf]  ;;  %v2817_v39 = vld [vmem:[#allocation4 + $0x50] sm:$0xf0] }
  0x30   :  { %578 = vmatpush.bf16.msrb.mxu1 %v2900_v40  ;;  %604 = vmatpush.bf16.msrb.mxu3 %v2908_v44  ;;  %v2816_v38 = vor.u32 %v3740_v35, %v2815_v34  ;;  %v2823_v40 = vld [vmem:[#allocation4 + $0x48] sm:$0xf]  ;;  %v299_v43 = vld [vmem:[#allocation5 + $0x18] sm:$0xff]  ;;  %v2820_v44 = vor.u32 %v3738_v36, %v2817_v39  ;;  %v3739_v46 = vld [vmem:[#allocation4 + $0x4c] sm:$0xf]  ;;  %s2635_s1 = sshll.u32 %s4173_s0, 4  ;;  %s2636_s1 = int_to_ptr.vmem [resolvable:$true] %s2635_s1 }
  0x31   :  { %278 = vmatmul.bf16.vlgmr.msra.gmra.mxu2 %v4172_v32  ;;  %v2825_v47 = vld [vmem:[#allocation4 + $0x58] sm:$0xf0]  ;;  %v2799_v50 = vld [vmem:[#allocation4 + $0x20] sm:$0xf]  ;;  %v3736_v51 = vld [vmem:[#allocation4 + $0x2c] sm:$0xf0] }
  0x32   :  { %591 = vmatpush.bf16.msrb.mxu2 %v2904_v41  ;;  %v3741_v41 = vld [vmem:[#allocation4 + $0x54] sm:$0xf0]  ;;  %v2828_v49 = vor.u32 %v3739_v46, %v2825_v47  ;;  %v2801_v54 = vld [vmem:[#allocation4 + $0x30] sm:$0xf0]  ;;  %v2807_v55 = vld [vmem:[#allocation4 + $0x28] sm:$0xf] }
  0x33   :  { %566 = vmatpush.bf16.msrb.mxu0 %v2880_v48  ;;  %v2824_v45 = vor.u32 %v3741_v41, %v2823_v40  ;;  %v3737_v57 = vld [vmem:[#allocation4 + $0x34] sm:$0xf0]  ;;  %v3735_v58 = vld [vmem:[#allocation4 + $0x2c] sm:$0xf]  ;;  %v2809_v59 = vld [vmem:[#allocation4 + $0x38] sm:$0xf0] }
  0x34   :  { %579 = vmatpush.bf16.msrb.mxu1 %v2884_v52  ;;  %605 = vmatpush.bf16.msrb.mxu3 %v2892_v56  ;;  %v2800_v52 = vor.u32 %v3736_v51, %v2799_v50  ;;  %v2808_v61 = vor.u32 %v3737_v57, %v2807_v55  ;;  %v2812_v62 = vor.u32 %v3735_v58, %v2809_v59  ;;  %v3732_v0 = vld [vmem:[#allocation4 + $0xc] sm:$0xf0]  ;;  %v3730_v1 = vld [vmem:[#allocation4 + $0x4] sm:$0xf]  ;;  %v2785_v5 = vld [vmem:[#allocation4 + $0x10] sm:$0xf0] }
  0x35   :  { %v2791_v6 = vld [vmem:[#allocation4 + $0x8] sm:$0xf]  ;;  %v3733_v7 = vld [vmem:[#allocation4 + $0x14] sm:$0xf0]  ;;  %v2788_v9 = vor.u32 %v3730_v1, %v2785_v5  ;;  %v3731_v10 = vld [vmem:[#allocation4 + $0xc] sm:$0xf] }
  0x36   :  { %592 = vmatpush.bf16.msrb.mxu2 %v2888_v53  ;;  %v3734_v53 = vld [vmem:[#allocation4 + $0x24] sm:$0xf]  ;;  %v2793_v11 = vld [vmem:[#allocation4 + $0x18] sm:$0xf0]  ;;  %v298_v20 = vld [vmem:[#allocation5 + $0x10] sm:$0xff]  ;;  %s2637_s23 = sshll.u32 %s4230_s2, 4  ;;  %s2638_s23 = int_to_ptr.hbm [resolvable:$true] %s2637_s23 }
  0x37   :  { %567 = vmatpush.bf16.msrb.mxu0 %v2864_v60  ;;  %v2804_v56 = vor.u32 %v3734_v53, %v2801_v54  ;;  %v2796_v14 = vor.u32 %v3731_v10, %v2793_v11  ;;  %v3790_v1 = vld [vmem:[#allocation4 + $0xe4] sm:$0xf]  ;;  %v3793_v5 = vld [vmem:[#allocation4 + $0xf4] sm:$0xf0]  ;;  %v3010_v11 = vld [vmem:[#allocation4 + $0xc0] sm:$0xf] }
  0x38   :  { %580 = vmatpush.bf16.msrb.mxu1 %v2868_v63  ;;  %606 = vmatpush.bf16.msrb.mxu3 %v2876_v4  ;;  %v2783_v63 = vld [vmem:[#allocation4] sm:$0xf]  ;;  %s4174_s24 = smov 128   ;;  %s4175_s25 = smov 8  }
  0x39   :  { %v2784_v4 = vor.u32 %v3732_v0, %v2783_v63  ;;  %v3026_v63 = vld [vmem:[#allocation4 + $0xe0] sm:$0xf]  ;;  %v3792_v0 = vld [vmem:[#allocation4 + $0xec] sm:$0xf0] }
  0x3a   :  { %593 = vmatpush.bf16.msrb.mxu2 %v2872_v3 }
  0x3b   :  { %568 = vmatpush.bf16.msrb.mxu0 %v2848_v8 }
  0x3c   :  { %581 = vmatpush.bf16.msrb.mxu1 %v2852_v12  ;;  %607 = vmatpush.bf16.msrb.mxu3 %v2860_v17 }
  0x3e   :  { %594 = vmatpush.bf16.msrb.mxu2 %v2856_v13  ;;  %v2792_v13 = vor.u32 %v3733_v7, %v2791_v6 }
  0x3f   :  { %569 = vmatpush.bf16.msrb.mxu0 %v2832_v21 }
  0x40   :  { %582 = vmatpush.bf16.msrb.mxu1 %v2836_v26  ;;  %608 = vmatpush.bf16.msrb.mxu3 %v2844_v31 }
  0x42   :  { %595 = vmatpush.bf16.msrb.mxu2 %v2840_v27 }
  0x43   :  { %570 = vmatpush.bf16.msrb.mxu0 %v2816_v38 }
  0x44   :  { %583 = vmatpush.bf16.msrb.mxu1 %v2820_v44  ;;  %609 = vmatpush.bf16.msrb.mxu3 %v2828_v49 }
  0x46   :  { %596 = vmatpush.bf16.msrb.mxu2 %v2824_v45 }
  0x47   :  { %571 = vmatpush.bf16.msrb.mxu0 %v2800_v52 }
  0x48   :  { %584 = vmatpush.bf16.msrb.mxu1 %v2804_v56  ;;  %610 = vmatpush.bf16.msrb.mxu3 %v2812_v62 }
  0x4a   :  { %597 = vmatpush.bf16.msrb.mxu2 %v2808_v61 }
  0x4b   :  { %572 = vmatpush.bf16.msrb.mxu0 %v2784_v4  ;;  %v3034_v4 = vld [vmem:[#allocation4 + $0xe8] sm:$0xf] }
  0x4c   :  { %585 = vmatpush.bf16.msrb.mxu1 %v2788_v9  ;;  %611 = vmatpush.bf16.msrb.mxu3 %v2796_v14  ;;  %v3035_v7 = vor.u32 %v3793_v5, %v3034_v4  ;;  %v3036_v9 = vld [vmem:[#allocation4 + $0xf8] sm:$0xf0]  ;;  %v3770_v4 = vld [vmem:[#allocation4 + $0x44] sm:$0xf] }
  0x4e   :  { %598 = vmatpush.bf16.msrb.mxu2 %v2792_v13  ;;  %v3786_v13 = vld [vmem:[#allocation4 + $0xc4] sm:$0xf] }
  0x52   :  { %914 = vmatpush.bf16.msra.mxu2 %v3035_v7  ;;  %v2954_v7 = vld [vmem:[#allocation4 + $0x48] sm:$0xf] }
  0xaa   :  { %v253_v30 = vpop.f32.mrf.mxu0 }
  0xab   :  { %v300_v32 = vadd.f32 %v296_v16, %v253_v30  ;;  %v266_v33 = vpop.f32.mrf.mxu1 }
  0xac   :  { %v301_v37 = vadd.f32 %v297_v25, %v266_v33 }
  0xad   :  { %v2778_v42 = vmul.f32 -1.442695, %v300_v32 }
  0xae   :  { %v2779_v48 = vmul.f32 -1.442695, %v301_v37 }
  0xaf   :  { %3962 = vpow2.f32 %v2778_v42 }
  0xb0   :  { %3964 = vpow2.f32 %v2779_v48 }
  0xb2   :  { %v292_v60 = vpop.f32.mrf.mxu3  ;;  %v255_v3 = vpop.f32.mrf.mxu0 }
  0xb3   :  { %v303_v2 = vadd.f32 %v299_v43, %v292_v60  ;;  %v268_v8 = vpop.f32.mrf.mxu1  ;;  %v3028_v3 = vld [vmem:[#allocation4 + $0xf0] sm:$0xf0] }
  0xb4   :  { %v279_v16 = vpop.f32.mrf.mxu2  ;;  %v3031_v6 = vor.u32 %v3790_v1, %v3028_v3  ;;  %v3791_v8 = vld [vmem:[#allocation4 + $0xec] sm:$0xf]  ;;  %v3772_v3 = vld [vmem:[#allocation4 + $0x4c] sm:$0xf0] }
  0xb5   :  { %v2780_v12 = vmul.f32 -1.442695, %v303_v2  ;;  %v3963_v15 = vpop.eup %3962  ;;  %v302_v23 = vadd.f32 %v298_v20, %v279_v16  ;;  %v3027_v2 = vor.u32 %v3792_v0, %v3026_v63  ;;  %v3039_v10 = vor.u32 %v3791_v8, %v3036_v9  ;;  %v3018_v16 = vld [vmem:[#allocation4 + $0xc8] sm:$0xf]  ;;  %v3787_v20 = vld [vmem:[#allocation4 + $0xcc] sm:$0xf] }
  0xb6   :  { %v3965_v17 = vpop.eup %3964  ;;  %v307_v18 = vadd.f32 1.0, %v3963_v15  ;;  %901 = vmatpush.bf16.msra.mxu1 %v3031_v6  ;;  %v3012_v15 = vld [vmem:[#allocation4 + $0xd0] sm:$0xf0]  ;;  %v3773_v8 = vld [vmem:[#allocation4 + $0x54] sm:$0xf0] }
  0xb7   :  { %3966 = vpow2.f32 %v2780_v12  ;;  %v326_v19 = vadd.f32 1.0, %v3965_v17  ;;  %888 = vmatpush.bf16.msra.mxu0 %v3027_v2  ;;  %v3788_v12 = vld [vmem:[#allocation4 + $0xcc] sm:$0xf0]  ;;  %927 = vmatpush.bf16.msra.mxu3 %v3039_v10  ;;  %v3789_v17 = vld [vmem:[#allocation4 + $0xd4] sm:$0xf0] }
  0xb8   :  { %3968 = vrcp.f32 %v307_v18  ;;  %v319_v32 = vand.u32 2147483648, %v307_v18  ;;  %v317_v35 = vand.u32 2147483647, %v307_v18  ;;  %vm313_vm2 = vweird.f32 %v307_v18  ;;  %v2946_v2 = vld [vmem:[#allocation4 + $0x40] sm:$0xf] }
  0xb9   :  { %3970 = vrcp.f32 %v326_v19  ;;  %v338_v33 = vand.u32 2147483648, %v326_v19  ;;  %v336_v37 = vand.u32 2147483647, %v326_v19  ;;  %vm332_vm3 = vweird.f32 %v326_v19  ;;  %v2948_v6 = vld [vmem:[#allocation4 + $0x50] sm:$0xf0] }
  0xba   :  { %v294_v21 = vpop.f32.mrf.mxu3  ;;  %v320_v42 = vor.u32 1.1754944e-38, %v319_v32  ;;  %vm318_vm5 = vcmp.eq.f32.partialorder %v317_v35, 8.507059e+37  ;;  %v3011_v14 = vor.u32 %v3788_v12, %v3010_v11  ;;  %v3783_v32 = vld [vmem:[#allocation4 + $0xac] sm:$0xf]  ;;  %v2978_v35 = vld [vmem:[#allocation4 + $0x80] sm:$0xf]  ;;  %v2947_v5 = vor.u32 %v3772_v3, %v2946_v2 }
  0xbb   :  { %v339_v44 = vor.u32 1.1754944e-38, %v338_v33  ;;  %vm337_vm7 = vcmp.eq.f32.partialorder %v336_v37, 8.507059e+37  ;;  %v3020_v21 = vld [vmem:[#allocation4 + $0xd8] sm:$0xf0]  ;;  %v3778_v37 = vld [vmem:[#allocation4 + $0x84] sm:$0xf]  ;;  %v2951_v12 = vor.u32 %v3770_v4, %v2948_v6 }
  0xbc   :  { %v281_v25 = vpop.f32.mrf.mxu2  ;;  %889 = vmatpush.bf16.msra.mxu0 %v3011_v14  ;;  %v3004_v33 = vld [vmem:[#allocation4 + $0xb8] sm:$0xf0]  ;;  %v3771_v14 = vld [vmem:[#allocation4 + $0x4c] sm:$0xf] }
  0xbd   :  { %v3967_v22 = vpop.eup %3966  ;;  %v3782_v25 = vld [vmem:[#allocation4 + $0xa4] sm:$0xf]  ;;  %v621_v11 = vld [vmem:[#allocation5 + $0x38] sm:$0xff] }
  0xbe   :  { %v346_v24 = vadd.f32 1.0, %v3967_v22  ;;  %v3969_v26 = vpop.eup %3968  ;;  %v3023_v22 = vor.u32 %v3787_v20, %v3020_v21  ;;  %v3766_v20 = vld [vmem:[#allocation4 + $0x24] sm:$0xf]  ;;  %v2932_v21 = vld [vmem:[#allocation4 + $0x30] sm:$0xf0] }
  0xbf   :  { %v3971_v27 = vpop.eup %3970  ;;  %v309_v28 = vmul.f32 %v3969_v26, %v307_v18  ;;  %vm314_vm0 = vweird.f32 %v3969_v26  ;;  %v3015_v18 = vor.u32 %v3786_v13, %v3012_v15  ;;  %v2955_v13 = vor.u32 %v3773_v8, %v2954_v7  ;;  %v2956_v15 = vld [vmem:[#allocation4 + $0x58] sm:$0xf0] }
  0xc0   :  { %3972 = vrcp.f32 %v346_v24  ;;  %v328_v29 = vmul.f32 %v3971_v27, %v326_v19  ;;  %vm333_vm1 = vweird.f32 %v3971_v27  ;;  %vm315_vm4 = vmor %vm313_vm2, %vm314_vm0  ;;  %v358_v55 = vand.u32 2147483648, %v346_v24  ;;  %928 = vmatpush.bf16.msra.mxu3 %v3023_v22  ;;  %v2938_v22 = vld [vmem:[#allocation4 + $0x28] sm:$0xf] }
  0xc1   :  { %3974 = vtanh.f32 %v302_v23  ;;  %v310_v30 = vsub.f32 1.0, %v309_v28  ;;  %vm334_vm6 = vmor %vm332_vm3, %vm333_vm1  ;;  %vm352_vm9 = vweird.f32 %v346_v24  ;;  %v356_v56 = vand.u32 2147483647, %v346_v24  ;;  %902 = vmatpush.bf16.msra.mxu1 %v3015_v18  ;;  %v2994_v23 = vld [vmem:[#allocation4 + $0xa0] sm:$0xf] }
  0xc2   :  { %v329_v31 = vsub.f32 1.0, %v328_v29  ;;  %v359_v58 = vor.u32 1.1754944e-38, %v358_v55  ;;  %v3019_v19 = vor.u32 %v3789_v17, %v3018_v16  ;;  %v3002_v28 = vld [vmem:[#allocation4 + $0xa8] sm:$0xf]  ;;  %v3785_v29 = vld [vmem:[#allocation4 + $0xb4] sm:$0xf0]  ;;  %v2959_v18 = vor.u32 %v3771_v14, %v2956_v15 }
  0xc3   :  { %v311_v34 = vmul.f32 %v3969_v26, %v310_v30  ;;  %vm357_vm11 = vcmp.eq.f32.partialorder %v356_v56, 8.507059e+37  ;;  %v2970_v55 = vld [vmem:[#allocation4 + $0x68] sm:$0xf]  ;;  %v3777_v56 = vld [vmem:[#allocation4 + $0x74] sm:$0xf0] }
  0xc4   :  { %v330_v36 = vmul.f32 %v3971_v27, %v329_v31  ;;  %915 = vmatpush.bf16.msra.mxu2 %v3019_v19  ;;  %v3003_v31 = vor.u32 %v3785_v29, %v3002_v28  ;;  %v2930_v16 = vld [vmem:[#allocation4 + $0x20] sm:$0xf]  ;;  %v3768_v17 = vld [vmem:[#allocation4 + $0x2c] sm:$0xf0] }
  0xc5   :  { %v312_v39 = vadd.f32 %v3969_v26, %v311_v34  ;;  %v3007_v34 = vor.u32 %v3783_v32, %v3004_v33  ;;  %v2931_v19 = vor.u32 %v3768_v17, %v2930_v16  ;;  %v3764_v32 = vld [vmem:[#allocation4 + $0xc] sm:$0xf0]  ;;  %v3762_v33 = vld [vmem:[#allocation4 + $0x4] sm:$0xf] }
  0xc6   :  { %v3973_v38 = vpop.eup %3972  ;;  %v331_v43 = vadd.f32 %v3971_v27, %v330_v36  ;;  %v3780_v36 = vld [vmem:[#allocation4 + $0x8c] sm:$0xf0] }
  0xc7   :  { %v3975_v40 = vpop.eup %3974  ;;  %v348_v41 = vmul.f32 %v3973_v38, %v346_v24  ;;  %v316_v45 = vsel %vm315_vm4, %v3969_v26, %v312_v39  ;;  %vm353_vm8 = vweird.f32 %v3973_v38  ;;  %v3784_v24 = vld [vmem:[#allocation4 + $0xac] sm:$0xf0]  ;;  %929 = vmatpush.bf16.msra.mxu3 %v3007_v34  ;;  %v2980_v39 = vld [vmem:[#allocation4 + $0x90] sm:$0xf0] }
  0xc8   :  { %v321_v47 = vsel %vm318_vm5, %v320_v42, %v316_v45  ;;  %v335_v48 = vsel %vm334_vm6, %v3971_v27, %v331_v43  ;;  %vm354_vm10 = vmor %vm352_vm9, %vm353_vm8  ;;  %v2995_v26 = vor.u32 %v3784_v24, %v2994_v23  ;;  %v2996_v27 = vld [vmem:[#allocation4 + $0xb0] sm:$0xf0]  ;;  %916 = vmatpush.bf16.msra.mxu2 %v3003_v31  ;;  %v2983_v42 = vor.u32 %v3778_v37, %v2980_v39  ;;  %v2988_v45 = vld [vmem:[#allocation4 + $0x98] sm:$0xf0] }
  0xc9   :  { %v349_v46 = vsub.f32 1.0, %v348_v41  ;;  %v340_v49 = vsel %vm337_vm7, %v339_v44, %v335_v48  ;;  %v363_v50 = vmul.f32 %v3975_v40, %v321_v47  ;;  %v2999_v30 = vor.u32 %v3782_v25, %v2996_v27  ;;  %v2986_v40 = vld [vmem:[#allocation4 + $0x88] sm:$0xf]  ;;  %v3781_v41 = vld [vmem:[#allocation4 + $0x94] sm:$0xf0] }
  0xca   :  { %v362_v52 = vmul.f32 0.0, %v340_v49  ;;  %890 = vmatpush.bf16.msra.mxu0 %v2995_v26  ;;  %v2987_v43 = vor.u32 %v3781_v41, %v2986_v40  ;;  %v3779_v44 = vld [vmem:[#allocation4 + $0x8c] sm:$0xf]  ;;  %v2962_v49 = vld [vmem:[#allocation4 + $0x60] sm:$0xf]  ;;  %v2935_v23 = vor.u32 %v3766_v20, %v2932_v21 }
  0xcb   :  { %v350_v51 = vmul.f32 %v3973_v38, %v349_v46  ;;  %903 = vmatpush.bf16.msra.mxu1 %v2999_v30  ;;  %v618_v46 = vld [vmem:[#allocation5 + $0x20] sm:$0xff]  ;;  %v619_v47 = vld [vmem:[#allocation5 + $0x28] sm:$0xff]  ;;  %v2991_v48 = vor.u32 %v3779_v44, %v2988_v45  ;;  %v3769_v24 = vld [vmem:[#allocation4 + $0x34] sm:$0xf0] }
  0xcc   :  { %v4197_v53 = vadd.f32 %v363_v50, %v362_v52  ;;  %917 = vmatpush.bf16.msra.mxu2 %v2987_v43  ;;  %v3776_v50 = vld [vmem:[#allocation4 + $0x6c] sm:$0xf0]  ;;  %v3767_v25 = vld [vmem:[#allocation4 + $0x2c] sm:$0xf]  ;;  %v2940_v26 = vld [vmem:[#allocation4 + $0x38] sm:$0xf0]  ;;  %v2939_v29 = vor.u32 %v3769_v24, %v2938_v22 }
  0xcd   :  { %v351_v54 = vadd.f32 %v3973_v38, %v350_v51  ;;  %v3774_v51 = vld [vmem:[#allocation4 + $0x64] sm:$0xf]  ;;  %930 = vmatpush.bf16.msra.mxu3 %v2991_v48  ;;  %v2963_v52 = vor.u32 %v3776_v50, %v2962_v49  ;;  %v2943_v30 = vor.u32 %v3767_v25, %v2940_v26  ;;  %v2914_v31 = vld [vmem:[#allocation4] sm:$0xf]  ;;  %v2922_v39 = vld [vmem:[#allocation4 + $0x8] sm:$0xf] }
  0xce   :  { %3976 = vtanh.f32 %v4197_v53  ;;  %v2915_v37 = vor.u32 %v3764_v32, %v2914_v31  ;;  %v3765_v40 = vld [vmem:[#allocation4 + $0x14] sm:$0xf0]  ;;  %v3763_v43 = vld [vmem:[#allocation4 + $0xc] sm:$0xf]  ;;  %v2924_v44 = vld [vmem:[#allocation4 + $0x18] sm:$0xf0] }
  0xcf   :  { %v355_v57 = vsel %vm354_vm10, %v3973_v38, %v351_v54  ;;  %v2979_v38 = vor.u32 %v3780_v36, %v2978_v35  ;;  %904 = vmatpush.bf16.msra.mxu1 %v2983_v42  ;;  %v2964_v54 = vld [vmem:[#allocation4 + $0x70] sm:$0xf0]  ;;  %v2923_v42 = vor.u32 %v3765_v40, %v2922_v39  ;;  %v3824_v31 = vld [vmem:[#allocation4 + $0xec] sm:$0xf0]  ;;  %v3822_v32 = vld [vmem:[#allocation4 + $0xe4] sm:$0xf] }
  0xd0   :  { %v360_v60 = vsel %vm357_vm11, %v359_v58, %v355_v57  ;;  %v2967_v57 = vor.u32 %v3774_v51, %v2964_v54  ;;  %v2971_v58 = vor.u32 %v3777_v56, %v2970_v55  ;;  %v620_v54 = vld [vmem:[#allocation5 + $0x30] sm:$0xff]  ;;  %v3823_v39 = vld [vmem:[#allocation4 + $0xec] sm:$0xf]  ;;  %v3167_v40 = vld [vmem:[#allocation4 + $0xf8] sm:$0xf0] }
  0xd1   :  { %891 = vmatpush.bf16.msra.mxu0 %v2979_v38  ;;  %v2916_v38 = vld [vmem:[#allocation4 + $0x10] sm:$0xf0] }
  0xd2   :  { %918 = vmatpush.bf16.msra.mxu2 %v2971_v58  ;;  %v2919_v41 = vor.u32 %v3762_v33, %v2916_v38 }
  0xd3   :  { %905 = vmatpush.bf16.msra.mxu1 %v2967_v57 }
  0xd4   :  { %v3977_v59 = vpop.eup %3976 }
  0xd5   :  { %v366_v61 = vmul.f32 %v3977_v59, %v360_v60  ;;  %v3775_v59 = vld [vmem:[#allocation4 + $0x6c] sm:$0xf]  ;;  %v2972_v60 = vld [vmem:[#allocation4 + $0x78] sm:$0xf0]  ;;  %892 = vmatpush.bf16.msra.mxu0 %v2963_v52 }
  0xd6   :  { %v2975_v63 = vor.u32 %v3775_v59, %v2972_v60  ;;  %919 = vmatpush.bf16.msra.mxu2 %v2955_v13 }
  0xd7   :  { %369 = vst [vmem:[#allocation8] sm:$0xff] %v366_v61  ;;  %v372_v62 = vpack.c.bf16 %v366_v61, %v366_v61  ;;  %906 = vmatpush.bf16.msra.mxu1 %v2951_v12 }
  0xd8   :  { %931 = vmatpush.bf16.msra.mxu3 %v2975_v63 }
  0xd9   :  { %573 = vmatmul.bf16.vlgmr.msrb.gmra.mxu0 %v372_v62  ;;  %586 = vmatmul.bf16.vlgmr.msrb.gmra.mxu1 %v372_v62 }
  0xda   :  { %599 = vmatmul.bf16.vlgmr.msrb.gmra.mxu2 %v372_v62  ;;  %612 = vmatmul.bf16.vlgmr.msrb.gmra.mxu3 %v372_v62 }
  0xdb   :  { %893 = vmatpush.bf16.msra.mxu0 %v2947_v5  ;;  %907 = vmatpush.bf16.msra.mxu1 %v2935_v23 }
  0xdc   :  { %932 = vmatpush.bf16.msra.mxu3 %v2959_v18  ;;  %920 = vmatpush.bf16.msra.mxu2 %v2939_v29 }
  0xdf   :  { %894 = vmatpush.bf16.msra.mxu0 %v2931_v19  ;;  %908 = vmatpush.bf16.msra.mxu1 %v2919_v41  ;;  %v3170_v41 = vor.u32 %v3823_v39, %v3167_v40  ;;  %v3805_v39 = vld [vmem:[#allocation4 + $0x54] sm:$0xf0] }
  0xe0   :  { %933 = vmatpush.bf16.msra.mxu3 %v2943_v30  ;;  %921 = vmatpush.bf16.msra.mxu2 %v2923_v42  ;;  %v3141_v42 = vld [vmem:[#allocation4 + $0xc0] sm:$0xf] }
  0xe3   :  { %895 = vmatpush.bf16.msra.mxu0 %v2915_v37 }
 0x156   :  { %v574_v61 = vpop.f32.mrf.mxu0  ;;  %v587_v62 = vpop.f32.mrf.mxu1 }
 0x157   :  { %v622_v0 = vadd.f32 %v618_v46, %v574_v61  ;;  %v623_v1 = vadd.f32 %v619_v47, %v587_v62  ;;  %v2927_v47 = vor.u32 %v3763_v43, %v2924_v44  ;;  %v3820_v43 = vld [vmem:[#allocation4 + $0xcc] sm:$0xf0]  ;;  %v3818_v44 = vld [vmem:[#allocation4 + $0xc4] sm:$0xf] }
 0x159   :  { %v2909_v9 = vmul.f32 -1.442695, %v622_v0  ;;  %v2910_v10 = vmul.f32 -1.442695, %v623_v1  ;;  %934 = vmatpush.bf16.msra.mxu3 %v2927_v47  ;;  %v3149_v47 = vld [vmem:[#allocation4 + $0xc8] sm:$0xf] }
 0x15b   :  { %3978 = vpow2.f32 %v2909_v9 }
 0x15c   :  { %3980 = vpow2.f32 %v2910_v10 }
 0x15d   :  { %v600_v27 = vpop.f32.mrf.mxu2  ;;  %v613_v28 = vpop.f32.mrf.mxu3  ;;  %1250 = vmatpush.bf16.msrb.mxu3 %v3170_v41 }
 0x15e   :  { %v625_v34 = vadd.f32 %v621_v11, %v613_v28  ;;  %v576_v35 = vpop.f32.mrf.mxu0  ;;  %v589_v36 = vpop.f32.mrf.mxu1  ;;  %v624_v58 = vadd.f32 %v620_v54, %v600_v27 }
 0x15f   :  { %v3165_v35 = vld [vmem:[#allocation4 + $0xe8] sm:$0xf]  ;;  %v3825_v36 = vld [vmem:[#allocation4 + $0xf4] sm:$0xf0] }
 0x160   :  { %v2911_v45 = vmul.f32 -1.442695, %v625_v34  ;;  %v3159_v34 = vld [vmem:[#allocation4 + $0xf0] sm:$0xf0]  ;;  %v3166_v38 = vor.u32 %v3825_v36, %v3165_v35  ;;  %v3802_v35 = vld [vmem:[#allocation4 + $0x44] sm:$0xf] }
 0x161   :  { %v3979_v46 = vpop.eup %3978  ;;  %v3162_v37 = vor.u32 %v3822_v32, %v3159_v34  ;;  %v3804_v34 = vld [vmem:[#allocation4 + $0x4c] sm:$0xf0] }
 0x162   :  { %v3981_v48 = vpop.eup %3980  ;;  %v629_v49 = vadd.f32 1.0, %v3979_v46  ;;  %3982 = vpow2.f32 %v2911_v45  ;;  %1237 = vmatpush.bf16.msrb.mxu2 %v3166_v38  ;;  %v3142_v45 = vor.u32 %v3820_v43, %v3141_v42  ;;  %v3143_v46 = vld [vmem:[#allocation4 + $0xd0] sm:$0xf0]  ;;  %v3085_v38 = vld [vmem:[#allocation4 + $0x48] sm:$0xf]  ;;  %v944_v42 = vld [vmem:[#allocation5 + $0x58] sm:$0xff] }
 0x163   :  { %v648_v50 = vadd.f32 1.0, %v3981_v48  ;;  %1224 = vmatpush.bf16.msrb.mxu1 %v3162_v37  ;;  %v3821_v48 = vld [vmem:[#allocation4 + $0xd4] sm:$0xf0]  ;;  %v3079_v37 = vld [vmem:[#allocation4 + $0x50] sm:$0xf0] }
 0x164   :  { %3984 = vrcp.f32 %v629_v49  ;;  %v641_v0 = vand.u32 2147483648, %v629_v49  ;;  %v639_v3 = vand.u32 2147483647, %v629_v49  ;;  %vm635_vm14 = vweird.f32 %v629_v49 }
 0x165   :  { %3986 = vrcp.f32 %v648_v50  ;;  %v602_v51 = vpop.f32.mrf.mxu2  ;;  %v615_v52 = vpop.f32.mrf.mxu3  ;;  %v660_v1 = vand.u32 2147483648, %v648_v50  ;;  %v658_v5 = vand.u32 2147483647, %v648_v50  ;;  %vm654_vm15 = vweird.f32 %v648_v50 }
 0x166   :  { %v642_v8 = vor.u32 1.1754944e-38, %v641_v0  ;;  %vm640_vm2 = vcmp.eq.f32.partialorder %v639_v3, 8.507059e+37  ;;  %v3819_v51 = vld [vmem:[#allocation4 + $0xcc] sm:$0xf]  ;;  %v3151_v52 = vld [vmem:[#allocation4 + $0xd8] sm:$0xf0]  ;;  %v3082_v43 = vor.u32 %v3802_v35, %v3079_v37 }
 0x167   :  { %v661_v11 = vor.u32 1.1754944e-38, %v660_v1  ;;  %vm659_vm3 = vcmp.eq.f32.partialorder %v658_v5, 8.507059e+37  ;;  %v3154_v54 = vor.u32 %v3819_v51, %v3151_v52  ;;  %v3815_v0 = vld [vmem:[#allocation4 + $0xac] sm:$0xf]  ;;  %v3135_v1 = vld [vmem:[#allocation4 + $0xb8] sm:$0xf0] }
 0x168   :  { %v3983_v55 = vpop.eup %3982  ;;  %v3109_v3 = vld [vmem:[#allocation4 + $0x80] sm:$0xf]  ;;  %v3810_v5 = vld [vmem:[#allocation4 + $0x84] sm:$0xf]  ;;  %v3063_v52 = vld [vmem:[#allocation4 + $0x30] sm:$0xf0] }
 0x169   :  { %v668_v56 = vadd.f32 1.0, %v3983_v55  ;;  %v3125_v55 = vld [vmem:[#allocation4 + $0xa0] sm:$0xf]  ;;  %1251 = vmatpush.bf16.msrb.mxu3 %v3154_v54  ;;  %v3798_v51 = vld [vmem:[#allocation4 + $0x24] sm:$0xf] }
 0x16a   :  { %v3985_v57 = vpop.eup %3984  ;;  %v3069_v54 = vld [vmem:[#allocation4 + $0x28] sm:$0xf] }
 0x16b   :  { %v3987_v59 = vpop.eup %3986  ;;  %v631_v60 = vmul.f32 %v3985_v57, %v629_v49  ;;  %3988 = vrcp.f32 %v668_v56  ;;  %vm636_vm12 = vweird.f32 %v3985_v57  ;;  %v680_v23 = vand.u32 2147483648, %v668_v56 }
 0x16c   :  { %v650_v61 = vmul.f32 %v3987_v59, %v648_v50  ;;  %3990 = vtanh.f32 %v624_v58  ;;  %vm655_vm13 = vweird.f32 %v3987_v59  ;;  %vm637_vm0 = vmor %vm635_vm14, %vm636_vm12  ;;  %vm674_vm5 = vweird.f32 %v668_v56 }
 0x16d   :  { %v632_v62 = vsub.f32 1.0, %v631_v60  ;;  %vm656_vm1 = vmor %vm654_vm15, %vm655_vm13  ;;  %v678_v24 = vand.u32 2147483647, %v668_v56  ;;  %v681_v26 = vor.u32 1.1754944e-38, %v680_v23  ;;  %v3146_v49 = vor.u32 %v3818_v44, %v3143_v46  ;;  %v3133_v60 = vld [vmem:[#allocation4 + $0xa8] sm:$0xf] }
 0x16e   :  { %v651_v63 = vsub.f32 1.0, %v650_v61  ;;  %v3150_v50 = vor.u32 %v3821_v48, %v3149_v47  ;;  %v3817_v61 = vld [vmem:[#allocation4 + $0xb4] sm:$0xf0]  ;;  %v3101_v23 = vld [vmem:[#allocation4 + $0x68] sm:$0xf]  ;;  %v3086_v44 = vor.u32 %v3805_v39, %v3085_v38 }
 0x16f   :  { %v633_v2 = vmul.f32 %v3985_v57, %v632_v62  ;;  %vm679_vm7 = vcmp.eq.f32.partialorder %v678_v24, 8.507059e+37  ;;  %1225 = vmatpush.bf16.msrb.mxu1 %v3146_v49  ;;  %v3809_v24 = vld [vmem:[#allocation4 + $0x74] sm:$0xf0]  ;;  %v3087_v46 = vld [vmem:[#allocation4 + $0x58] sm:$0xf0] }
 0x170   :  { %v652_v4 = vmul.f32 %v3987_v59, %v651_v63  ;;  %1238 = vmatpush.bf16.msrb.mxu2 %v3150_v50  ;;  %v3134_v63 = vor.u32 %v3817_v61, %v3133_v60  ;;  %v3061_v47 = vld [vmem:[#allocation4 + $0x20] sm:$0xf]  ;;  %v3800_v48 = vld [vmem:[#allocation4 + $0x2c] sm:$0xf0] }
 0x171   :  { %v3989_v6 = vpop.eup %3988  ;;  %v634_v7 = vadd.f32 %v3985_v57, %v633_v2  ;;  %v3138_v2 = vor.u32 %v3815_v0, %v3135_v1  ;;  %v3062_v50 = vor.u32 %v3800_v48, %v3061_v47  ;;  %v3796_v0 = vld [vmem:[#allocation4 + $0xc] sm:$0xf0]  ;;  %v3794_v1 = vld [vmem:[#allocation4 + $0x4] sm:$0xf] }
 0x172   :  { %v653_v9 = vadd.f32 %v3987_v59, %v652_v4  ;;  %v670_v10 = vmul.f32 %v3989_v6, %v668_v56  ;;  %v3991_v13 = vpop.eup %3990  ;;  %vm675_vm4 = vweird.f32 %v3989_v6  ;;  %v3816_v56 = vld [vmem:[#allocation4 + $0xac] sm:$0xf0] }
 0x173   :  { %v638_v12 = vsel %vm637_vm0, %v3985_v57, %v634_v7  ;;  %vm676_vm6 = vmor %vm674_vm5, %vm675_vm4  ;;  %v3814_v57 = vld [vmem:[#allocation4 + $0xa4] sm:$0xf]  ;;  %v3126_v58 = vor.u32 %v3816_v56, %v3125_v55  ;;  %v3812_v4 = vld [vmem:[#allocation4 + $0x8c] sm:$0xf0]  ;;  %1252 = vmatpush.bf16.msrb.mxu3 %v3138_v2  ;;  %v3066_v55 = vor.u32 %v3798_v51, %v3063_v52 }
 0x174   :  { %v643_v14 = vsel %vm640_vm2, %v642_v8, %v638_v12  ;;  %v657_v15 = vsel %vm656_vm1, %v3987_v59, %v653_v9  ;;  %v671_v16 = vsub.f32 1.0, %v670_v10  ;;  %v3127_v59 = vld [vmem:[#allocation4 + $0xb0] sm:$0xf0]  ;;  %1239 = vmatpush.bf16.msrb.mxu2 %v3134_v63  ;;  %v3117_v8 = vld [vmem:[#allocation4 + $0x88] sm:$0xf] }
 0x175   :  { %v662_v17 = vsel %vm659_vm3, %v661_v11, %v657_v15  ;;  %v685_v18 = vmul.f32 %v3991_v13, %v643_v14  ;;  %v3130_v62 = vor.u32 %v3814_v57, %v3127_v59  ;;  %v3111_v7 = vld [vmem:[#allocation4 + $0x90] sm:$0xf0]  ;;  %v3813_v9 = vld [vmem:[#allocation4 + $0x94] sm:$0xf0]  ;;  %v3811_v12 = vld [vmem:[#allocation4 + $0x8c] sm:$0xf] }
 0x176   :  { %v684_v19 = vmul.f32 %v662_v17, %v4197_v53  ;;  %v672_v20 = vmul.f32 %v3989_v6, %v671_v16  ;;  %v3157_v53 = vld [vmem:[#allocation4 + $0xe0] sm:$0xf]  ;;  %v3114_v10 = vor.u32 %v3810_v5, %v3111_v7  ;;  %v3118_v11 = vor.u32 %v3813_v9, %v3117_v8  ;;  %v3119_v13 = vld [vmem:[#allocation4 + $0x98] sm:$0xf0]  ;;  %v942_v15 = vld [vmem:[#allocation5 + $0x48] sm:$0xff] }
 0x177   :  { %v3158_v33 = vor.u32 %v3824_v31, %v3157_v53  ;;  %1226 = vmatpush.bf16.msrb.mxu1 %v3130_v62  ;;  %v941_v14 = vld [vmem:[#allocation5 + $0x40] sm:$0xff]  ;;  %v3122_v16 = vor.u32 %v3811_v12, %v3119_v13  ;;  %v3801_v56 = vld [vmem:[#allocation4 + $0x34] sm:$0xf0]  ;;  %v3799_v57 = vld [vmem:[#allocation4 + $0x2c] sm:$0xf] }
 0x178   :  { %v4201_v21 = vadd.f32 %v685_v18, %v684_v19  ;;  %v673_v22 = vadd.f32 %v3989_v6, %v672_v20  ;;  %1240 = vmatpush.bf16.msrb.mxu2 %v3118_v11  ;;  %v3093_v17 = vld [vmem:[#allocation4 + $0x60] sm:$0xf]  ;;  %v3808_v18 = vld [vmem:[#allocation4 + $0x6c] sm:$0xf0]  ;;  %v3806_v19 = vld [vmem:[#allocation4 + $0x64] sm:$0xf]  ;;  %v3070_v61 = vor.u32 %v3801_v56, %v3069_v54 }
 0x179   :  { %1211 = vmatpush.bf16.msrb.mxu0 %v3158_v33  ;;  %1253 = vmatpush.bf16.msrb.mxu3 %v3122_v16  ;;  %v3094_v20 = vor.u32 %v3808_v18, %v3093_v17  ;;  %v3077_v33 = vld [vmem:[#allocation4 + $0x40] sm:$0xf]  ;;  %v3053_v7 = vld [vmem:[#allocation4 + $0x8] sm:$0xf]  ;;  %v3797_v8 = vld [vmem:[#allocation4 + $0x14] sm:$0xf0] }
 0x17a   :  { %3992 = vtanh.f32 %v4201_v21  ;;  %v677_v25 = vsel %vm676_vm6, %v3989_v6, %v673_v22  ;;  %v3110_v6 = vor.u32 %v3812_v4, %v3109_v3  ;;  %v3095_v22 = vld [vmem:[#allocation4 + $0x70] sm:$0xf0]  ;;  %v3078_v36 = vor.u32 %v3804_v34, %v3077_v33  ;;  %v3045_v63 = vld [vmem:[#allocation4] sm:$0xf]  ;;  %v3795_v11 = vld [vmem:[#allocation4 + $0xc] sm:$0xf] }
 0x17b   :  { %v682_v28 = vsel %vm679_vm7, %v681_v26, %v677_v25  ;;  %1227 = vmatpush.bf16.msrb.mxu1 %v3114_v10  ;;  %v3098_v25 = vor.u32 %v3806_v19, %v3095_v22  ;;  %v3102_v26 = vor.u32 %v3809_v24, %v3101_v23  ;;  %v3046_v5 = vor.u32 %v3796_v0, %v3045_v63  ;;  %v3055_v12 = vld [vmem:[#allocation4 + $0x18] sm:$0xf0]  ;;  %v943_v22 = vld [vmem:[#allocation5 + $0x50] sm:$0xff]  ;;  %v3854_v0 = vld [vmem:[#allocation4 + $0xe4] sm:$0xf] }
 0x17c   :  { %v3054_v10 = vor.u32 %v3797_v8, %v3053_v7  ;;  %v3856_v63 = vld [vmem:[#allocation4 + $0xec] sm:$0xf0]  ;;  %v3855_v7 = vld [vmem:[#allocation4 + $0xec] sm:$0xf]  ;;  %v3298_v8 = vld [vmem:[#allocation4 + $0xf8] sm:$0xf0] }
 0x17d   :  { %1212 = vmatpush.bf16.msrb.mxu0 %v3142_v45  ;;  %1241 = vmatpush.bf16.msrb.mxu2 %v3102_v26  ;;  %v3803_v45 = vld [vmem:[#allocation4 + $0x4c] sm:$0xf] }
 0x17e   :  { %v3090_v49 = vor.u32 %v3803_v45, %v3087_v46 }
 0x17f   :  { %1228 = vmatpush.bf16.msrb.mxu1 %v3098_v25 }
 0x180   :  { %v3993_v27 = vpop.eup %3992 }
 0x181   :  { %v688_v29 = vmul.f32 %v3993_v27, %v682_v28  ;;  %1213 = vmatpush.bf16.msrb.mxu0 %v3126_v58  ;;  %v3807_v27 = vld [vmem:[#allocation4 + $0x6c] sm:$0xf]  ;;  %v3103_v28 = vld [vmem:[#allocation4 + $0x78] sm:$0xf0]  ;;  %1242 = vmatpush.bf16.msrb.mxu2 %v3086_v44 }
 0x182   :  { %v3106_v53 = vor.u32 %v3807_v27, %v3103_v28  ;;  %v3071_v58 = vld [vmem:[#allocation4 + $0x38] sm:$0xf0] }
 0x183   :  { %692 = vst [vmem:[#allocation8 + $0x8] sm:$0xff] %v688_v29  ;;  %v695_v30 = vpack.c.bf16 %v688_v29, %v688_v29  ;;  %1229 = vmatpush.bf16.msrb.mxu1 %v3082_v43  ;;  %v3074_v62 = vor.u32 %v3799_v57, %v3071_v58 }
 0x184   :  { %1254 = vmatpush.bf16.msrb.mxu3 %v3106_v53 }
 0x185   :  { %896 = vmatmul.bf16.vlgmr.msra.gmra.mxu0 %v695_v30  ;;  %909 = vmatmul.bf16.vlgmr.msra.gmra.mxu1 %v695_v30 }
 0x186   :  { %922 = vmatmul.bf16.vlgmr.msra.gmra.mxu2 %v695_v30  ;;  %935 = vmatmul.bf16.vlgmr.msra.gmra.mxu3 %v695_v30 }
 0x187   :  { %1214 = vmatpush.bf16.msrb.mxu0 %v3110_v6  ;;  %v3047_v6 = vld [vmem:[#allocation4 + $0x10] sm:$0xf0]  ;;  %1230 = vmatpush.bf16.msrb.mxu1 %v3066_v55 }
 0x188   :  { %1255 = vmatpush.bf16.msrb.mxu3 %v3090_v49  ;;  %1243 = vmatpush.bf16.msrb.mxu2 %v3070_v61  ;;  %v3050_v9 = vor.u32 %v3794_v1, %v3047_v6 }
 0x18b   :  { %1215 = vmatpush.bf16.msrb.mxu0 %v3094_v20  ;;  %1231 = vmatpush.bf16.msrb.mxu1 %v3050_v9  ;;  %v3301_v9 = vor.u32 %v3855_v7, %v3298_v8  ;;  %v3837_v7 = vld [vmem:[#allocation4 + $0x54] sm:$0xf0] }
 0x18c   :  { %1256 = vmatpush.bf16.msrb.mxu3 %v3074_v62  ;;  %1244 = vmatpush.bf16.msrb.mxu2 %v3054_v10  ;;  %v3272_v10 = vld [vmem:[#allocation4 + $0xc0] sm:$0xf] }
 0x18f   :  { %1216 = vmatpush.bf16.msrb.mxu0 %v3078_v36 }
 0x193   :  { %1217 = vmatpush.bf16.msrb.mxu0 %v3062_v50 }
 0x197   :  { %1218 = vmatpush.bf16.msrb.mxu0 %v3046_v5 }
 0x202   :  { %v897_v29 = vpop.f32.mrf.mxu0  ;;  %v910_v30 = vpop.f32.mrf.mxu1 }
 0x203   :  { %v945_v31 = vadd.f32 %v941_v14, %v897_v29  ;;  %v946_v32 = vadd.f32 %v942_v15, %v910_v30  ;;  %v3058_v15 = vor.u32 %v3795_v11, %v3055_v12  ;;  %v3852_v11 = vld [vmem:[#allocation4 + $0xcc] sm:$0xf0]  ;;  %v3850_v12 = vld [vmem:[#allocation4 + $0xc4] sm:$0xf] }
 0x205   :  { %v3040_v40 = vmul.f32 -1.442695, %v945_v31  ;;  %v3041_v41 = vmul.f32 -1.442695, %v946_v32  ;;  %1257 = vmatpush.bf16.msrb.mxu3 %v3058_v15  ;;  %v3280_v15 = vld [vmem:[#allocation4 + $0xc8] sm:$0xf] }
 0x207   :  { %3994 = vpow2.f32 %v3040_v40 }
 0x208   :  { %3996 = vpow2.f32 %v3041_v41 }
 0x209   :  { %v923_v59 = vpop.f32.mrf.mxu2  ;;  %v936_v60 = vpop.f32.mrf.mxu3  ;;  %1573 = vmatpush.bf16.msra.mxu3 %v3301_v9 }
 0x20a   :  { %v948_v2 = vadd.f32 %v944_v42, %v936_v60  ;;  %v899_v3 = vpop.f32.mrf.mxu0  ;;  %v912_v4 = vpop.f32.mrf.mxu1  ;;  %v947_v26 = vadd.f32 %v943_v22, %v923_v59 }
 0x20b   :  { %v3296_v3 = vld [vmem:[#allocation4 + $0xe8] sm:$0xf]  ;;  %v3857_v4 = vld [vmem:[#allocation4 + $0xf4] sm:$0xf0] }
 0x20c   :  { %v3042_v13 = vmul.f32 -1.442695, %v948_v2  ;;  %v3290_v2 = vld [vmem:[#allocation4 + $0xf0] sm:$0xf0]  ;;  %v3297_v6 = vor.u32 %v3857_v4, %v3296_v3  ;;  %v3834_v3 = vld [vmem:[#allocation4 + $0x44] sm:$0xf] }
 0x20d   :  { %v3995_v14 = vpop.eup %3994  ;;  %v3293_v5 = vor.u32 %v3854_v0, %v3290_v2  ;;  %v3836_v2 = vld [vmem:[#allocation4 + $0x4c] sm:$0xf0] }
 0x20e   :  { %v3997_v16 = vpop.eup %3996  ;;  %v952_v17 = vadd.f32 1.0, %v3995_v14  ;;  %3998 = vpow2.f32 %v3042_v13  ;;  %1560 = vmatpush.bf16.msra.mxu2 %v3297_v6  ;;  %v3273_v13 = vor.u32 %v3852_v11, %v3272_v10  ;;  %v3274_v14 = vld [vmem:[#allocation4 + $0xd0] sm:$0xf0]  ;;  %v3216_v6 = vld [vmem:[#allocation4 + $0x48] sm:$0xf]  ;;  %v1267_v10 = vld [vmem:[#allocation5 + $0x78] sm:$0xff] }
 0x20f   :  { %v971_v18 = vadd.f32 1.0, %v3997_v16  ;;  %1547 = vmatpush.bf16.msra.mxu1 %v3293_v5  ;;  %v3853_v16 = vld [vmem:[#allocation4 + $0xd4] sm:$0xf0]  ;;  %v3210_v5 = vld [vmem:[#allocation4 + $0x50] sm:$0xf0] }
 0x210   :  { %4000 = vrcp.f32 %v952_v17  ;;  %v964_v31 = vand.u32 2147483648, %v952_v17  ;;  %v962_v34 = vand.u32 2147483647, %v952_v17  ;;  %vm958_vm10 = vweird.f32 %v952_v17 }
 0x211   :  { %4002 = vrcp.f32 %v971_v18  ;;  %v925_v19 = vpop.f32.mrf.mxu2  ;;  %v938_v20 = vpop.f32.mrf.mxu3  ;;  %v983_v32 = vand.u32 2147483648, %v971_v18  ;;  %v981_v36 = vand.u32 2147483647, %v971_v18  ;;  %vm977_vm11 = vweird.f32 %v971_v18 }
 0x212   :  { %v965_v39 = vor.u32 1.1754944e-38, %v964_v31  ;;  %vm963_vm14 = vcmp.eq.f32.partialorder %v962_v34, 8.507059e+37  ;;  %v3851_v19 = vld [vmem:[#allocation4 + $0xcc] sm:$0xf]  ;;  %v3282_v20 = vld [vmem:[#allocation4 + $0xd8] sm:$0xf0]  ;;  %v3213_v11 = vor.u32 %v3834_v3, %v3210_v5 }
 0x213   :  { %v984_v42 = vor.u32 1.1754944e-38, %v983_v32  ;;  %vm982_vm15 = vcmp.eq.f32.partialorder %v981_v36, 8.507059e+37  ;;  %v3285_v22 = vor.u32 %v3851_v19, %v3282_v20  ;;  %v3847_v31 = vld [vmem:[#allocation4 + $0xac] sm:$0xf]  ;;  %v3266_v32 = vld [vmem:[#allocation4 + $0xb8] sm:$0xf0] }
 0x214   :  { %v3999_v23 = vpop.eup %3998  ;;  %v3240_v34 = vld [vmem:[#allocation4 + $0x80] sm:$0xf]  ;;  %v3842_v36 = vld [vmem:[#allocation4 + $0x84] sm:$0xf]  ;;  %v3194_v20 = vld [vmem:[#allocation4 + $0x30] sm:$0xf0] }
 0x215   :  { %v991_v24 = vadd.f32 1.0, %v3999_v23  ;;  %v3256_v23 = vld [vmem:[#allocation4 + $0xa0] sm:$0xf]  ;;  %1574 = vmatpush.bf16.msra.mxu3 %v3285_v22  ;;  %v3830_v19 = vld [vmem:[#allocation4 + $0x24] sm:$0xf] }
 0x216   :  { %v4001_v25 = vpop.eup %4000  ;;  %v3200_v22 = vld [vmem:[#allocation4 + $0x28] sm:$0xf] }
 0x217   :  { %v4003_v27 = vpop.eup %4002  ;;  %v954_v28 = vmul.f32 %v4001_v25, %v952_v17  ;;  %4004 = vrcp.f32 %v991_v24  ;;  %vm959_vm8 = vweird.f32 %v4001_v25  ;;  %v1003_v55 = vand.u32 2147483648, %v991_v24 }
 0x218   :  { %v973_v29 = vmul.f32 %v4003_v27, %v971_v18  ;;  %4006 = vtanh.f32 %v947_v26  ;;  %vm978_vm9 = vweird.f32 %v4003_v27  ;;  %vm960_vm12 = vmor %vm958_vm10, %vm959_vm8  ;;  %vm997_vm1 = vweird.f32 %v991_v24 }
 0x219   :  { %v955_v30 = vsub.f32 1.0, %v954_v28  ;;  %vm979_vm13 = vmor %vm977_vm11, %vm978_vm9  ;;  %v1001_v56 = vand.u32 2147483647, %v991_v24  ;;  %v1004_v58 = vor.u32 1.1754944e-38, %v1003_v55  ;;  %v3277_v17 = vor.u32 %v3850_v12, %v3274_v14  ;;  %v3264_v28 = vld [vmem:[#allocation4 + $0xa8] sm:$0xf] }
 0x21a   :  { %v974_v53 = vsub.f32 1.0, %v973_v29  ;;  %v3281_v18 = vor.u32 %v3853_v16, %v3280_v15  ;;  %v3849_v29 = vld [vmem:[#allocation4 + $0xb4] sm:$0xf0]  ;;  %v3232_v55 = vld [vmem:[#allocation4 + $0x68] sm:$0xf]  ;;  %v3217_v12 = vor.u32 %v3837_v7, %v3216_v6 }
 0x21b   :  { %v956_v33 = vmul.f32 %v4001_v25, %v955_v30  ;;  %vm1002_vm3 = vcmp.eq.f32.partialorder %v1001_v56, 8.507059e+37  ;;  %1548 = vmatpush.bf16.msra.mxu1 %v3277_v17  ;;  %v3841_v56 = vld [vmem:[#allocation4 + $0x74] sm:$0xf0]  ;;  %v3218_v14 = vld [vmem:[#allocation4 + $0x58] sm:$0xf0] }
 0x21c   :  { %v975_v35 = vmul.f32 %v4003_v27, %v974_v53  ;;  %1561 = vmatpush.bf16.msra.mxu2 %v3281_v18  ;;  %v3265_v53 = vor.u32 %v3849_v29, %v3264_v28  ;;  %v3192_v15 = vld [vmem:[#allocation4 + $0x20] sm:$0xf]  ;;  %v3832_v16 = vld [vmem:[#allocation4 + $0x2c] sm:$0xf0] }
 0x21d   :  { %v4005_v37 = vpop.eup %4004  ;;  %v957_v38 = vadd.f32 %v4001_v25, %v956_v33  ;;  %v3269_v33 = vor.u32 %v3847_v31, %v3266_v32  ;;  %v3193_v18 = vor.u32 %v3832_v16, %v3192_v15  ;;  %v3828_v31 = vld [vmem:[#allocation4 + $0xc] sm:$0xf0]  ;;  %v3826_v32 = vld [vmem:[#allocation4 + $0x4] sm:$0xf] }
 0x21e   :  { %v976_v40 = vadd.f32 %v4003_v27, %v975_v35  ;;  %v993_v41 = vmul.f32 %v4005_v37, %v991_v24  ;;  %v4007_v44 = vpop.eup %4006  ;;  %vm998_vm0 = vweird.f32 %v4005_v37  ;;  %v3848_v24 = vld [vmem:[#allocation4 + $0xac] sm:$0xf0] }
 0x21f   :  { %v961_v43 = vsel %vm960_vm12, %v4001_v25, %v957_v38  ;;  %vm999_vm2 = vmor %vm997_vm1, %vm998_vm0  ;;  %v3846_v25 = vld [vmem:[#allocation4 + $0xa4] sm:$0xf]  ;;  %v3257_v26 = vor.u32 %v3848_v24, %v3256_v23  ;;  %v3844_v35 = vld [vmem:[#allocation4 + $0x8c] sm:$0xf0]  ;;  %1575 = vmatpush.bf16.msra.mxu3 %v3269_v33  ;;  %v3197_v23 = vor.u32 %v3830_v19, %v3194_v20 }
 0x220   :  { %v966_v45 = vsel %vm963_vm14, %v965_v39, %v961_v43  ;;  %v980_v46 = vsel %vm979_vm13, %v4003_v27, %v976_v40  ;;  %v994_v47 = vsub.f32 1.0, %v993_v41  ;;  %v3258_v27 = vld [vmem:[#allocation4 + $0xb0] sm:$0xf0]  ;;  %1562 = vmatpush.bf16.msra.mxu2 %v3265_v53  ;;  %v3248_v39 = vld [vmem:[#allocation4 + $0x88] sm:$0xf] }
 0x221   :  { %v985_v48 = vsel %vm982_vm15, %v984_v42, %v980_v46  ;;  %v1008_v49 = vmul.f32 %v4007_v44, %v966_v45  ;;  %v3261_v30 = vor.u32 %v3846_v25, %v3258_v27  ;;  %v3242_v38 = vld [vmem:[#allocation4 + $0x90] sm:$0xf0]  ;;  %v3845_v40 = vld [vmem:[#allocation4 + $0x94] sm:$0xf0]  ;;  %v3843_v43 = vld [vmem:[#allocation4 + $0x8c] sm:$0xf] }
 0x222   :  { %v1007_v50 = vmul.f32 %v985_v48, %v4201_v21  ;;  %v995_v51 = vmul.f32 %v4005_v37, %v994_v47  ;;  %v3288_v21 = vld [vmem:[#allocation4 + $0xe0] sm:$0xf]  ;;  %v3245_v41 = vor.u32 %v3842_v36, %v3242_v38  ;;  %v3249_v42 = vor.u32 %v3845_v40, %v3248_v39  ;;  %v3250_v44 = vld [vmem:[#allocation4 + $0x98] sm:$0xf0]  ;;  %v1265_v46 = vld [vmem:[#allocation5 + $0x68] sm:$0xff] }
 0x223   :  { %v3289_v1 = vor.u32 %v3856_v63, %v3288_v21  ;;  %1549 = vmatpush.bf16.msra.mxu1 %v3261_v30  ;;  %v1264_v45 = vld [vmem:[#allocation5 + $0x60] sm:$0xff]  ;;  %v3253_v47 = vor.u32 %v3843_v43, %v3250_v44  ;;  %v3833_v24 = vld [vmem:[#allocation4 + $0x34] sm:$0xf0]  ;;  %v3831_v25 = vld [vmem:[#allocation4 + $0x2c] sm:$0xf] }
 0x224   :  { %v4205_v52 = vadd.f32 %v1008_v49, %v1007_v50  ;;  %v996_v54 = vadd.f32 %v4005_v37, %v995_v51  ;;  %1563 = vmatpush.bf16.msra.mxu2 %v3249_v42  ;;  %v3224_v48 = vld [vmem:[#allocation4 + $0x60] sm:$0xf]  ;;  %v3840_v49 = vld [vmem:[#allocation4 + $0x6c] sm:$0xf0]  ;;  %v3838_v50 = vld [vmem:[#allocation4 + $0x64] sm:$0xf]  ;;  %v3201_v29 = vor.u32 %v3833_v24, %v3200_v22 }
 0x225   :  { %1534 = vmatpush.bf16.msra.mxu0 %v3289_v1  ;;  %1576 = vmatpush.bf16.msra.mxu3 %v3253_v47  ;;  %v3225_v51 = vor.u32 %v3840_v49, %v3224_v48  ;;  %v3208_v1 = vld [vmem:[#allocation4 + $0x40] sm:$0xf]  ;;  %v3184_v38 = vld [vmem:[#allocation4 + $0x8] sm:$0xf]  ;;  %v3829_v39 = vld [vmem:[#allocation4 + $0x14] sm:$0xf0] }
 0x226   :  { %4008 = vtanh.f32 %v4205_v52  ;;  %v1000_v57 = vsel %vm999_vm2, %v4005_v37, %v996_v54  ;;  %v3241_v37 = vor.u32 %v3844_v35, %v3240_v34  ;;  %v3226_v54 = vld [vmem:[#allocation4 + $0x70] sm:$0xf0]  ;;  %v3209_v4 = vor.u32 %v3836_v2, %v3208_v1  ;;  %v3176_v53 = vld [vmem:[#allocation4] sm:$0xf]  ;;  %v3827_v42 = vld [vmem:[#allocation4 + $0xc] sm:$0xf] }
 0x227   :  { %v1005_v60 = vsel %vm1002_vm3, %v1004_v58, %v1000_v57  ;;  %1550 = vmatpush.bf16.msra.mxu1 %v3245_v41  ;;  %v3229_v57 = vor.u32 %v3838_v50, %v3226_v54  ;;  %v3233_v58 = vor.u32 %v3841_v56, %v3232_v55  ;;  %v3177_v36 = vor.u32 %v3828_v31, %v3176_v53  ;;  %v3186_v43 = vld [vmem:[#allocation4 + $0x18] sm:$0xf0]  ;;  %v1266_v54 = vld [vmem:[#allocation5 + $0x70] sm:$0xff]  ;;  %v3886_v31 = vld [vmem:[#allocation4 + $0xe4] sm:$0xf] }
 0x228   :  { %v3185_v41 = vor.u32 %v3829_v39, %v3184_v38  ;;  %v3888_v53 = vld [vmem:[#allocation4 + $0xec] sm:$0xf0]  ;;  %v3887_v38 = vld [vmem:[#allocation4 + $0xec] sm:$0xf]  ;;  %v3429_v39 = vld [vmem:[#allocation4 + $0xf8] sm:$0xf0] }
 0x229   :  { %1535 = vmatpush.bf16.msra.mxu0 %v3273_v13  ;;  %1564 = vmatpush.bf16.msra.mxu2 %v3233_v58  ;;  %v3835_v13 = vld [vmem:[#allocation4 + $0x4c] sm:$0xf] }
 0x22a   :  { %v3221_v17 = vor.u32 %v3835_v13, %v3218_v14 }
 0x22b   :  { %1551 = vmatpush.bf16.msra.mxu1 %v3229_v57 }
 0x22c   :  { %v4009_v59 = vpop.eup %4008 }
 0x22d   :  { %v1011_v61 = vmul.f32 %v4009_v59, %v1005_v60  ;;  %1536 = vmatpush.bf16.msra.mxu0 %v3257_v26  ;;  %v3839_v59 = vld [vmem:[#allocation4 + $0x6c] sm:$0xf]  ;;  %v3234_v60 = vld [vmem:[#allocation4 + $0x78] sm:$0xf0]  ;;  %1565 = vmatpush.bf16.msra.mxu2 %v3217_v12 }
 0x22e   :  { %v3237_v21 = vor.u32 %v3839_v59, %v3234_v60  ;;  %v3202_v26 = vld [vmem:[#allocation4 + $0x38] sm:$0xf0] }
 0x22f   :  { %1015 = vst [vmem:[#allocation8 + $0x10] sm:$0xff] %v1011_v61  ;;  %v1018_v62 = vpack.c.bf16 %v1011_v61, %v1011_v61  ;;  %1552 = vmatpush.bf16.msra.mxu1 %v3213_v11  ;;  %v3205_v30 = vor.u32 %v3831_v25, %v3202_v26 }
 0x230   :  { %1577 = vmatpush.bf16.msra.mxu3 %v3237_v21 }
 0x231   :  { %1219 = vmatmul.bf16.vlgmr.msrb.gmra.mxu0 %v1018_v62  ;;  %1232 = vmatmul.bf16.vlgmr.msrb.gmra.mxu1 %v1018_v62 }
 0x232   :  { %1245 = vmatmul.bf16.vlgmr.msrb.gmra.mxu2 %v1018_v62  ;;  %1258 = vmatmul.bf16.vlgmr.msrb.gmra.mxu3 %v1018_v62 }
 0x233   :  { %1537 = vmatpush.bf16.msra.mxu0 %v3241_v37  ;;  %v3178_v37 = vld [vmem:[#allocation4 + $0x10] sm:$0xf0]  ;;  %1553 = vmatpush.bf16.msra.mxu1 %v3197_v23 }
 0x234   :  { %1578 = vmatpush.bf16.msra.mxu3 %v3221_v17  ;;  %1566 = vmatpush.bf16.msra.mxu2 %v3201_v29  ;;  %v3181_v40 = vor.u32 %v3826_v32, %v3178_v37 }
 0x237   :  { %1538 = vmatpush.bf16.msra.mxu0 %v3225_v51  ;;  %1554 = vmatpush.bf16.msra.mxu1 %v3181_v40  ;;  %v3432_v40 = vor.u32 %v3887_v38, %v3429_v39  ;;  %v3869_v38 = vld [vmem:[#allocation4 + $0x54] sm:$0xf0] }
 0x238   :  { %1579 = vmatpush.bf16.msra.mxu3 %v3205_v30  ;;  %1567 = vmatpush.bf16.msra.mxu2 %v3185_v41  ;;  %v3403_v41 = vld [vmem:[#allocation4 + $0xc0] sm:$0xf] }
 0x23b   :  { %1539 = vmatpush.bf16.msra.mxu0 %v3209_v4 }
 0x23f   :  { %1540 = vmatpush.bf16.msra.mxu0 %v3193_v18 }
 0x243   :  { %1541 = vmatpush.bf16.msra.mxu0 %v3177_v36 }
 0x2ae   :  { %v1220_v61 = vpop.f32.mrf.mxu0  ;;  %v1233_v62 = vpop.f32.mrf.mxu1 }
 0x2af   :  { %v1268_v63 = vadd.f32 %v1264_v45, %v1220_v61  ;;  %v1269_v0 = vadd.f32 %v1265_v46, %v1233_v62  ;;  %v3189_v46 = vor.u32 %v3827_v42, %v3186_v43  ;;  %v3884_v42 = vld [vmem:[#allocation4 + $0xcc] sm:$0xf0]  ;;  %v3882_v43 = vld [vmem:[#allocation4 + $0xc4] sm:$0xf] }
 0x2b1   :  { %v3171_v8 = vmul.f32 -1.442695, %v1268_v63  ;;  %v3172_v9 = vmul.f32 -1.442695, %v1269_v0  ;;  %1580 = vmatpush.bf16.msra.mxu3 %v3189_v46  ;;  %v3411_v46 = vld [vmem:[#allocation4 + $0xc8] sm:$0xf] }
 0x2b3   :  { %4010 = vpow2.f32 %v3171_v8 }
 0x2b4   :  { %4012 = vpow2.f32 %v3172_v9 }
 0x2b5   :  { %v1246_v27 = vpop.f32.mrf.mxu2  ;;  %v1259_v28 = vpop.f32.mrf.mxu3  ;;  %1896 = vmatpush.bf16.msrb.mxu3 %v3432_v40 }
 0x2b6   :  { %v1271_v33 = vadd.f32 %v1267_v10, %v1259_v28  ;;  %v1222_v34 = vpop.f32.mrf.mxu0  ;;  %v1235_v35 = vpop.f32.mrf.mxu1  ;;  %v1270_v58 = vadd.f32 %v1266_v54, %v1246_v27 }
 0x2b7   :  { %v3427_v34 = vld [vmem:[#allocation4 + $0xe8] sm:$0xf]  ;;  %v3889_v35 = vld [vmem:[#allocation4 + $0xf4] sm:$0xf0] }
 0x2b8   :  { %v3173_v44 = vmul.f32 -1.442695, %v1271_v33  ;;  %v3421_v33 = vld [vmem:[#allocation4 + $0xf0] sm:$0xf0]  ;;  %v3428_v37 = vor.u32 %v3889_v35, %v3427_v34  ;;  %v3866_v34 = vld [vmem:[#allocation4 + $0x44] sm:$0xf] }
 0x2b9   :  { %v4011_v45 = vpop.eup %4010  ;;  %v3424_v36 = vor.u32 %v3886_v31, %v3421_v33  ;;  %v3868_v33 = vld [vmem:[#allocation4 + $0x4c] sm:$0xf0] }
 0x2ba   :  { %v4013_v47 = vpop.eup %4012  ;;  %v1275_v48 = vadd.f32 1.0, %v4011_v45  ;;  %4014 = vpow2.f32 %v3173_v44  ;;  %1883 = vmatpush.bf16.msrb.mxu2 %v3428_v37  ;;  %v3404_v44 = vor.u32 %v3884_v42, %v3403_v41  ;;  %v3405_v45 = vld [vmem:[#allocation4 + $0xd0] sm:$0xf0]  ;;  %v3347_v37 = vld [vmem:[#allocation4 + $0x48] sm:$0xf]  ;;  %v1590_v41 = vld [vmem:[#allocation5 + $0x98] sm:$0xff] }
 0x2bb   :  { %v1294_v49 = vadd.f32 1.0, %v4013_v47  ;;  %1870 = vmatpush.bf16.msrb.mxu1 %v3424_v36  ;;  %v3885_v47 = vld [vmem:[#allocation4 + $0xd4] sm:$0xf0]  ;;  %v3341_v36 = vld [vmem:[#allocation4 + $0x50] sm:$0xf0] }
 0x2bc   :  { %4016 = vrcp.f32 %v1275_v48  ;;  %v1287_v63 = vand.u32 2147483648, %v1275_v48  ;;  %v1285_v2 = vand.u32 2147483647, %v1275_v48  ;;  %vm1281_vm6 = vweird.f32 %v1275_v48 }
 0x2bd   :  { %4018 = vrcp.f32 %v1294_v49  ;;  %v1248_v50 = vpop.f32.mrf.mxu2  ;;  %v1261_v51 = vpop.f32.mrf.mxu3  ;;  %v1306_v0 = vand.u32 2147483648, %v1294_v49  ;;  %v1304_v4 = vand.u32 2147483647, %v1294_v49  ;;  %vm1300_vm7 = vweird.f32 %v1294_v49 }
 0x2be   :  { %v1288_v7 = vor.u32 1.1754944e-38, %v1287_v63  ;;  %vm1286_vm10 = vcmp.eq.f32.partialorder %v1285_v2, 8.507059e+37  ;;  %v3883_v50 = vld [vmem:[#allocation4 + $0xcc] sm:$0xf]  ;;  %v3413_v51 = vld [vmem:[#allocation4 + $0xd8] sm:$0xf0]  ;;  %v3344_v42 = vor.u32 %v3866_v34, %v3341_v36 }
 0x2bf   :  { %v1307_v10 = vor.u32 1.1754944e-38, %v1306_v0  ;;  %vm1305_vm11 = vcmp.eq.f32.partialorder %v1304_v4, 8.507059e+37  ;;  %v3416_v54 = vor.u32 %v3883_v50, %v3413_v51  ;;  %v3879_v63 = vld [vmem:[#allocation4 + $0xac] sm:$0xf]  ;;  %v3397_v0 = vld [vmem:[#allocation4 + $0xb8] sm:$0xf0] }
 0x2c0   :  { %v4015_v55 = vpop.eup %4014  ;;  %v3371_v2 = vld [vmem:[#allocation4 + $0x80] sm:$0xf]  ;;  %v3874_v4 = vld [vmem:[#allocation4 + $0x84] sm:$0xf]  ;;  %v3325_v51 = vld [vmem:[#allocation4 + $0x30] sm:$0xf0] }
 0x2c1   :  { %v1314_v56 = vadd.f32 1.0, %v4015_v55  ;;  %v3387_v55 = vld [vmem:[#allocation4 + $0xa0] sm:$0xf]  ;;  %1897 = vmatpush.bf16.msrb.mxu3 %v3416_v54  ;;  %v3862_v50 = vld [vmem:[#allocation4 + $0x24] sm:$0xf] }
 0x2c2   :  { %v4017_v57 = vpop.eup %4016  ;;  %v3331_v54 = vld [vmem:[#allocation4 + $0x28] sm:$0xf] }
 0x2c3   :  { %v4019_v59 = vpop.eup %4018  ;;  %v1277_v60 = vmul.f32 %v4017_v57, %v1275_v48  ;;  %4020 = vrcp.f32 %v1314_v56  ;;  %vm1282_vm4 = vweird.f32 %v4017_v57  ;;  %v1326_v23 = vand.u32 2147483648, %v1314_v56 }
 0x2c4   :  { %v1296_v61 = vmul.f32 %v4019_v59, %v1294_v49  ;;  %4022 = vtanh.f32 %v1270_v58  ;;  %vm1301_vm5 = vweird.f32 %v4019_v59  ;;  %vm1283_vm8 = vmor %vm1281_vm6, %vm1282_vm4  ;;  %vm1320_vm13 = vweird.f32 %v1314_v56 }
 0x2c5   :  { %v1278_v62 = vsub.f32 1.0, %v1277_v60  ;;  %vm1302_vm9 = vmor %vm1300_vm7, %vm1301_vm5  ;;  %v1324_v24 = vand.u32 2147483647, %v1314_v56  ;;  %v1327_v26 = vor.u32 1.1754944e-38, %v1326_v23  ;;  %v3408_v48 = vor.u32 %v3882_v43, %v3405_v45  ;;  %v3395_v60 = vld [vmem:[#allocation4 + $0xa8] sm:$0xf] }
 0x2c6   :  { %v1297_v21 = vsub.f32 1.0, %v1296_v61  ;;  %v3412_v49 = vor.u32 %v3885_v47, %v3411_v46  ;;  %v3881_v61 = vld [vmem:[#allocation4 + $0xb4] sm:$0xf0]  ;;  %v3363_v23 = vld [vmem:[#allocation4 + $0x68] sm:$0xf]  ;;  %v3348_v43 = vor.u32 %v3869_v38, %v3347_v37 }
 0x2c7   :  { %v1279_v1 = vmul.f32 %v4017_v57, %v1278_v62  ;;  %vm1325_vm15 = vcmp.eq.f32.partialorder %v1324_v24, 8.507059e+37  ;;  %1871 = vmatpush.bf16.msrb.mxu1 %v3408_v48  ;;  %v3873_v24 = vld [vmem:[#allocation4 + $0x74] sm:$0xf0]  ;;  %v3349_v45 = vld [vmem:[#allocation4 + $0x58] sm:$0xf0] }
 0x2c8   :  { %v1298_v3 = vmul.f32 %v4019_v59, %v1297_v21  ;;  %1884 = vmatpush.bf16.msrb.mxu2 %v3412_v49  ;;  %v3396_v21 = vor.u32 %v3881_v61, %v3395_v60  ;;  %v3323_v46 = vld [vmem:[#allocation4 + $0x20] sm:$0xf]  ;;  %v3864_v47 = vld [vmem:[#allocation4 + $0x2c] sm:$0xf0] }
 0x2c9   :  { %v4021_v5 = vpop.eup %4020  ;;  %v1280_v6 = vadd.f32 %v4017_v57, %v1279_v1  ;;  %v3400_v1 = vor.u32 %v3879_v63, %v3397_v0  ;;  %v3324_v49 = vor.u32 %v3864_v47, %v3323_v46  ;;  %v3860_v63 = vld [vmem:[#allocation4 + $0xc] sm:$0xf0]  ;;  %v3858_v0 = vld [vmem:[#allocation4 + $0x4] sm:$0xf] }
 0x2ca   :  { %v1299_v8 = vadd.f32 %v4019_v59, %v1298_v3  ;;  %v1316_v9 = vmul.f32 %v4021_v5, %v1314_v56  ;;  %v4023_v12 = vpop.eup %4022  ;;  %vm1321_vm12 = vweird.f32 %v4021_v5  ;;  %v3880_v56 = vld [vmem:[#allocation4 + $0xac] sm:$0xf0] }
 0x2cb   :  { %v1284_v11 = vsel %vm1283_vm8, %v4017_v57, %v1280_v6  ;;  %vm1322_vm14 = vmor %vm1320_vm13, %vm1321_vm12  ;;  %v3878_v57 = vld [vmem:[#allocation4 + $0xa4] sm:$0xf]  ;;  %v3388_v58 = vor.u32 %v3880_v56, %v3387_v55  ;;  %v3876_v3 = vld [vmem:[#allocation4 + $0x8c] sm:$0xf0]  ;;  %1898 = vmatpush.bf16.msrb.mxu3 %v3400_v1  ;;  %v3328_v55 = vor.u32 %v3862_v50, %v3325_v51 }
 0x2cc   :  { %v1289_v13 = vsel %vm1286_vm10, %v1288_v7, %v1284_v11  ;;  %v1303_v14 = vsel %vm1302_vm9, %v4019_v59, %v1299_v8  ;;  %v1317_v15 = vsub.f32 1.0, %v1316_v9  ;;  %v3389_v59 = vld [vmem:[#allocation4 + $0xb0] sm:$0xf0]  ;;  %1885 = vmatpush.bf16.msrb.mxu2 %v3396_v21  ;;  %v3379_v7 = vld [vmem:[#allocation4 + $0x88] sm:$0xf] }
 0x2cd   :  { %v1308_v16 = vsel %vm1305_vm11, %v1307_v10, %v1303_v14  ;;  %v1331_v17 = vmul.f32 %v4023_v12, %v1289_v13  ;;  %v3392_v62 = vor.u32 %v3878_v57, %v3389_v59  ;;  %v3373_v6 = vld [vmem:[#allocation4 + $0x90] sm:$0xf0]  ;;  %v3877_v8 = vld [vmem:[#allocation4 + $0x94] sm:$0xf0]  ;;  %v3875_v11 = vld [vmem:[#allocation4 + $0x8c] sm:$0xf] }
 0x2ce   :  { %v1330_v18 = vmul.f32 %v1308_v16, %v4205_v52  ;;  %v1318_v19 = vmul.f32 %v4021_v5, %v1317_v15  ;;  %v3419_v52 = vld [vmem:[#allocation4 + $0xe0] sm:$0xf]  ;;  %v3376_v9 = vor.u32 %v3874_v4, %v3373_v6  ;;  %v3380_v10 = vor.u32 %v3877_v8, %v3379_v7  ;;  %v3381_v12 = vld [vmem:[#allocation4 + $0x98] sm:$0xf0]  ;;  %v1588_v14 = vld [vmem:[#allocation5 + $0x88] sm:$0xff] }
 0x2cf   :  { %v3420_v32 = vor.u32 %v3888_v53, %v3419_v52  ;;  %1872 = vmatpush.bf16.msrb.mxu1 %v3392_v62  ;;  %v1587_v13 = vld [vmem:[#allocation5 + $0x80] sm:$0xff]  ;;  %v3384_v15 = vor.u32 %v3875_v11, %v3381_v12  ;;  %v3865_v56 = vld [vmem:[#allocation4 + $0x34] sm:$0xf0]  ;;  %v3863_v57 = vld [vmem:[#allocation4 + $0x2c] sm:$0xf] }
 0x2d0   :  { %v4209_v20 = vadd.f32 %v1331_v17, %v1330_v18  ;;  %v1319_v22 = vadd.f32 %v4021_v5, %v1318_v19  ;;  %1886 = vmatpush.bf16.msrb.mxu2 %v3380_v10  ;;  %v3355_v16 = vld [vmem:[#allocation4 + $0x60] sm:$0xf]  ;;  %v3872_v17 = vld [vmem:[#allocation4 + $0x6c] sm:$0xf0]  ;;  %v3870_v18 = vld [vmem:[#allocation4 + $0x64] sm:$0xf]  ;;  %v3332_v61 = vor.u32 %v3865_v56, %v3331_v54 }
 0x2d1   :  { %1857 = vmatpush.bf16.msrb.mxu0 %v3420_v32  ;;  %1899 = vmatpush.bf16.msrb.mxu3 %v3384_v15  ;;  %v3356_v19 = vor.u32 %v3872_v17, %v3355_v16  ;;  %v3339_v32 = vld [vmem:[#allocation4 + $0x40] sm:$0xf]  ;;  %v3315_v6 = vld [vmem:[#allocation4 + $0x8] sm:$0xf]  ;;  %v3861_v7 = vld [vmem:[#allocation4 + $0x14] sm:$0xf0] }
 0x2d2   :  { %4024 = vtanh.f32 %v4209_v20  ;;  %v1323_v25 = vsel %vm1322_vm14, %v4021_v5, %v1319_v22  ;;  %v3372_v5 = vor.u32 %v3876_v3, %v3371_v2  ;;  %v3357_v22 = vld [vmem:[#allocation4 + $0x70] sm:$0xf0]  ;;  %v3340_v35 = vor.u32 %v3868_v33, %v3339_v32  ;;  %v3307_v21 = vld [vmem:[#allocation4] sm:$0xf]  ;;  %v3859_v10 = vld [vmem:[#allocation4 + $0xc] sm:$0xf] }
 0x2d3   :  { %v1328_v28 = vsel %vm1325_vm15, %v1327_v26, %v1323_v25  ;;  %1873 = vmatpush.bf16.msrb.mxu1 %v3376_v9  ;;  %v3360_v25 = vor.u32 %v3870_v18, %v3357_v22  ;;  %v3364_v26 = vor.u32 %v3873_v24, %v3363_v23  ;;  %v3308_v4 = vor.u32 %v3860_v63, %v3307_v21  ;;  %v3317_v11 = vld [vmem:[#allocation4 + $0x18] sm:$0xf0]  ;;  %v1589_v22 = vld [vmem:[#allocation5 + $0x90] sm:$0xff]  ;;  %v3918_v63 = vld [vmem:[#allocation4 + $0xe4] sm:$0xf] }
 0x2d4   :  { %v3316_v9 = vor.u32 %v3861_v7, %v3315_v6  ;;  %v3920_v21 = vld [vmem:[#allocation4 + $0xec] sm:$0xf0]  ;;  %v3919_v6 = vld [vmem:[#allocation4 + $0xec] sm:$0xf]  ;;  %v3560_v7 = vld [vmem:[#allocation4 + $0xf8] sm:$0xf0] }
 0x2d5   :  { %1858 = vmatpush.bf16.msrb.mxu0 %v3404_v44  ;;  %1887 = vmatpush.bf16.msrb.mxu2 %v3364_v26  ;;  %v3867_v44 = vld [vmem:[#allocation4 + $0x4c] sm:$0xf] }
 0x2d6   :  { %v3352_v48 = vor.u32 %v3867_v44, %v3349_v45 }
 0x2d7   :  { %1874 = vmatpush.bf16.msrb.mxu1 %v3360_v25 }
 0x2d8   :  { %v4025_v27 = vpop.eup %4024 }
 0x2d9   :  { %v1334_v29 = vmul.f32 %v4025_v27, %v1328_v28  ;;  %1859 = vmatpush.bf16.msrb.mxu0 %v3388_v58  ;;  %v3871_v27 = vld [vmem:[#allocation4 + $0x6c] sm:$0xf]  ;;  %v3365_v28 = vld [vmem:[#allocation4 + $0x78] sm:$0xf0]  ;;  %1888 = vmatpush.bf16.msrb.mxu2 %v3348_v43 }
 0x2da   :  { %v3368_v52 = vor.u32 %v3871_v27, %v3365_v28  ;;  %v3333_v58 = vld [vmem:[#allocation4 + $0x38] sm:$0xf0] }
 0x2db   :  { %1338 = vst [vmem:[#allocation8 + $0x18] sm:$0xff] %v1334_v29  ;;  %v1341_v30 = vpack.c.bf16 %v1334_v29, %v1334_v29  ;;  %1875 = vmatpush.bf16.msrb.mxu1 %v3344_v42  ;;  %v3336_v62 = vor.u32 %v3863_v57, %v3333_v58 }
 0x2dc   :  { %1900 = vmatpush.bf16.msrb.mxu3 %v3368_v52 }
 0x2dd   :  { %1542 = vmatmul.bf16.vlgmr.msra.gmra.mxu0 %v1341_v30  ;;  %1555 = vmatmul.bf16.vlgmr.msra.gmra.mxu1 %v1341_v30 }
 0x2de   :  { %1568 = vmatmul.bf16.vlgmr.msra.gmra.mxu2 %v1341_v30  ;;  %1581 = vmatmul.bf16.vlgmr.msra.gmra.mxu3 %v1341_v30 }
 0x2df   :  { %1860 = vmatpush.bf16.msrb.mxu0 %v3372_v5  ;;  %v3309_v5 = vld [vmem:[#allocation4 + $0x10] sm:$0xf0]  ;;  %1876 = vmatpush.bf16.msrb.mxu1 %v3328_v55 }
 0x2e0   :  { %1901 = vmatpush.bf16.msrb.mxu3 %v3352_v48  ;;  %1889 = vmatpush.bf16.msrb.mxu2 %v3332_v61  ;;  %v3312_v8 = vor.u32 %v3858_v0, %v3309_v5 }
 0x2e3   :  { %1861 = vmatpush.bf16.msrb.mxu0 %v3356_v19  ;;  %1877 = vmatpush.bf16.msrb.mxu1 %v3312_v8  ;;  %v3563_v8 = vor.u32 %v3919_v6, %v3560_v7  ;;  %v3901_v6 = vld [vmem:[#allocation4 + $0x54] sm:$0xf0] }
 0x2e4   :  { %1902 = vmatpush.bf16.msrb.mxu3 %v3336_v62  ;;  %1890 = vmatpush.bf16.msrb.mxu2 %v3316_v9  ;;  %v3534_v9 = vld [vmem:[#allocation4 + $0xc0] sm:$0xf] }
 0x2e7   :  { %1862 = vmatpush.bf16.msrb.mxu0 %v3340_v35 }
 0x2eb   :  { %1863 = vmatpush.bf16.msrb.mxu0 %v3324_v49 }
 0x2ef   :  { %1864 = vmatpush.bf16.msrb.mxu0 %v3308_v4 }
 0x35a   :  { %v1543_v29 = vpop.f32.mrf.mxu0  ;;  %v1556_v30 = vpop.f32.mrf.mxu1 }
 0x35b   :  { %v1591_v53 = vadd.f32 %v1587_v13, %v1543_v29  ;;  %v1592_v31 = vadd.f32 %v1588_v14, %v1556_v30  ;;  %v3320_v14 = vor.u32 %v3859_v10, %v3317_v11  ;;  %v3916_v10 = vld [vmem:[#allocation4 + $0xcc] sm:$0xf0]  ;;  %v3914_v11 = vld [vmem:[#allocation4 + $0xc4] sm:$0xf] }
 0x35d   :  { %v3302_v39 = vmul.f32 -1.442695, %v1591_v53  ;;  %v3303_v40 = vmul.f32 -1.442695, %v1592_v31  ;;  %1903 = vmatpush.bf16.msrb.mxu3 %v3320_v14  ;;  %v3542_v14 = vld [vmem:[#allocation4 + $0xc8] sm:$0xf] }
 0x35f   :  { %4026 = vpow2.f32 %v3302_v39 }
 0x360   :  { %4028 = vpow2.f32 %v3303_v40 }
 0x361   :  { %v1569_v59 = vpop.f32.mrf.mxu2  ;;  %v1582_v60 = vpop.f32.mrf.mxu3  ;;  %2219 = vmatpush.bf16.msra.mxu3 %v3563_v8 }
 0x362   :  { %v1594_v1 = vadd.f32 %v1590_v41, %v1582_v60  ;;  %v1545_v2 = vpop.f32.mrf.mxu0  ;;  %v1558_v3 = vpop.f32.mrf.mxu1  ;;  %v1593_v26 = vadd.f32 %v1589_v22, %v1569_v59 }
 0x363   :  { %v3558_v2 = vld [vmem:[#allocation4 + $0xe8] sm:$0xf]  ;;  %v3921_v3 = vld [vmem:[#allocation4 + $0xf4] sm:$0xf0] }
 0x364   :  { %v3304_v12 = vmul.f32 -1.442695, %v1594_v1  ;;  %v3552_v1 = vld [vmem:[#allocation4 + $0xf0] sm:$0xf0]  ;;  %v3559_v5 = vor.u32 %v3921_v3, %v3558_v2  ;;  %v3898_v2 = vld [vmem:[#allocation4 + $0x44] sm:$0xf] }
 0x365   :  { %v4027_v13 = vpop.eup %4026  ;;  %v3555_v4 = vor.u32 %v3918_v63, %v3552_v1  ;;  %v3900_v1 = vld [vmem:[#allocation4 + $0x4c] sm:$0xf0] }
 0x366   :  { %v4029_v15 = vpop.eup %4028  ;;  %v1598_v16 = vadd.f32 1.0, %v4027_v13  ;;  %4030 = vpow2.f32 %v3304_v12  ;;  %2206 = vmatpush.bf16.msra.mxu2 %v3559_v5  ;;  %v3535_v12 = vor.u32 %v3916_v10, %v3534_v9  ;;  %v3536_v13 = vld [vmem:[#allocation4 + $0xd0] sm:$0xf0]  ;;  %v3478_v5 = vld [vmem:[#allocation4 + $0x48] sm:$0xf]  ;;  %v1913_v9 = vld [vmem:[#allocation5 + $0xb8] sm:$0xff] }
 0x367   :  { %v1617_v17 = vadd.f32 1.0, %v4029_v15  ;;  %2193 = vmatpush.bf16.msra.mxu1 %v3555_v4  ;;  %v3917_v15 = vld [vmem:[#allocation4 + $0xd4] sm:$0xf0]  ;;  %v3472_v4 = vld [vmem:[#allocation4 + $0x50] sm:$0xf0] }
 0x368   :  { %4032 = vrcp.f32 %v1598_v16  ;;  %v1610_v53 = vand.u32 2147483648, %v1598_v16  ;;  %v1608_v33 = vand.u32 2147483647, %v1598_v16  ;;  %vm1604_vm2 = vweird.f32 %v1598_v16 }
 0x369   :  { %4034 = vrcp.f32 %v1617_v17  ;;  %v1571_v18 = vpop.f32.mrf.mxu2  ;;  %v1584_v19 = vpop.f32.mrf.mxu3  ;;  %v1629_v31 = vand.u32 2147483648, %v1617_v17  ;;  %v1627_v35 = vand.u32 2147483647, %v1617_v17  ;;  %vm1623_vm3 = vweird.f32 %v1617_v17 }
 0x36a   :  { %v1611_v38 = vor.u32 1.1754944e-38, %v1610_v53  ;;  %vm1609_vm6 = vcmp.eq.f32.partialorder %v1608_v33, 8.507059e+37  ;;  %v3915_v18 = vld [vmem:[#allocation4 + $0xcc] sm:$0xf]  ;;  %v3544_v19 = vld [vmem:[#allocation4 + $0xd8] sm:$0xf0]  ;;  %v3475_v10 = vor.u32 %v3898_v2, %v3472_v4 }
 0x36b   :  { %v1630_v41 = vor.u32 1.1754944e-38, %v1629_v31  ;;  %vm1628_vm7 = vcmp.eq.f32.partialorder %v1627_v35, 8.507059e+37  ;;  %v3547_v22 = vor.u32 %v3915_v18, %v3544_v19  ;;  %v3911_v53 = vld [vmem:[#allocation4 + $0xac] sm:$0xf]  ;;  %v3528_v31 = vld [vmem:[#allocation4 + $0xb8] sm:$0xf0] }
 0x36c   :  { %v4031_v23 = vpop.eup %4030  ;;  %v3502_v33 = vld [vmem:[#allocation4 + $0x80] sm:$0xf]  ;;  %v3906_v35 = vld [vmem:[#allocation4 + $0x84] sm:$0xf]  ;;  %v3456_v19 = vld [vmem:[#allocation4 + $0x30] sm:$0xf0] }
 0x36d   :  { %v1637_v24 = vadd.f32 1.0, %v4031_v23  ;;  %v3518_v23 = vld [vmem:[#allocation4 + $0xa0] sm:$0xf]  ;;  %2220 = vmatpush.bf16.msra.mxu3 %v3547_v22  ;;  %v3894_v18 = vld [vmem:[#allocation4 + $0x24] sm:$0xf] }
 0x36e   :  { %v4033_v25 = vpop.eup %4032  ;;  %v3462_v22 = vld [vmem:[#allocation4 + $0x28] sm:$0xf] }
 0x36f   :  { %v4035_v27 = vpop.eup %4034  ;;  %v1600_v28 = vmul.f32 %v4033_v25, %v1598_v16  ;;  %4036 = vrcp.f32 %v1637_v24  ;;  %vm1605_vm0 = vweird.f32 %v4033_v25  ;;  %v1649_v55 = vand.u32 2147483648, %v1637_v24 }
 0x370   :  { %v1619_v29 = vmul.f32 %v4035_v27, %v1617_v17  ;;  %4038 = vtanh.f32 %v1593_v26  ;;  %vm1624_vm1 = vweird.f32 %v4035_v27  ;;  %vm1606_vm4 = vmor %vm1604_vm2, %vm1605_vm0  ;;  %vm1643_vm9 = vweird.f32 %v1637_v24 }
 0x371   :  { %v1601_v30 = vsub.f32 1.0, %v1600_v28  ;;  %vm1625_vm5 = vmor %vm1623_vm3, %vm1624_vm1  ;;  %v1647_v56 = vand.u32 2147483647, %v1637_v24  ;;  %v1650_v58 = vor.u32 1.1754944e-38, %v1649_v55  ;;  %v3539_v16 = vor.u32 %v3914_v11, %v3536_v13  ;;  %v3526_v28 = vld [vmem:[#allocation4 + $0xa8] sm:$0xf] }
 0x372   :  { %v1620_v52 = vsub.f32 1.0, %v1619_v29  ;;  %v3543_v17 = vor.u32 %v3917_v15, %v3542_v14  ;;  %v3913_v29 = vld [vmem:[#allocation4 + $0xb4] sm:$0xf0]  ;;  %v3494_v55 = vld [vmem:[#allocation4 + $0x68] sm:$0xf]  ;;  %v3479_v11 = vor.u32 %v3901_v6, %v3478_v5 }
 0x373   :  { %v1602_v32 = vmul.f32 %v4033_v25, %v1601_v30  ;;  %vm1648_vm11 = vcmp.eq.f32.partialorder %v1647_v56, 8.507059e+37  ;;  %2194 = vmatpush.bf16.msra.mxu1 %v3539_v16  ;;  %v3905_v56 = vld [vmem:[#allocation4 + $0x74] sm:$0xf0]  ;;  %v3480_v13 = vld [vmem:[#allocation4 + $0x58] sm:$0xf0] }
 0x374   :  { %v1621_v34 = vmul.f32 %v4035_v27, %v1620_v52  ;;  %2207 = vmatpush.bf16.msra.mxu2 %v3543_v17  ;;  %v3527_v52 = vor.u32 %v3913_v29, %v3526_v28  ;;  %v3454_v14 = vld [vmem:[#allocation4 + $0x20] sm:$0xf]  ;;  %v3896_v15 = vld [vmem:[#allocation4 + $0x2c] sm:$0xf0] }
 0x375   :  { %v4037_v36 = vpop.eup %4036  ;;  %v1603_v37 = vadd.f32 %v4033_v25, %v1602_v32  ;;  %v3531_v32 = vor.u32 %v3911_v53, %v3528_v31  ;;  %v3455_v17 = vor.u32 %v3896_v15, %v3454_v14  ;;  %v3892_v53 = vld [vmem:[#allocation4 + $0xc] sm:$0xf0]  ;;  %v3890_v31 = vld [vmem:[#allocation4 + $0x4] sm:$0xf] }
 0x376   :  { %v1622_v39 = vadd.f32 %v4035_v27, %v1621_v34  ;;  %v1639_v40 = vmul.f32 %v4037_v36, %v1637_v24  ;;  %v4039_v43 = vpop.eup %4038  ;;  %vm1644_vm8 = vweird.f32 %v4037_v36  ;;  %v3912_v24 = vld [vmem:[#allocation4 + $0xac] sm:$0xf0] }
 0x377   :  { %v1607_v42 = vsel %vm1606_vm4, %v4033_v25, %v1603_v37  ;;  %vm1645_vm10 = vmor %vm1643_vm9, %vm1644_vm8  ;;  %v3910_v25 = vld [vmem:[#allocation4 + $0xa4] sm:$0xf]  ;;  %v3519_v26 = vor.u32 %v3912_v24, %v3518_v23  ;;  %v3908_v34 = vld [vmem:[#allocation4 + $0x8c] sm:$0xf0]  ;;  %2221 = vmatpush.bf16.msra.mxu3 %v3531_v32  ;;  %v3459_v23 = vor.u32 %v3894_v18, %v3456_v19 }
 0x378   :  { %v1612_v44 = vsel %vm1609_vm6, %v1611_v38, %v1607_v42  ;;  %v1626_v45 = vsel %vm1625_vm5, %v4035_v27, %v1622_v39  ;;  %v1640_v46 = vsub.f32 1.0, %v1639_v40  ;;  %v3520_v27 = vld [vmem:[#allocation4 + $0xb0] sm:$0xf0]  ;;  %2208 = vmatpush.bf16.msra.mxu2 %v3527_v52  ;;  %v3510_v38 = vld [vmem:[#allocation4 + $0x88] sm:$0xf] }
 0x379   :  { %v1631_v47 = vsel %vm1628_vm7, %v1630_v41, %v1626_v45  ;;  %v1654_v48 = vmul.f32 %v4039_v43, %v1612_v44  ;;  %v3523_v30 = vor.u32 %v3910_v25, %v3520_v27  ;;  %v3504_v37 = vld [vmem:[#allocation4 + $0x90] sm:$0xf0]  ;;  %v3909_v39 = vld [vmem:[#allocation4 + $0x94] sm:$0xf0]  ;;  %v3907_v42 = vld [vmem:[#allocation4 + $0x8c] sm:$0xf] }
 0x37a   :  { %v1653_v49 = vmul.f32 %v1631_v47, %v4209_v20  ;;  %v1641_v50 = vmul.f32 %v4037_v36, %v1640_v46  ;;  %v3550_v20 = vld [vmem:[#allocation4 + $0xe0] sm:$0xf]  ;;  %v3507_v40 = vor.u32 %v3906_v35, %v3504_v37  ;;  %v3511_v41 = vor.u32 %v3909_v39, %v3510_v38  ;;  %v3512_v43 = vld [vmem:[#allocation4 + $0x98] sm:$0xf0]  ;;  %v1911_v45 = vld [vmem:[#allocation5 + $0xa8] sm:$0xff] }
 0x37b   :  { %v3551_v0 = vor.u32 %v3920_v21, %v3550_v20  ;;  %2195 = vmatpush.bf16.msra.mxu1 %v3523_v30  ;;  %v1910_v44 = vld [vmem:[#allocation5 + $0xa0] sm:$0xff]  ;;  %v3515_v46 = vor.u32 %v3907_v42, %v3512_v43  ;;  %v3897_v24 = vld [vmem:[#allocation4 + $0x34] sm:$0xf0]  ;;  %v3895_v25 = vld [vmem:[#allocation4 + $0x2c] sm:$0xf] }
 0x37c   :  { %v4213_v51 = vadd.f32 %v1654_v48, %v1653_v49  ;;  %v1642_v54 = vadd.f32 %v4037_v36, %v1641_v50  ;;  %2209 = vmatpush.bf16.msra.mxu2 %v3511_v41  ;;  %v3486_v47 = vld [vmem:[#allocation4 + $0x60] sm:$0xf]  ;;  %v3904_v48 = vld [vmem:[#allocation4 + $0x6c] sm:$0xf0]  ;;  %v3902_v49 = vld [vmem:[#allocation4 + $0x64] sm:$0xf]  ;;  %v3463_v29 = vor.u32 %v3897_v24, %v3462_v22 }
 0x37d   :  { %2180 = vmatpush.bf16.msra.mxu0 %v3551_v0  ;;  %2222 = vmatpush.bf16.msra.mxu3 %v3515_v46  ;;  %v3487_v50 = vor.u32 %v3904_v48, %v3486_v47  ;;  %v3470_v0 = vld [vmem:[#allocation4 + $0x40] sm:$0xf]  ;;  %v3446_v37 = vld [vmem:[#allocation4 + $0x8] sm:$0xf]  ;;  %v3893_v38 = vld [vmem:[#allocation4 + $0x14] sm:$0xf0] }
 0x37e   :  { %4040 = vtanh.f32 %v4213_v51  ;;  %v1646_v57 = vsel %vm1645_vm10, %v4037_v36, %v1642_v54  ;;  %v3503_v36 = vor.u32 %v3908_v34, %v3502_v33  ;;  %v3488_v54 = vld [vmem:[#allocation4 + $0x70] sm:$0xf0]  ;;  %v3471_v3 = vor.u32 %v3900_v1, %v3470_v0  ;;  %v3438_v52 = vld [vmem:[#allocation4] sm:$0xf]  ;;  %v3891_v41 = vld [vmem:[#allocation4 + $0xc] sm:$0xf] }
 0x37f   :  { %v1651_v60 = vsel %vm1648_vm11, %v1650_v58, %v1646_v57  ;;  %2196 = vmatpush.bf16.msra.mxu1 %v3507_v40  ;;  %v3491_v57 = vor.u32 %v3902_v49, %v3488_v54  ;;  %v3495_v58 = vor.u32 %v3905_v56, %v3494_v55  ;;  %v3439_v35 = vor.u32 %v3892_v53, %v3438_v52  ;;  %v3448_v42 = vld [vmem:[#allocation4 + $0x18] sm:$0xf0]  ;;  %v1912_v54 = vld [vmem:[#allocation5 + $0xb0] sm:$0xff]  ;;  %v3950_v53 = vld [vmem:[#allocation4 + $0xe4] sm:$0xf] }
 0x380   :  { %v3447_v40 = vor.u32 %v3893_v38, %v3446_v37  ;;  %v3952_v52 = vld [vmem:[#allocation4 + $0xec] sm:$0xf0]  ;;  %v3951_v37 = vld [vmem:[#allocation4 + $0xec] sm:$0xf]  ;;  %v3691_v38 = vld [vmem:[#allocation4 + $0xf8] sm:$0xf0] }
 0x381   :  { %2181 = vmatpush.bf16.msra.mxu0 %v3535_v12  ;;  %2210 = vmatpush.bf16.msra.mxu2 %v3495_v58  ;;  %v3899_v12 = vld [vmem:[#allocation4 + $0x4c] sm:$0xf] }
 0x382   :  { %v3483_v16 = vor.u32 %v3899_v12, %v3480_v13 }
 0x383   :  { %2197 = vmatpush.bf16.msra.mxu1 %v3491_v57 }
 0x384   :  { %v4041_v59 = vpop.eup %4040 }
 0x385   :  { %v1657_v61 = vmul.f32 %v4041_v59, %v1651_v60  ;;  %2182 = vmatpush.bf16.msra.mxu0 %v3519_v26  ;;  %v3903_v59 = vld [vmem:[#allocation4 + $0x6c] sm:$0xf]  ;;  %v3496_v60 = vld [vmem:[#allocation4 + $0x78] sm:$0xf0]  ;;  %2211 = vmatpush.bf16.msra.mxu2 %v3479_v11 }
 0x386   :  { %v3499_v20 = vor.u32 %v3903_v59, %v3496_v60  ;;  %v3464_v26 = vld [vmem:[#allocation4 + $0x38] sm:$0xf0] }
 0x387   :  { %1661 = vst [vmem:[#allocation8 + $0x20] sm:$0xff] %v1657_v61  ;;  %v1664_v62 = vpack.c.bf16 %v1657_v61, %v1657_v61  ;;  %2198 = vmatpush.bf16.msra.mxu1 %v3475_v10  ;;  %v3467_v30 = vor.u32 %v3895_v25, %v3464_v26 }
 0x388   :  { %2223 = vmatpush.bf16.msra.mxu3 %v3499_v20 }
 0x389   :  { %1865 = vmatmul.bf16.vlgmr.msrb.gmra.mxu0 %v1664_v62  ;;  %1878 = vmatmul.bf16.vlgmr.msrb.gmra.mxu1 %v1664_v62 }
 0x38a   :  { %1891 = vmatmul.bf16.vlgmr.msrb.gmra.mxu2 %v1664_v62  ;;  %1904 = vmatmul.bf16.vlgmr.msrb.gmra.mxu3 %v1664_v62 }
 0x38b   :  { %2183 = vmatpush.bf16.msra.mxu0 %v3503_v36  ;;  %v3440_v36 = vld [vmem:[#allocation4 + $0x10] sm:$0xf0]  ;;  %2199 = vmatpush.bf16.msra.mxu1 %v3459_v23 }
 0x38c   :  { %2224 = vmatpush.bf16.msra.mxu3 %v3483_v16  ;;  %2212 = vmatpush.bf16.msra.mxu2 %v3463_v29  ;;  %v3443_v39 = vor.u32 %v3890_v31, %v3440_v36 }
 0x38f   :  { %2184 = vmatpush.bf16.msra.mxu0 %v3487_v50  ;;  %2200 = vmatpush.bf16.msra.mxu1 %v3443_v39  ;;  %v3694_v39 = vor.u32 %v3951_v37, %v3691_v38  ;;  %v3933_v37 = vld [vmem:[#allocation4 + $0x54] sm:$0xf0] }
 0x390   :  { %2225 = vmatpush.bf16.msra.mxu3 %v3467_v30  ;;  %2213 = vmatpush.bf16.msra.mxu2 %v3447_v40  ;;  %v3665_v40 = vld [vmem:[#allocation4 + $0xc0] sm:$0xf] }
 0x393   :  { %2185 = vmatpush.bf16.msra.mxu0 %v3471_v3 }
 0x397   :  { %2186 = vmatpush.bf16.msra.mxu0 %v3455_v17 }
 0x39b   :  { %2187 = vmatpush.bf16.msra.mxu0 %v3439_v35 }
 0x406   :  { %v1866_v61 = vpop.f32.mrf.mxu0  ;;  %v1879_v62 = vpop.f32.mrf.mxu1 }
 0x407   :  { %v1914_v21 = vadd.f32 %v1910_v44, %v1866_v61  ;;  %v1915_v63 = vadd.f32 %v1911_v45, %v1879_v62  ;;  %v3451_v45 = vor.u32 %v3891_v41, %v3448_v42  ;;  %v3948_v41 = vld [vmem:[#allocation4 + $0xcc] sm:$0xf0]  ;;  %v3946_v42 = vld [vmem:[#allocation4 + $0xc4] sm:$0xf] }
 0x409   :  { %v3433_v7 = vmul.f32 -1.442695, %v1914_v21  ;;  %v3434_v8 = vmul.f32 -1.442695, %v1915_v63  ;;  %2226 = vmatpush.bf16.msra.mxu3 %v3451_v45  ;;  %v3673_v45 = vld [vmem:[#allocation4 + $0xc8] sm:$0xf] }
 0x40b   :  { %4042 = vpow2.f32 %v3433_v7 }
 0x40c   :  { %4044 = vpow2.f32 %v3434_v8 }
 0x40d   :  { %v1892_v27 = vpop.f32.mrf.mxu2  ;;  %v1905_v28 = vpop.f32.mrf.mxu3  ;;  %2542 = vmatpush.bf16.msrb.mxu3 %v3694_v39 }
 0x40e   :  { %v1917_v32 = vadd.f32 %v1913_v9, %v1905_v28  ;;  %v1868_v33 = vpop.f32.mrf.mxu0  ;;  %v1881_v34 = vpop.f32.mrf.mxu1  ;;  %v1916_v58 = vadd.f32 %v1912_v54, %v1892_v27 }
 0x40f   :  { %v3689_v33 = vld [vmem:[#allocation4 + $0xe8] sm:$0xf]  ;;  %v3953_v34 = vld [vmem:[#allocation4 + $0xf4] sm:$0xf0] }
 0x410   :  { %v3435_v43 = vmul.f32 -1.442695, %v1917_v32  ;;  %v3683_v32 = vld [vmem:[#allocation4 + $0xf0] sm:$0xf0]  ;;  %v3690_v36 = vor.u32 %v3953_v34, %v3689_v33  ;;  %v3930_v33 = vld [vmem:[#allocation4 + $0x44] sm:$0xf] }
 0x411   :  { %v4043_v44 = vpop.eup %4042  ;;  %v3686_v35 = vor.u32 %v3950_v53, %v3683_v32  ;;  %v3932_v32 = vld [vmem:[#allocation4 + $0x4c] sm:$0xf0] }
 0x412   :  { %v4045_v46 = vpop.eup %4044  ;;  %v1921_v47 = vadd.f32 1.0, %v4043_v44  ;;  %4046 = vpow2.f32 %v3435_v43  ;;  %2529 = vmatpush.bf16.msrb.mxu2 %v3690_v36  ;;  %v3666_v43 = vor.u32 %v3948_v41, %v3665_v40  ;;  %v3667_v44 = vld [vmem:[#allocation4 + $0xd0] sm:$0xf0]  ;;  %v3609_v36 = vld [vmem:[#allocation4 + $0x48] sm:$0xf]  ;;  %v2236_v40 = vld [vmem:[#allocation5 + $0xd8] sm:$0xff] }
 0x413   :  { %v1940_v48 = vadd.f32 1.0, %v4045_v46  ;;  %2516 = vmatpush.bf16.msrb.mxu1 %v3686_v35  ;;  %v3949_v46 = vld [vmem:[#allocation4 + $0xd4] sm:$0xf0]  ;;  %v3603_v35 = vld [vmem:[#allocation4 + $0x50] sm:$0xf0] }
 0x414   :  { %4048 = vrcp.f32 %v1921_v47  ;;  %v1933_v21 = vand.u32 2147483648, %v1921_v47  ;;  %v1931_v1 = vand.u32 2147483647, %v1921_v47  ;;  %vm1927_vm14 = vweird.f32 %v1921_v47 }
 0x415   :  { %4050 = vrcp.f32 %v1940_v48  ;;  %v1894_v49 = vpop.f32.mrf.mxu2  ;;  %v1907_v50 = vpop.f32.mrf.mxu3  ;;  %v1952_v63 = vand.u32 2147483648, %v1940_v48  ;;  %v1950_v3 = vand.u32 2147483647, %v1940_v48  ;;  %vm1946_vm15 = vweird.f32 %v1940_v48 }
 0x416   :  { %v1934_v6 = vor.u32 1.1754944e-38, %v1933_v21  ;;  %vm1932_vm2 = vcmp.eq.f32.partialorder %v1931_v1, 8.507059e+37  ;;  %v3947_v49 = vld [vmem:[#allocation4 + $0xcc] sm:$0xf]  ;;  %v3675_v50 = vld [vmem:[#allocation4 + $0xd8] sm:$0xf0]  ;;  %v3606_v41 = vor.u32 %v3930_v33, %v3603_v35 }
 0x417   :  { %v1953_v9 = vor.u32 1.1754944e-38, %v1952_v63  ;;  %vm1951_vm3 = vcmp.eq.f32.partialorder %v1950_v3, 8.507059e+37  ;;  %v3678_v54 = vor.u32 %v3947_v49, %v3675_v50  ;;  %v3943_v21 = vld [vmem:[#allocation4 + $0xac] sm:$0xf]  ;;  %v3659_v63 = vld [vmem:[#allocation4 + $0xb8] sm:$0xf0] }
 0x418   :  { %v4047_v55 = vpop.eup %4046  ;;  %v3633_v1 = vld [vmem:[#allocation4 + $0x80] sm:$0xf]  ;;  %v3938_v3 = vld [vmem:[#allocation4 + $0x84] sm:$0xf]  ;;  %v3587_v50 = vld [vmem:[#allocation4 + $0x30] sm:$0xf0] }
 0x419   :  { %v1960_v56 = vadd.f32 1.0, %v4047_v55  ;;  %v3649_v55 = vld [vmem:[#allocation4 + $0xa0] sm:$0xf]  ;;  %2543 = vmatpush.bf16.msrb.mxu3 %v3678_v54  ;;  %v3926_v49 = vld [vmem:[#allocation4 + $0x24] sm:$0xf] }
 0x41a   :  { %v4049_v57 = vpop.eup %4048  ;;  %v3593_v54 = vld [vmem:[#allocation4 + $0x28] sm:$0xf] }
 0x41b   :  { %v4051_v59 = vpop.eup %4050  ;;  %v1923_v60 = vmul.f32 %v4049_v57, %v1921_v47  ;;  %4052 = vrcp.f32 %v1960_v56  ;;  %vm1928_vm12 = vweird.f32 %v4049_v57  ;;  %v1972_v23 = vand.u32 2147483648, %v1960_v56 }
 0x41c   :  { %v1942_v61 = vmul.f32 %v4051_v59, %v1940_v48  ;;  %4054 = vtanh.f32 %v1916_v58  ;;  %vm1947_vm13 = vweird.f32 %v4051_v59  ;;  %vm1929_vm0 = vmor %vm1927_vm14, %vm1928_vm12  ;;  %vm1966_vm5 = vweird.f32 %v1960_v56 }
 0x41d   :  { %v1924_v62 = vsub.f32 1.0, %v1923_v60  ;;  %vm1948_vm1 = vmor %vm1946_vm15, %vm1947_vm13  ;;  %v1970_v24 = vand.u32 2147483647, %v1960_v56  ;;  %v1973_v26 = vor.u32 1.1754944e-38, %v1972_v23  ;;  %v3670_v47 = vor.u32 %v3946_v42, %v3667_v44  ;;  %v3657_v60 = vld [vmem:[#allocation4 + $0xa8] sm:$0xf] }
 0x41e   :  { %v1943_v20 = vsub.f32 1.0, %v1942_v61  ;;  %v3674_v48 = vor.u32 %v3949_v46, %v3673_v45  ;;  %v3945_v61 = vld [vmem:[#allocation4 + $0xb4] sm:$0xf0]  ;;  %v3625_v23 = vld [vmem:[#allocation4 + $0x68] sm:$0xf]  ;;  %v3610_v42 = vor.u32 %v3933_v37, %v3609_v36 }
 0x41f   :  { %v1925_v0 = vmul.f32 %v4049_v57, %v1924_v62  ;;  %vm1971_vm7 = vcmp.eq.f32.partialorder %v1970_v24, 8.507059e+37  ;;  %2517 = vmatpush.bf16.msrb.mxu1 %v3670_v47  ;;  %v3937_v24 = vld [vmem:[#allocation4 + $0x74] sm:$0xf0]  ;;  %v3611_v44 = vld [vmem:[#allocation4 + $0x58] sm:$0xf0] }
 0x420   :  { %v1944_v2 = vmul.f32 %v4051_v59, %v1943_v20  ;;  %2530 = vmatpush.bf16.msrb.mxu2 %v3674_v48  ;;  %v3658_v20 = vor.u32 %v3945_v61, %v3657_v60  ;;  %v3585_v45 = vld [vmem:[#allocation4 + $0x20] sm:$0xf]  ;;  %v3928_v46 = vld [vmem:[#allocation4 + $0x2c] sm:$0xf0] }
 0x421   :  { %v4053_v4 = vpop.eup %4052  ;;  %v1926_v5 = vadd.f32 %v4049_v57, %v1925_v0  ;;  %v3662_v0 = vor.u32 %v3943_v21, %v3659_v63  ;;  %v3586_v48 = vor.u32 %v3928_v46, %v3585_v45  ;;  %v3924_v21 = vld [vmem:[#allocation4 + $0xc] sm:$0xf0]  ;;  %v3922_v63 = vld [vmem:[#allocation4 + $0x4] sm:$0xf] }
 0x422   :  { %v1945_v7 = vadd.f32 %v4051_v59, %v1944_v2  ;;  %v1962_v8 = vmul.f32 %v4053_v4, %v1960_v56  ;;  %v4055_v11 = vpop.eup %4054  ;;  %vm1967_vm4 = vweird.f32 %v4053_v4  ;;  %v3944_v56 = vld [vmem:[#allocation4 + $0xac] sm:$0xf0] }
 0x423   :  { %v1930_v10 = vsel %vm1929_vm0, %v4049_v57, %v1926_v5  ;;  %vm1968_vm6 = vmor %vm1966_vm5, %vm1967_vm4  ;;  %v3942_v57 = vld [vmem:[#allocation4 + $0xa4] sm:$0xf]  ;;  %v3650_v58 = vor.u32 %v3944_v56, %v3649_v55  ;;  %v3940_v2 = vld [vmem:[#allocation4 + $0x8c] sm:$0xf0]  ;;  %2544 = vmatpush.bf16.msrb.mxu3 %v3662_v0  ;;  %v3590_v55 = vor.u32 %v3926_v49, %v3587_v50 }
 0x424   :  { %v1935_v12 = vsel %vm1932_vm2, %v1934_v6, %v1930_v10  ;;  %v1949_v13 = vsel %vm1948_vm1, %v4051_v59, %v1945_v7  ;;  %v1963_v14 = vsub.f32 1.0, %v1962_v8  ;;  %v3651_v59 = vld [vmem:[#allocation4 + $0xb0] sm:$0xf0]  ;;  %2531 = vmatpush.bf16.msrb.mxu2 %v3658_v20  ;;  %v3641_v6 = vld [vmem:[#allocation4 + $0x88] sm:$0xf] }
 0x425   :  { %v1954_v15 = vsel %vm1951_vm3, %v1953_v9, %v1949_v13  ;;  %v1977_v16 = vmul.f32 %v4055_v11, %v1935_v12  ;;  %v3654_v62 = vor.u32 %v3942_v57, %v3651_v59  ;;  %v3635_v5 = vld [vmem:[#allocation4 + $0x90] sm:$0xf0]  ;;  %v3941_v7 = vld [vmem:[#allocation4 + $0x94] sm:$0xf0]  ;;  %v3939_v10 = vld [vmem:[#allocation4 + $0x8c] sm:$0xf] }
 0x426   :  { %v1976_v17 = vmul.f32 %v1954_v15, %v4213_v51  ;;  %v1964_v18 = vmul.f32 %v4053_v4, %v1963_v14  ;;  %v3681_v51 = vld [vmem:[#allocation4 + $0xe0] sm:$0xf]  ;;  %v3638_v8 = vor.u32 %v3938_v3, %v3635_v5  ;;  %v3642_v9 = vor.u32 %v3941_v7, %v3641_v6  ;;  %v3643_v11 = vld [vmem:[#allocation4 + $0x98] sm:$0xf0]  ;;  %v2234_v13 = vld [vmem:[#allocation5 + $0xc8] sm:$0xff] }
 0x427   :  { %v3682_v31 = vor.u32 %v3952_v52, %v3681_v51  ;;  %2518 = vmatpush.bf16.msrb.mxu1 %v3654_v62  ;;  %v2233_v12 = vld [vmem:[#allocation5 + $0xc0] sm:$0xff]  ;;  %v3646_v14 = vor.u32 %v3939_v10, %v3643_v11  ;;  %v3929_v56 = vld [vmem:[#allocation4 + $0x34] sm:$0xf0]  ;;  %v3927_v57 = vld [vmem:[#allocation4 + $0x2c] sm:$0xf] }
 0x428   :  { %v4217_v19 = vadd.f32 %v1977_v16, %v1976_v17  ;;  %v1965_v22 = vadd.f32 %v4053_v4, %v1964_v18  ;;  %2532 = vmatpush.bf16.msrb.mxu2 %v3642_v9  ;;  %v3617_v15 = vld [vmem:[#allocation4 + $0x60] sm:$0xf]  ;;  %v3936_v16 = vld [vmem:[#allocation4 + $0x6c] sm:$0xf0]  ;;  %v3934_v17 = vld [vmem:[#allocation4 + $0x64] sm:$0xf]  ;;  %v3594_v61 = vor.u32 %v3929_v56, %v3593_v54 }
 0x429   :  { %2503 = vmatpush.bf16.msrb.mxu0 %v3682_v31  ;;  %2545 = vmatpush.bf16.msrb.mxu3 %v3646_v14  ;;  %v3618_v18 = vor.u32 %v3936_v16, %v3617_v15  ;;  %v3601_v31 = vld [vmem:[#allocation4 + $0x40] sm:$0xf]  ;;  %v3577_v5 = vld [vmem:[#allocation4 + $0x8] sm:$0xf]  ;;  %v3925_v6 = vld [vmem:[#allocation4 + $0x14] sm:$0xf0] }
 0x42a   :  { %4056 = vtanh.f32 %v4217_v19  ;;  %v1969_v25 = vsel %vm1968_vm6, %v4053_v4, %v1965_v22  ;;  %v3634_v4 = vor.u32 %v3940_v2, %v3633_v1  ;;  %v3619_v22 = vld [vmem:[#allocation4 + $0x70] sm:$0xf0]  ;;  %v3602_v34 = vor.u32 %v3932_v32, %v3601_v31  ;;  %v3569_v20 = vld [vmem:[#allocation4] sm:$0xf]  ;;  %v3923_v9 = vld [vmem:[#allocation4 + $0xc] sm:$0xf] }
 0x42b   :  { %v1974_v28 = vsel %vm1971_vm7, %v1973_v26, %v1969_v25  ;;  %2519 = vmatpush.bf16.msrb.mxu1 %v3638_v8  ;;  %v3622_v25 = vor.u32 %v3934_v17, %v3619_v22  ;;  %v3626_v26 = vor.u32 %v3937_v24, %v3625_v23  ;;  %v3570_v3 = vor.u32 %v3924_v21, %v3569_v20  ;;  %v3579_v10 = vld [vmem:[#allocation4 + $0x18] sm:$0xf0]  ;;  %v2235_v22 = vld [vmem:[#allocation5 + $0xd0] sm:$0xff]  ;;  %v2557_v20 = vld [vmem:[#allocation5 + $0xe8] sm:$0xff] }
 0x42c   :  { %v3578_v8 = vor.u32 %v3925_v6, %v3577_v5 }
 0x42d   :  { %2504 = vmatpush.bf16.msrb.mxu0 %v3666_v43  ;;  %2533 = vmatpush.bf16.msrb.mxu2 %v3626_v26  ;;  %v3931_v43 = vld [vmem:[#allocation4 + $0x4c] sm:$0xf] }
 0x42e   :  { %v3614_v47 = vor.u32 %v3931_v43, %v3611_v44 }
 0x42f   :  { %2520 = vmatpush.bf16.msrb.mxu1 %v3622_v25 }
 0x430   :  { %v4057_v27 = vpop.eup %4056 }
 0x431   :  { %v1980_v29 = vmul.f32 %v4057_v27, %v1974_v28  ;;  %2505 = vmatpush.bf16.msrb.mxu0 %v3650_v58  ;;  %v3935_v27 = vld [vmem:[#allocation4 + $0x6c] sm:$0xf]  ;;  %v3627_v28 = vld [vmem:[#allocation4 + $0x78] sm:$0xf0]  ;;  %2534 = vmatpush.bf16.msrb.mxu2 %v3610_v42 }
 0x432   :  { %v3630_v51 = vor.u32 %v3935_v27, %v3627_v28  ;;  %v3595_v58 = vld [vmem:[#allocation4 + $0x38] sm:$0xf0] }
 0x433   :  { %1984 = vst [vmem:[#allocation8 + $0x28] sm:$0xff] %v1980_v29  ;;  %v1987_v30 = vpack.c.bf16 %v1980_v29, %v1980_v29  ;;  %2521 = vmatpush.bf16.msrb.mxu1 %v3606_v41  ;;  %v3598_v62 = vor.u32 %v3927_v57, %v3595_v58 }
 0x434   :  { %2546 = vmatpush.bf16.msrb.mxu3 %v3630_v51 }
 0x435   :  { %2188 = vmatmul.bf16.vlgmr.msra.gmra.mxu0 %v1987_v30  ;;  %2201 = vmatmul.bf16.vlgmr.msra.gmra.mxu1 %v1987_v30 }
 0x436   :  { %2214 = vmatmul.bf16.vlgmr.msra.gmra.mxu2 %v1987_v30  ;;  %2227 = vmatmul.bf16.vlgmr.msra.gmra.mxu3 %v1987_v30 }
 0x437   :  { %2506 = vmatpush.bf16.msrb.mxu0 %v3634_v4  ;;  %v3571_v4 = vld [vmem:[#allocation4 + $0x10] sm:$0xf0]  ;;  %2522 = vmatpush.bf16.msrb.mxu1 %v3590_v55 }
 0x438   :  { %2547 = vmatpush.bf16.msrb.mxu3 %v3614_v47  ;;  %2535 = vmatpush.bf16.msrb.mxu2 %v3594_v61  ;;  %v3574_v7 = vor.u32 %v3922_v63, %v3571_v4  ;;  %v2559_v4 = vld [vmem:[#allocation5 + $0xf8] sm:$0xff] }
 0x43b   :  { %2507 = vmatpush.bf16.msrb.mxu0 %v3618_v18  ;;  %2523 = vmatpush.bf16.msrb.mxu1 %v3574_v7 }
 0x43c   :  { %2548 = vmatpush.bf16.msrb.mxu3 %v3598_v62  ;;  %2536 = vmatpush.bf16.msrb.mxu2 %v3578_v8 }
 0x43f   :  { %2508 = vmatpush.bf16.msrb.mxu0 %v3602_v34 }
 0x443   :  { %2509 = vmatpush.bf16.msrb.mxu0 %v3586_v48 }
 0x447   :  { %2510 = vmatpush.bf16.msrb.mxu0 %v3570_v3 }
 0x4b2   :  { %v2189_v29 = vpop.f32.mrf.mxu0  ;;  %v2202_v30 = vpop.f32.mrf.mxu1 }
 0x4b3   :  { %v2237_v52 = vadd.f32 %v2233_v12, %v2189_v29  ;;  %v2238_v53 = vadd.f32 %v2234_v13, %v2202_v30  ;;  %v3582_v13 = vor.u32 %v3923_v9, %v3579_v10 }
 0x4b5   :  { %v3564_v38 = vmul.f32 -1.442695, %v2237_v52  ;;  %v3565_v39 = vmul.f32 -1.442695, %v2238_v53  ;;  %2549 = vmatpush.bf16.msrb.mxu3 %v3582_v13 }
 0x4b7   :  { %4058 = vpow2.f32 %v3564_v38 }
 0x4b8   :  { %4060 = vpow2.f32 %v3565_v39 }
 0x4b9   :  { %v2215_v59 = vpop.f32.mrf.mxu2  ;;  %v2228_v60 = vpop.f32.mrf.mxu3 }
 0x4ba   :  { %v2240_v0 = vadd.f32 %v2236_v40, %v2228_v60  ;;  %v2191_v1 = vpop.f32.mrf.mxu0  ;;  %v2204_v2 = vpop.f32.mrf.mxu1  ;;  %v2239_v26 = vadd.f32 %v2235_v22, %v2215_v59 }
 0x4bc   :  { %v3566_v11 = vmul.f32 -1.442695, %v2240_v0 }
 0x4bd   :  { %v4059_v12 = vpop.eup %4058 }
 0x4be   :  { %v4061_v14 = vpop.eup %4060  ;;  %v2244_v15 = vadd.f32 1.0, %v4059_v12  ;;  %4062 = vpow2.f32 %v3566_v11 }
 0x4bf   :  { %v2263_v16 = vadd.f32 1.0, %v4061_v14 }
 0x4c0   :  { %4064 = vrcp.f32 %v2244_v15  ;;  %v2256_v52 = vand.u32 2147483648, %v2244_v15  ;;  %v2254_v32 = vand.u32 2147483647, %v2244_v15  ;;  %vm2250_vm10 = vweird.f32 %v2244_v15 }
 0x4c1   :  { %4066 = vrcp.f32 %v2263_v16  ;;  %v2217_v17 = vpop.f32.mrf.mxu2  ;;  %v2230_v18 = vpop.f32.mrf.mxu3  ;;  %v2275_v53 = vand.u32 2147483648, %v2263_v16  ;;  %v2273_v34 = vand.u32 2147483647, %v2263_v16  ;;  %vm2269_vm11 = vweird.f32 %v2263_v16 }
 0x4c2   :  { %v2257_v37 = vor.u32 1.1754944e-38, %v2256_v52  ;;  %vm2255_vm14 = vcmp.eq.f32.partialorder %v2254_v32, 8.507059e+37  ;;  %v2558_v17 = vld [vmem:[#allocation5 + $0xf0] sm:$0xff] }
 0x4c3   :  { %v2276_v40 = vor.u32 1.1754944e-38, %v2275_v53  ;;  %vm2274_vm15 = vcmp.eq.f32.partialorder %v2273_v34, 8.507059e+37 }
 0x4c4   :  { %v4063_v23 = vpop.eup %4062 }
 0x4c5   :  { %v2283_v24 = vadd.f32 1.0, %v4063_v23 }
 0x4c6   :  { %v4065_v25 = vpop.eup %4064 }
 0x4c7   :  { %v4067_v27 = vpop.eup %4066  ;;  %v2246_v28 = vmul.f32 %v4065_v25, %v2244_v15  ;;  %4068 = vrcp.f32 %v2283_v24  ;;  %vm2251_vm8 = vweird.f32 %v4065_v25  ;;  %v2295_v55 = vand.u32 2147483648, %v2283_v24 }
 0x4c8   :  { %v2265_v29 = vmul.f32 %v4067_v27, %v2263_v16  ;;  %4070 = vtanh.f32 %v2239_v26  ;;  %vm2270_vm9 = vweird.f32 %v4067_v27  ;;  %vm2252_vm12 = vmor %vm2250_vm10, %vm2251_vm8  ;;  %vm2289_vm1 = vweird.f32 %v2283_v24 }
 0x4c9   :  { %v2247_v30 = vsub.f32 1.0, %v2246_v28  ;;  %vm2271_vm13 = vmor %vm2269_vm11, %vm2270_vm9  ;;  %v2293_v56 = vand.u32 2147483647, %v2283_v24  ;;  %v2296_v58 = vor.u32 1.1754944e-38, %v2295_v55 }
 0x4ca   :  { %v2266_v51 = vsub.f32 1.0, %v2265_v29 }
 0x4cb   :  { %v2248_v31 = vmul.f32 %v4065_v25, %v2247_v30  ;;  %vm2294_vm3 = vcmp.eq.f32.partialorder %v2293_v56, 8.507059e+37 }
 0x4cc   :  { %v2267_v33 = vmul.f32 %v4067_v27, %v2266_v51 }
 0x4cd   :  { %v4069_v35 = vpop.eup %4068  ;;  %v2249_v36 = vadd.f32 %v4065_v25, %v2248_v31 }
 0x4ce   :  { %v2268_v38 = vadd.f32 %v4067_v27, %v2267_v33  ;;  %v2285_v39 = vmul.f32 %v4069_v35, %v2283_v24  ;;  %v4071_v42 = vpop.eup %4070  ;;  %vm2290_vm0 = vweird.f32 %v4069_v35 }
 0x4cf   :  { %v2253_v41 = vsel %vm2252_vm12, %v4065_v25, %v2249_v36  ;;  %vm2291_vm2 = vmor %vm2289_vm1, %vm2290_vm0 }
 0x4d0   :  { %v2258_v43 = vsel %vm2255_vm14, %v2257_v37, %v2253_v41  ;;  %v2272_v44 = vsel %vm2271_vm13, %v4067_v27, %v2268_v38  ;;  %v2286_v45 = vsub.f32 1.0, %v2285_v39 }
 0x4d1   :  { %v2277_v46 = vsel %vm2274_vm15, %v2276_v40, %v2272_v44  ;;  %v2300_v47 = vmul.f32 %v4071_v42, %v2258_v43 }
 0x4d2   :  { %v2299_v48 = vmul.f32 %v2277_v46, %v4217_v19  ;;  %v2287_v49 = vmul.f32 %v4069_v35, %v2286_v45  ;;  %v2556_v19 = vld [vmem:[#allocation5 + $0xe0] sm:$0xff] }
 0x4d4   :  { %v4221_v50 = vadd.f32 %v2300_v47, %v2299_v48  ;;  %v2288_v54 = vadd.f32 %v4069_v35, %v2287_v49 }
 0x4d6   :  { %4072 = vtanh.f32 %v4221_v50  ;;  %v2292_v57 = vsel %vm2291_vm2, %v4069_v35, %v2288_v54 }
 0x4d7   :  { %v2297_v60 = vsel %vm2294_vm3, %v2296_v58, %v2292_v57 }
 0x4dc   :  { %v4073_v59 = vpop.eup %4072 }
 0x4dd   :  { %v2303_v61 = vmul.f32 %v4073_v59, %v2297_v60 }
 0x4df   :  { %2307 = vst [vmem:[#allocation8 + $0x30] sm:$0xff] %v2303_v61  ;;  %v2310_v62 = vpack.c.bf16 %v2303_v61, %v2303_v61 }
 0x4e1   :  { %2511 = vmatmul.bf16.vlgmr.msrb.gmra.mxu0 %v2310_v62  ;;  %2524 = vmatmul.bf16.vlgmr.msrb.gmra.mxu1 %v2310_v62 }
 0x4e2   :  { %2537 = vmatmul.bf16.vlgmr.msrb.gmra.mxu2 %v2310_v62  ;;  %2550 = vmatmul.bf16.vlgmr.msrb.gmra.mxu3 %v2310_v62 }
 0x55e   :  { %v2512_v21 = vpop.f32.mrf.mxu0  ;;  %v2525_v63 = vpop.f32.mrf.mxu1 }
 0x55f   :  { %v2560_v0 = vadd.f32 %v2556_v19, %v2512_v21  ;;  %v2561_v1 = vadd.f32 %v2557_v20, %v2525_v63 }
 0x561   :  { %v3695_v2 = vmul.f32 -1.442695, %v2560_v0  ;;  %v3696_v3 = vmul.f32 -1.442695, %v2561_v1 }
 0x563   :  { %4074 = vpow2.f32 %v3695_v2 }
 0x564   :  { %4076 = vpow2.f32 %v3696_v3 }
 0x565   :  { %v2538_v5 = vpop.f32.mrf.mxu2  ;;  %v2551_v6 = vpop.f32.mrf.mxu3 }
 0x566   :  { %v2563_v7 = vadd.f32 %v2559_v4, %v2551_v6  ;;  %v2514_v8 = vpop.f32.mrf.mxu0  ;;  %v2527_v9 = vpop.f32.mrf.mxu1  ;;  %v2562_v24 = vadd.f32 %v2558_v17, %v2538_v5 }
 0x568   :  { %v3697_v10 = vmul.f32 -1.442695, %v2563_v7 }
 0x569   :  { %v4075_v11 = vpop.eup %4074 }
 0x56a   :  { %v4077_v12 = vpop.eup %4076  ;;  %v2567_v13 = vadd.f32 1.0, %v4075_v11  ;;  %4078 = vpow2.f32 %v3697_v10 }
 0x56b   :  { %v2586_v14 = vadd.f32 1.0, %v4077_v12 }
 0x56c   :  { %4080 = vrcp.f32 %v2567_v13  ;;  %v2579_v30 = vand.u32 2147483648, %v2567_v13  ;;  %v2577_v53 = vand.u32 2147483647, %v2567_v13  ;;  %vm2573_vm6 = vweird.f32 %v2567_v13 }
 0x56d   :  { %4082 = vrcp.f32 %v2586_v14  ;;  %v2540_v15 = vpop.f32.mrf.mxu2  ;;  %v2553_v16 = vpop.f32.mrf.mxu3  ;;  %v2598_v51 = vand.u32 2147483648, %v2586_v14  ;;  %v2596_v32 = vand.u32 2147483647, %v2586_v14  ;;  %vm2592_vm7 = vweird.f32 %v2586_v14 }
 0x56e   :  { %v2580_v35 = vor.u32 1.1754944e-38, %v2579_v30  ;;  %vm2578_vm10 = vcmp.eq.f32.partialorder %v2577_v53, 8.507059e+37 }
 0x56f   :  { %v2599_v38 = vor.u32 1.1754944e-38, %v2598_v51  ;;  %vm2597_vm11 = vcmp.eq.f32.partialorder %v2596_v32, 8.507059e+37 }
 0x570   :  { %v4079_v18 = vpop.eup %4078 }
 0x571   :  { %v2606_v22 = vadd.f32 1.0, %v4079_v18 }
 0x572   :  { %v4081_v23 = vpop.eup %4080 }
 0x573   :  { %v4083_v25 = vpop.eup %4082  ;;  %v2569_v26 = vmul.f32 %v4081_v23, %v2567_v13  ;;  %4084 = vrcp.f32 %v2606_v22  ;;  %vm2574_vm4 = vweird.f32 %v4081_v23  ;;  %v2618_v54 = vand.u32 2147483648, %v2606_v22 }
 0x574   :  { %v2588_v27 = vmul.f32 %v4083_v25, %v2586_v14  ;;  %4086 = vtanh.f32 %v2562_v24  ;;  %vm2593_vm5 = vweird.f32 %v4083_v25  ;;  %vm2575_vm8 = vmor %vm2573_vm6, %vm2574_vm4  ;;  %vm2612_vm13 = vweird.f32 %v2606_v22 }
 0x575   :  { %v2570_v28 = vsub.f32 1.0, %v2569_v26  ;;  %vm2594_vm9 = vmor %vm2592_vm7, %vm2593_vm5  ;;  %v2616_v55 = vand.u32 2147483647, %v2606_v22  ;;  %v2619_v57 = vor.u32 1.1754944e-38, %v2618_v54 }
 0x576   :  { %v2589_v29 = vsub.f32 1.0, %v2588_v27 }
 0x577   :  { %v2571_v52 = vmul.f32 %v4081_v23, %v2570_v28  ;;  %vm2617_vm15 = vcmp.eq.f32.partialorder %v2616_v55, 8.507059e+37 }
 0x578   :  { %v2590_v31 = vmul.f32 %v4083_v25, %v2589_v29 }
 0x579   :  { %v4085_v33 = vpop.eup %4084  ;;  %v2572_v34 = vadd.f32 %v4081_v23, %v2571_v52 }
 0x57a   :  { %v2591_v36 = vadd.f32 %v4083_v25, %v2590_v31  ;;  %v2608_v37 = vmul.f32 %v4085_v33, %v2606_v22  ;;  %v4087_v40 = vpop.eup %4086  ;;  %vm2613_vm12 = vweird.f32 %v4085_v33 }
 0x57b   :  { %v2576_v39 = vsel %vm2575_vm8, %v4081_v23, %v2572_v34  ;;  %vm2614_vm14 = vmor %vm2612_vm13, %vm2613_vm12 }
 0x57c   :  { %v2581_v41 = vsel %vm2578_vm10, %v2580_v35, %v2576_v39  ;;  %v2595_v42 = vsel %vm2594_vm9, %v4083_v25, %v2591_v36  ;;  %v2609_v43 = vsub.f32 1.0, %v2608_v37 }
 0x57d   :  { %v2600_v44 = vsel %vm2597_vm11, %v2599_v38, %v2595_v42  ;;  %v2623_v45 = vmul.f32 %v4087_v40, %v2581_v41 }
 0x57e   :  { %v2622_v46 = vmul.f32 %v2600_v44, %v4221_v50  ;;  %v2610_v47 = vmul.f32 %v4085_v33, %v2609_v43 }
 0x580   :  { %v2624_v48 = vadd.f32 %v2623_v45, %v2622_v46  ;;  %v2611_v49 = vadd.f32 %v4085_v33, %v2610_v47 }
 0x582   :  { %4088 = vtanh.f32 %v2624_v48  ;;  %v2615_v56 = vsel %vm2614_vm14, %v4085_v33, %v2611_v49 }
 0x583   :  { %v2620_v50 = vsel %vm2617_vm15, %v2619_v57, %v2615_v56 }
 0x588   :  { %v4089_v58 = vpop.eup %4088 }
 0x589   :  { %v2626_v59 = vmul.f32 %v4089_v58, %v2620_v50 }
 0x58b   :  { %2630 = vst [vmem:[#allocation8 + $0x38] sm:$0xff] %v2626_v59 }
 0x58c   :  { %2643 = dma.vmem_to_hbm [thread:$0]  %s2636_s1, 1024, %s2638_s23, [#allocation7], %s4174_s24, %s4174_s24, %s4175_s25  }
 0x58d   :  { %4166 = dma.done.wait [#allocation7], 1024  }
 0x58e   :  { %4167 = vsyncadd [#allocation7], 4294966272 }
 0x58f   :  { %2648 = vsyncpa [#allocation6], 1 }
 0x590   :  { %2649 = vsyncpa [#allocation7], 1 }

</bundles_post_ra>
